<compile_context>
chip_gen: v7x
topology: tpu7x:2x2x1
jax: 0.10.0
libtpu: 0.0.40
codegen_flags: <defaults>
</compile_context>

<pallas_src>
import math

import jax
import jax.numpy as jnp
from jax.experimental import pallas as pl
from jax.experimental.pallas import tpu as pltpu

LEAKY_SLOPE = 0.2
BN_EPS = 0.8          # nn.BatchNorm1d(out_feat, 0.8): second positional arg is eps
NOISE_LEVEL = 0.1
HIDDEN = 1024
N_BLOCKS = 5
FIRST_SEED = 10
BLOCK_SEEDS = (40, 50, 60, 70, 80)


def _leaky(v):
    return jnp.where(v >= 0.0, v, LEAKY_SLOPE * v)


def _dequant_bf16(q_i8):
    # i8 -> f32 -> bf16: both conversions are plainly supported by Mosaic; the chain is
    # elementwise and processed vreg-by-vreg, hidden under the next weight slab's DMA.
    return q_i8.astype(jnp.float32).astype(jnp.bfloat16)


# --------------------------------------------------------------------------- kernel
def _generator_kernel(z_ref, w0_ref, shift0_ref,
                      wq_ref, sc_ref, sh_ref,
                      wfq_ref, scf_ref, bf_ref,
                      out_ref, x_sc):
    """One grid step = one ArgNoiseBasicBlock; activation carried in VMEM scratch."""
    i = pl.program_id(0)

    # --- step 0: AlgorithmicNoiseLayer(latent_dim, 1024, normalize=False) ----------
    @pl.when(i == 0)
    def _():
        y0 = jnp.dot(z_ref[...].astype(jnp.bfloat16), w0_ref[...],
                     preferred_element_type=jnp.float32)
        x_sc[...] = _leaky(y0 + shift0_ref[...])            # noise + bias pre-folded

    # --- residual block i -----------------------------------------------------------
    x = x_sc[...]                                            # (B, 1024) f32 carry
    w1 = _dequant_bf16(wq_ref[0, 0])                         # (1024, 1024) bf16
    w2 = _dequant_bf16(wq_ref[0, 1])

    h = jnp.dot(x.astype(jnp.bfloat16), w1, preferred_element_type=jnp.float32)
    h = _leaky(h * sc_ref[0, 0] + sh_ref[0, 0])              # scale = int8 dequant * BN
    y = jnp.dot(h.astype(jnp.bfloat16), w2, preferred_element_type=jnp.float32)
    x = _leaky(y * sc_ref[0, 1] + sh_ref[0, 1] + x)          # residual add in f32
    x_sc[...] = x

    # --- last step: final nn.Linear(1024, C*H*W) -> nn.Tanh() ------------------------
    @pl.when(i == pl.num_programs(0) - 1)
    def _():
        wf = _dequant_bf16(wfq_ref[...])
        yf = jnp.dot(x.astype(jnp.bfloat16), wf, preferred_element_type=jnp.float32)
        out_ref[...] = jnp.tanh(yf * scf_ref[...] + bf_ref[...])


# --------------------------------------------------------------------------- params
def _init_linear(key, in_f, out_f):
    kw, kb = jax.random.split(key)
    bound = 1.0 / math.sqrt(in_f)
    w = jax.random.uniform(kw, (in_f, out_f), jnp.float32, -bound, bound)
    b = jax.random.uniform(kb, (out_f,), jnp.float32, -bound, bound)
    return w, b


def _quantize_per_col(w):
    """Symmetric int8 quantization with per-output-channel scale."""
    amax = jnp.max(jnp.abs(w), axis=0, keepdims=True)            # (1, out)
    scale = jnp.maximum(amax, 1e-8) / 127.0
    q = jnp.clip(jnp.round(w / scale), -127.0, 127.0).astype(jnp.int8)
    return q, scale.astype(jnp.float32)


def build_generator_params(key, latent_dim, img_shape, batch):
    """int8 weights + per-channel scales; bias, eval-BN and seeded noise folded in."""
    out_dim = int(img_shape[0] * img_shape[1] * img_shape[2])
    bn_scale = 1.0 / math.sqrt(1.0 + BN_EPS)   # gamma / sqrt(running_var + eps)

    # layer 0: Linear(latent_dim, 1024), normalize=False -> no BN fold; weight is tiny,
    # keep bf16.  Noise folded: shift0 = (level * n0) @ W0 + b0.
    key, k0 = jax.random.split(key)
    w0, b0 = _init_linear(k0, latent_dim, HIDDEN)
    noise0 = jax.random.normal(jax.random.PRNGKey(FIRST_SEED),
                               (batch, latent_dim), jnp.float32)
    shift0 = (NOISE_LEVEL * noise0) @ w0 + b0                     # (B, 1024)

    # residual blocks: BN scale folded into effective weight, then int8-quantized;
    # per-row noise folded through the (dequantized) first weight into shift[i, 0].
    wres_q, scale_res, shift_res = [], [], []
    for seed in BLOCK_SEEDS:
        key, k1, k2 = jax.random.split(key, 3)
        w1, b1 = _init_linear(k1, HIDDEN, HIDDEN)
        w2, b2 = _init_linear(k2, HIDDEN, HIDDEN)
        noise = jax.random.normal(jax.random.PRNGKey(seed),
                                  (batch, HIDDEN), jnp.float32)

        q1, s1 = _quantize_per_col(w1 * bn_scale)
        q2, s2 = _quantize_per_col(w2 * bn_scale)
        deq1 = q1.astype(jnp.float32) * s1                        # what the kernel sees
        sh1 = (NOISE_LEVEL * noise) @ deq1 + b1 * bn_scale        # (B, 1024)
        sh2 = jnp.broadcast_to(b2 * bn_scale, (batch, HIDDEN))    # (B, 1024)

        wres_q.append(jnp.stack([q1, q2]))                        # (2, 1024, 1024) i8
        scale_res.append(jnp.stack([s1, s2]))                     # (2, 1, 1024) f32
        shift_res.append(jnp.stack([sh1, sh2]))                   # (2, B, 1024) f32

    # final Linear(1024, out_dim) (plain Linear -> Tanh: no BN, no noise, no LeakyReLU)
    key, kf = jax.random.split(key)
    wf, bfb = _init_linear(kf, HIDDEN, out_dim)
    qf, sf = _quantize_per_col(wf)

    return dict(
        w0=w0.astype(jnp.bfloat16),                               # (latent, 1024) bf16
        shift0=shift0,                                            # (B, 1024) f32
        wres_q=jnp.stack(wres_q),                                 # (5, 2, 1024, 1024) i8
        scale_res=jnp.stack(scale_res),                           # (5, 2, 1, 1024) f32
        shift_res=jnp.stack(shift_res),                           # (5, 2, B, 1024) f32
        wf_q=qf,                                                  # (1024, out_dim) i8
        scale_f=sf,                                               # (1, out_dim) f32
        bf=bfb.reshape(1, out_dim),                               # (1, out_dim) f32
    )


# --------------------------------------------------------------------------- forward
def generator_forward(params, z, img_shape):
    B, latent = z.shape
    out_dim = int(img_shape[0] * img_shape[1] * img_shape[2])

    grid_spec = pltpu.PrefetchScalarGridSpec(
        num_scalar_prefetch=0,
        grid=(N_BLOCKS,),                                  # one step per residual block
        in_specs=[
            pl.BlockSpec((B, latent), lambda i: (0, 0)),             # z (loaded once)
            pl.BlockSpec((latent, HIDDEN), lambda i: (0, 0)),        # w0
            pl.BlockSpec((B, HIDDEN), lambda i: (0, 0)),             # shift0
            pl.BlockSpec((1, 2, HIDDEN, HIDDEN), lambda i: (i, 0, 0, 0)),  # streamed i8
            pl.BlockSpec((1, 2, 1, HIDDEN), lambda i: (i, 0, 0, 0)),       # scales
            pl.BlockSpec((1, 2, B, HIDDEN), lambda i: (i, 0, 0, 0)),       # shifts
            pl.BlockSpec((HIDDEN, out_dim), lambda i: (0, 0)),       # wf (int8)
            pl.BlockSpec((1, out_dim), lambda i: (0, 0)),            # scale_f
            pl.BlockSpec((1, out_dim), lambda i: (0, 0)),            # bf
        ],
        out_specs=pl.BlockSpec((B, out_dim), lambda i: (0, 0)),      # written at last i
        scratch_shapes=[pltpu.VMEM((B, HIDDEN), jnp.float32)],       # activation carry
    )

    img_flat = pl.pallas_call(
        _generator_kernel,
        out_shape=jax.ShapeDtypeStruct((B, out_dim), jnp.float32),
        grid_spec=grid_spec,
        compiler_params=pltpu.CompilerParams(
            dimension_semantics=("arbitrary",),        # sequential layer dependency
            vmem_limit_bytes=32 * 1024 * 1024,         # streamed design needs ~10 MB
        ),
    )(z, params["w0"], params["shift0"],
      params["wres_q"], params["scale_res"], params["shift_res"],
      params["wf_q"], params["scale_f"], params["bf"])

    return img_flat.reshape(B, *img_shape)   # NCHW, matches img.view(B, *img_shape)


# --------------------------------------------------------------------------- main
if __name__ == "__main__":
    # opt: dataset='mnist' -> channels=1; small img_size=16; latent_dim=32; batch=2
    batch, latent_dim, img_size, channels = 2, 32, 16, 1
    img_shape = (channels, img_size, img_size)

    root = jax.random.PRNGKey(0)
    k_params, k_z = jax.random.split(root)

    params = build_generator_params(k_params, latent_dim, img_shape, batch)
    z = jax.random.normal(k_z, (batch, latent_dim), jnp.float32)

    img = generator_forward(params, z, img_shape)
    img = jax.block_until_ready(img)

    assert img.shape == (batch, channels, img_size, img_size), img.shape
    assert bool(jnp.all(jnp.isfinite(img)))
    assert bool(jnp.all(jnp.abs(img) <= 1.0 + 1e-6))   # tanh output range
    print("KERNEL_OK")
</pallas_src>

<mosaic_0001>
module attributes {stable_mosaic.version = 11 : i64} {
  func.func @_generator_kernel(%arg0: i32, %arg1: memref<2x32xf32, #tpu.memory_space<vmem>>, %arg2: memref<32x1024xbf16, #tpu.memory_space<vmem>>, %arg3: memref<2x1024xf32, #tpu.memory_space<vmem>>, %arg4: memref<1x2x1024x1024xi8, #tpu.memory_space<vmem>>, %arg5: memref<1x2x1x1024xf32, #tpu.memory_space<vmem>>, %arg6: memref<1x2x2x1024xf32, #tpu.memory_space<vmem>>, %arg7: memref<1024x256xi8, #tpu.memory_space<vmem>>, %arg8: memref<1x256xf32, #tpu.memory_space<vmem>>, %arg9: memref<1x256xf32, #tpu.memory_space<vmem>>, %arg10: memref<2x256xf32, #tpu.memory_space<vmem>>, %arg11: memref<2x1024xf32, #tpu.memory_space<vmem>>) attributes {dimension_semantics = [#tpu.dimension_semantics<arbitrary>], iteration_bounds = array<i64: 5>, scalar_prefetch = 0 : i64, scratch_operands = 1 : i64, tpu.core_type = #tpu.core_type<tc>, window_params = [{pipeline_mode = #tpu.pipeline_mode<synchronous>, transform_indices = @transform_0, window_bounds = array<i64: 2, 32>}, {pipeline_mode = #tpu.pipeline_mode<synchronous>, transform_indices = @transform_1, window_bounds = array<i64: 32, 1024>}, {pipeline_mode = #tpu.pipeline_mode<synchronous>, transform_indices = @transform_2, window_bounds = array<i64: 2, 1024>}, {transform_indices = @transform_3, window_bounds = array<i64: 1, 2, 1024, 1024>}, {transform_indices = @transform_4, window_bounds = array<i64: 1, 2, 1, 1024>}, {transform_indices = @transform_5, window_bounds = array<i64: 1, 2, 2, 1024>}, {pipeline_mode = #tpu.pipeline_mode<synchronous>, transform_indices = @transform_6, window_bounds = array<i64: 1024, 256>}, {pipeline_mode = #tpu.pipeline_mode<synchronous>, transform_indices = @transform_7, window_bounds = array<i64: 1, 256>}, {pipeline_mode = #tpu.pipeline_mode<synchronous>, transform_indices = @transform_8, window_bounds = array<i64: 1, 256>}, {pipeline_mode = #tpu.pipeline_mode<synchronous>, transform_indices = @transform_9, window_bounds = array<i64: 2, 256>}]} {
    %c0_i32 = arith.constant 0 : i32
    %0 = arith.cmpi eq, %arg0, %c0_i32 : i32
    %1 = arith.extui %0 : i1 to i32
    %c0_i32_0 = arith.constant 0 : i32
    %2 = arith.cmpi ne, %1, %c0_i32_0 : i32
    scf.if %2 {
      %c0_33 = arith.constant 0 : index
      %c0_34 = arith.constant 0 : index
      %45 = vector.load %arg1[%c0_33, %c0_34] : memref<2x32xf32, #tpu.memory_space<vmem>>, vector<2x32xf32>
      %46 = arith.truncf %45 : vector<2x32xf32> to vector<2x32xbf16>
      %c0_35 = arith.constant 0 : index
      %c0_36 = arith.constant 0 : index
      %47 = vector.load %arg2[%c0_35, %c0_36] : memref<32x1024xbf16, #tpu.memory_space<vmem>>, vector<32x1024xbf16>
      %cst_37 = arith.constant dense<0.000000e+00> : vector<2x1024xf32>
      %48 = tpu.matmul %46, %47, %cst_37 {dimension_numbers = #tpu.dot_dimension_numbers<[1], [0], [0], [1], [0, 0, 1, 1], [], []>} : vector<2x32xbf16>, vector<32x1024xbf16>, vector<2x1024xf32> -> vector<2x1024xf32>
      %c0_38 = arith.constant 0 : index
      %c0_39 = arith.constant 0 : index
      %49 = vector.load %arg3[%c0_38, %c0_39] : memref<2x1024xf32, #tpu.memory_space<vmem>>, vector<2x1024xf32>
      %50 = arith.addf %48, %49 : vector<2x1024xf32>
      %cst_40 = arith.constant 0.000000e+00 : f32
      %51 = vector.broadcast %cst_40 : f32 to vector<2x1024xf32>
      %52 = arith.cmpf oge, %50, %51 : vector<2x1024xf32>
      %cst_41 = arith.constant 2.000000e-01 : f32
      %53 = vector.broadcast %cst_41 : f32 to vector<2x1024xf32>
      %54 = arith.mulf %53, %50 : vector<2x1024xf32>
      %55 = arith.select %52, %50, %54 : vector<2x1024xi1>, vector<2x1024xf32>
      %c0_42 = arith.constant 0 : index
      %c0_43 = arith.constant 0 : index
      %56 = vector.load %arg11[%c0_42, %c0_43] : memref<2x1024xf32, #tpu.memory_space<vmem>>, vector<2x1024xf32>
      tpu.vector_store %arg11[%c0_42, %c0_43], %55 {strides = array<i32>} : memref<2x1024xf32, #tpu.memory_space<vmem>>, vector<2x1024xf32>,
    } else {
    }
    %c0 = arith.constant 0 : index
    %c0_1 = arith.constant 0 : index
    %3 = vector.load %arg11[%c0, %c0_1] : memref<2x1024xf32, #tpu.memory_space<vmem>>, vector<2x1024xf32>
    %c0_2 = arith.constant 0 : index
    %c0_3 = arith.constant 0 : index
    %c0_4 = arith.constant 0 : index
    %c0_5 = arith.constant 0 : index
    %4 = vector.load %arg4[%c0_2, %c0_3, %c0_4, %c0_5] : memref<1x2x1024x1024xi8, #tpu.memory_space<vmem>>, vector<1x1x1024x1024xi8>
    %5 = vector.shape_cast %4 : vector<1x1x1024x1024xi8> to vector<1024x1024xi8>
    %6 = arith.sitofp %5 : vector<1024x1024xi8> to vector<1024x1024xf32>
    %7 = arith.truncf %6 : vector<1024x1024xf32> to vector<1024x1024xbf16>
    %c0_6 = arith.constant 0 : index
    %c1 = arith.constant 1 : index
    %c0_7 = arith.constant 0 : index
    %c0_8 = arith.constant 0 : index
    %8 = vector.load %arg4[%c0_6, %c1, %c0_7, %c0_8] : memref<1x2x1024x1024xi8, #tpu.memory_space<vmem>>, vector<1x1x1024x1024xi8>
    %9 = vector.shape_cast %8 : vector<1x1x1024x1024xi8> to vector<1024x1024xi8>
    %10 = arith.sitofp %9 : vector<1024x1024xi8> to vector<1024x1024xf32>
    %11 = arith.truncf %10 : vector<1024x1024xf32> to vector<1024x1024xbf16>
    %12 = arith.truncf %3 : vector<2x1024xf32> to vector<2x1024xbf16>
    %cst = arith.constant dense<0.000000e+00> : vector<2x1024xf32>
    %13 = tpu.matmul %12, %7, %cst {dimension_numbers = #tpu.dot_dimension_numbers<[1], [0], [0], [1], [0, 0, 1, 1], [], []>} : vector<2x1024xbf16>, vector<1024x1024xbf16>, vector<2x1024xf32> -> vector<2x1024xf32>
    %c0_9 = arith.constant 0 : index
    %c0_10 = arith.constant 0 : index
    %c0_11 = arith.constant 0 : index
    %c0_12 = arith.constant 0 : index
    %14 = vector.load %arg5[%c0_9, %c0_10, %c0_11, %c0_12] : memref<1x2x1x1024xf32, #tpu.memory_space<vmem>>, vector<1x1x1x1024xf32>
    %15 = vector.shape_cast %14 : vector<1x1x1x1024xf32> to vector<1x1024xf32>
    %16 = vector.broadcast %15 : vector<1x1024xf32> to vector<2x1024xf32>
    %17 = arith.mulf %13, %16 : vector<2x1024xf32>
    %c0_13 = arith.constant 0 : index
    %c0_14 = arith.constant 0 : index
    %c0_15 = arith.constant 0 : index
    %c0_16 = arith.constant 0 : index
    %18 = vector.load %arg6[%c0_13, %c0_14, %c0_15, %c0_16] : memref<1x2x2x1024xf32, #tpu.memory_space<vmem>>, vector<1x1x2x1024xf32>
    %19 = vector.shape_cast %18 : vector<1x1x2x1024xf32> to vector<2x1024xf32>
    %20 = arith.addf %17, %19 : vector<2x1024xf32>
    %cst_17 = arith.constant 0.000000e+00 : f32
    %21 = vector.broadcast %cst_17 : f32 to vector<2x1024xf32>
    %22 = arith.cmpf oge, %20, %21 : vector<2x1024xf32>
    %cst_18 = arith.constant 2.000000e-01 : f32
    %23 = vector.broadcast %cst_18 : f32 to vector<2x1024xf32>
    %24 = arith.mulf %23, %20 : vector<2x1024xf32>
    %25 = arith.select %22, %20, %24 : vector<2x1024xi1>, vector<2x1024xf32>
    %26 = arith.truncf %25 : vector<2x1024xf32> to vector<2x1024xbf16>
    %cst_19 = arith.constant dense<0.000000e+00> : vector<2x1024xf32>
    %27 = tpu.matmul %26, %11, %cst_19 {dimension_numbers = #tpu.dot_dimension_numbers<[1], [0], [0], [1], [0, 0, 1, 1], [], []>} : vector<2x1024xbf16>, vector<1024x1024xbf16>, vector<2x1024xf32> -> vector<2x1024xf32>
    %c0_20 = arith.constant 0 : index
    %c1_21 = arith.constant 1 : index
    %c0_22 = arith.constant 0 : index
    %c0_23 = arith.constant 0 : index
    %28 = vector.load %arg5[%c0_20, %c1_21, %c0_22, %c0_23] : memref<1x2x1x1024xf32, #tpu.memory_space<vmem>>, vector<1x1x1x1024xf32>
    %29 = vector.shape_cast %28 : vector<1x1x1x1024xf32> to vector<1x1024xf32>
    %30 = vector.broadcast %29 : vector<1x1024xf32> to vector<2x1024xf32>
    %31 = arith.mulf %27, %30 : vector<2x1024xf32>
    %c0_24 = arith.constant 0 : index
    %c1_25 = arith.constant 1 : index
    %c0_26 = arith.constant 0 : index
    %c0_27 = arith.constant 0 : index
    %32 = vector.load %arg6[%c0_24, %c1_25, %c0_26, %c0_27] : memref<1x2x2x1024xf32, #tpu.memory_space<vmem>>, vector<1x1x2x1024xf32>
    %33 = vector.shape_cast %32 : vector<1x1x2x1024xf32> to vector<2x1024xf32>
    %34 = arith.addf %31, %33 : vector<2x1024xf32>
    %35 = arith.addf %34, %3 : vector<2x1024xf32>
    %cst_28 = arith.constant 0.000000e+00 : f32
    %36 = vector.broadcast %cst_28 : f32 to vector<2x1024xf32>
    %37 = arith.cmpf oge, %35, %36 : vector<2x1024xf32>
    %cst_29 = arith.constant 2.000000e-01 : f32
    %38 = vector.broadcast %cst_29 : f32 to vector<2x1024xf32>
    %39 = arith.mulf %38, %35 : vector<2x1024xf32>
    %40 = arith.select %37, %35, %39 : vector<2x1024xi1>, vector<2x1024xf32>
    %c0_30 = arith.constant 0 : index
    %c0_31 = arith.constant 0 : index
    %41 = vector.load %arg11[%c0_30, %c0_31] : memref<2x1024xf32, #tpu.memory_space<vmem>>, vector<2x1024xf32>
    tpu.vector_store %arg11[%c0_30, %c0_31], %40 {strides = array<i32>} : memref<2x1024xf32, #tpu.memory_space<vmem>>, vector<2x1024xf32>,
    %c4_i32 = arith.constant 4 : i32
    %42 = arith.cmpi eq, %arg0, %c4_i32 : i32
    %43 = arith.extui %42 : i1 to i32
    %c0_i32_32 = arith.constant 0 : i32
    %44 = arith.cmpi ne, %43, %c0_i32_32 : i32
    scf.if %44 {
      %c0_33 = arith.constant 0 : index
      %c0_34 = arith.constant 0 : index
      %45 = vector.load %arg7[%c0_33, %c0_34] : memref<1024x256xi8, #tpu.memory_space<vmem>>, vector<1024x256xi8>
      %46 = arith.sitofp %45 : vector<1024x256xi8> to vector<1024x256xf32>
      %47 = arith.truncf %46 : vector<1024x256xf32> to vector<1024x256xbf16>
      %48 = arith.truncf %40 : vector<2x1024xf32> to vector<2x1024xbf16>
      %cst_35 = arith.constant dense<0.000000e+00> : vector<2x256xf32>
      %49 = tpu.matmul %48, %47, %cst_35 {dimension_numbers = #tpu.dot_dimension_numbers<[1], [0], [0], [1], [0, 0, 1, 1], [], []>} : vector<2x1024xbf16>, vector<1024x256xbf16>, vector<2x256xf32> -> vector<2x256xf32>
      %c0_36 = arith.constant 0 : index
      %c0_37 = arith.constant 0 : index
      %50 = vector.load %arg8[%c0_36, %c0_37] : memref<1x256xf32, #tpu.memory_space<vmem>>, vector<1x256xf32>
      %51 = vector.broadcast %50 : vector<1x256xf32> to vector<2x256xf32>
      %52 = arith.mulf %49, %51 : vector<2x256xf32>
      %c0_38 = arith.constant 0 : index
      %c0_39 = arith.constant 0 : index
      %53 = vector.load %arg9[%c0_38, %c0_39] : memref<1x256xf32, #tpu.memory_space<vmem>>, vector<1x256xf32>
      %54 = vector.broadcast %53 : vector<1x256xf32> to vector<2x256xf32>
      %55 = arith.addf %52, %54 : vector<2x256xf32>
      %56 = math.tanh %55 : vector<2x256xf32>
      %c0_40 = arith.constant 0 : index
      %c0_41 = arith.constant 0 : index
      %57 = vector.load %arg10[%c0_40, %c0_41] : memref<2x256xf32, #tpu.memory_space<vmem>>, vector<2x256xf32>
      tpu.vector_store %arg10[%c0_40, %c0_41], %56 {strides = array<i32>} : memref<2x256xf32, #tpu.memory_space<vmem>>, vector<2x256xf32>,
    } else {
    }
    return
  }
  func.func @transform_0(%arg0: i32) -> (i32, i32) {
    %c0_i32 = arith.constant 0 : i32
    %c0_i32_0 = arith.constant 0 : i32
    %c0_i32_1 = arith.constant 0 : i32
    return %c0_i32, %c0_i32_0 : i32, i32
  }
  func.func @transform_1(%arg0: i32) -> (i32, i32) {
    %c0_i32 = arith.constant 0 : i32
    %c0_i32_0 = arith.constant 0 : i32
    %c0_i32_1 = arith.constant 0 : i32
    return %c0_i32, %c0_i32_0 : i32, i32
  }
  func.func @transform_2(%arg0: i32) -> (i32, i32) {
    %c0_i32 = arith.constant 0 : i32
    %c0_i32_0 = arith.constant 0 : i32
    %c0_i32_1 = arith.constant 0 : i32
    return %c0_i32, %c0_i32_0 : i32, i32
  }
  func.func @transform_3(%arg0: i32) -> (i32, i32, i32, i32) {
    %c0_i32 = arith.constant 0 : i32
    %c0_i32_0 = arith.constant 0 : i32
    %c0_i32_1 = arith.constant 0 : i32
    %c0_i32_2 = arith.constant 0 : i32
    return %arg0, %c0_i32, %c0_i32_0, %c0_i32_1 : i32, i32, i32, i32
  }
  func.func @transform_4(%arg0: i32) -> (i32, i32, i32, i32) {
    %c0_i32 = arith.constant 0 : i32
    %c0_i32_0 = arith.constant 0 : i32
    %c0_i32_1 = arith.constant 0 : i32
    %c0_i32_2 = arith.constant 0 : i32
    return %arg0, %c0_i32, %c0_i32_0, %c0_i32_1 : i32, i32, i32, i32
  }
  func.func @transform_5(%arg0: i32) -> (i32, i32, i32, i32) {
    %c0_i32 = arith.constant 0 : i32
    %c0_i32_0 = arith.constant 0 : i32
    %c0_i32_1 = arith.constant 0 : i32
    %c0_i32_2 = arith.constant 0 : i32
    return %arg0, %c0_i32, %c0_i32_0, %c0_i32_1 : i32, i32, i32, i32
  }
  func.func @transform_6(%arg0: i32) -> (i32, i32) {
    %c0_i32 = arith.constant 0 : i32
    %c0_i32_0 = arith.constant 0 : i32
    %c0_i32_1 = arith.constant 0 : i32
    return %c0_i32, %c0_i32_0 : i32, i32
  }
  func.func @transform_7(%arg0: i32) -> (i32, i32) {
    %c0_i32 = arith.constant 0 : i32
    %c0_i32_0 = arith.constant 0 : i32
    %c0_i32_1 = arith.constant 0 : i32
    return %c0_i32, %c0_i32_0 : i32, i32
  }
  func.func @transform_8(%arg0: i32) -> (i32, i32) {
    %c0_i32 = arith.constant 0 : i32
    %c0_i32_0 = arith.constant 0 : i32
    %c0_i32_1 = arith.constant 0 : i32
    return %c0_i32, %c0_i32_0 : i32, i32
  }
  func.func @transform_9(%arg0: i32) -> (i32, i32) {
    %c0_i32 = arith.constant 0 : i32
    %c0_i32_0 = arith.constant 0 : i32
    %c0_i32_1 = arith.constant 0 : i32
    return %c0_i32, %c0_i32_0 : i32, i32
  }
}

</mosaic_0001>

<bundles_post_ra>
// kernel: tpu_custom_call.1
= control target key start
LH: loop header
LB: loop body
LE: loop exit
PB: predicated region body
PF: predicated region fallthrough
CT: control target
= control target key end

     0   :  { %s6883_s0 = inlined_call_operand.hbm [shape: f32[2,32], index: 0, kind: input, shape index: {}]   ;;  %s6884_s1 = inlined_call_operand.hbm [shape: bf16[32,1024], index: 1, kind: input, shape index: {}]   ;;  %s6885_s2 = inlined_call_operand.hbm [shape: f32[2,1024], index: 2, kind: input, shape index: {}]   ;;  %s6886_s3 = inlined_call_operand.hbm [shape: s8[5,2,1024,1024], index: 3, kind: input, shape index: {}]   ;;  %s6887_s4 = inlined_call_operand.hbm [shape: f32[5,2,1,1024], index: 4, kind: input, shape index: {}]   ;;  %s6888_s5 = inlined_call_operand.hbm [shape: f32[5,2,2,1024], index: 5, kind: input, shape index: {}]   ;;  %s6889_s6 = inlined_call_operand.hbm [shape: s8[1024,256], index: 6, kind: input, shape index: {}]   ;;  %s6890_s7 = inlined_call_operand.hbm [shape: f32[1,256], index: 7, kind: input, shape index: {}]   ;;  %s6891_s8 = inlined_call_operand.hbm [shape: f32[1,256], index: 8, kind: input, shape index: {}]   ;;  %s6892_s9 = inlined_call_operand.hbm [shape: f32[2,256], index: 9, kind: output, shape index: {}]  }
   0x1   :  { %6911 = sst [smem:[#allocation29_spill]] %s6884_s1 }
   0x2   :  { %6912 = sst [smem:[#allocation30_spill]] %s6886_s3 }
   0x3   :  { %6913 = sst [smem:[#allocation31_spill]] %s6889_s6 }
   0x4   :  { %6914 = sst [smem:[#allocation32_spill]] %s6890_s7 }
   0x5   :  { %6915 = sst [smem:[#allocation33_spill]] %s6892_s9 }
   0x6   :  { %14 = vsyncpa [#allocation4], 0 }
   0x7   :  { %15 = vsyncpa [#allocation7], 0 }
   0x8   :  { %16 = vsyncpa [#allocation10], 0 }
   0x9   :  { %18 = vsyncpa [#allocation10 + $0x1], 0 }
   0xa   :  { %19 = vsyncpa [#allocation13], 0 }
   0xb   :  { %21 = vsyncpa [#allocation13 + $0x1], 0 }
   0xc   :  { %22 = vsyncpa [#allocation16], 0 }
   0xd   :  { %23 = vsyncpa [#allocation5], 0  ;;  %s5653_s30 = smov 0   ;;  %s5655_s10 = smov 0  }
   0xe   :  { %s5657_s11 = smov 0   ;;  %s5659_s12 = smov 0  }
   0xf LB: > { %6916 = sst [smem:[#allocation26_spill]] %s5576_s11  ;;  %s5582_s13 = smov [#allocation6]   ;;  %s5580_s12 = sphi %s5659_s12, %s6949_s12   ;;  %s5576_s11 = sphi %s5657_s11, %s6951_s11   ;;  %s5572_s10 = sphi %s5655_s10, %s6953_s10   ;;  %s5568_s30 = sphi %s5653_s30, %s6952_s30  }
  0x10   : > { %s282_s14 = sshll.u32 %s5582_s13, 4  ;;  %s5674_s15 = sadd.s32 4294967295, %s5580_s12   ;;  %s5680_s14 = int_to_ptr.vmem [resolvable:$true] %s282_s14 }
  0x11   : > { %p4675_p0 = scmp.ge.s32.totalorder %s5580_s12, 1  ;;  %p6894_p1 = scmp.eq.s32.totalorder %s5674_s15, 0 }
  0x12   : > { %p259_p2 = scmp.lt.s32.totalorder %s5580_s12, 6  ;;  %s5583_s17 = smov [#allocation14]  }
  0x13   : > { %s306_s18 = sshll.u32 %s5583_s17, 4  ;;  %s5584_s20 = smov [#allocation15]   ;;  %s5694_s18 = int_to_ptr.vmem [resolvable:$true] %s306_s18 }
  0x14   : > { %p5682_p4 = pnand %p4675_p0, %p259_p2  ;;  %s5696_s21 = sshll.u32 %s5584_s20, 4  ;;  %s321_s21 = int_to_ptr.vmem [resolvable:$true] %s5696_s21 }
  0x15   : > { %s6919_s1 = sld [smem:[#allocation29_spill]] }
  0x16   : > { %s6917_s16 = scalar_select %p5682_p4, 1, 0 }
  0x17   : > { %p5131_p5 = pneg %p5682_p4 }
  0x19   : > { %p5690_p6 = pnand %p5131_p5, %p6894_p1 }
  0x1b   : > { %s6918_s19 = scalar_select %p5690_p6, 1, 0 }
  0x1c   : > { %s5238_s24 = scalar_lea.hbm %s6919_s1, 2048  ;;  %p5706_p8 = pneg %p5690_p6 }
  0x1d   : > { %p5239_p7 = scmp.ne.s32.totalorder %s6919_s1, %s5238_s24  ;;  %p5245_p11 = scmp.lt.u32.totalorder %s5238_s24, %s6919_s1 }
  0x1e   : > { %s6920_s27 = scalar_select %p5706_p8, 1, 0 }
  0x1f   : > { %p5241_p9 = pnand %p5706_p8, %p5239_p7 }
  0x21   : > { %p5242_p10 = pneg %p5241_p9 }
  0x23   : > { %p5247_p12 = pnand %p5245_p11, %p5242_p10 }
  0x25   : > { %5250 = shalt.err (!%p5247_p12)
}
  0x26   : > { %s5251_s13 = scalar_lea.vmem %s5680_s14, 2048  ;;  %p5259_p5 = scmp.lt.s32.totalorder %s5680_s14, %s5680_s14 }
  0x27   : > { %p5252_p13 = scmp.ne.s32.totalorder %s5680_s14, %s5251_s13  ;;  %p5260_p3 = scmp.lt.s32.totalorder %s5251_s13, %s5251_s13 }
  0x29   : > { %p5254_p0 = pnand %p5252_p13, %p5706_p8  ;;  %p5261_p7 = por %p5260_p3, %p5259_p5 }
  0x2b   : > { %p5255_p2 = pneg %p5254_p0 }
  0x2d   : > { %p5262_p9 = pnand %p5261_p7, %p5255_p2 }
  0x2f   : > { %5265 = shalt.err (!%p5262_p9)
}
  0x30   : > { %s5585_s17 = smov 512   ;;  %s5586_s20 = smov 32  }
  0x31   : > { %5137 = dma.hbm_to_vmem [thread:$0]  (!%p5690_p6), %s6919_s1, 2048, %s5680_s14, [#allocation7], %s5585_s17, %s5585_s17, %s5586_s20  }
  0x32   : > { %s6921_s6 = sld [smem:[#allocation31_spill]] }
  0x38   : > { %s5266_s26 = scalar_lea.hbm %s6921_s6, 8192 }
  0x39   : > { %p5267_p3 = scmp.ne.s32.totalorder %s6921_s6, %s5266_s26  ;;  %p5273_p12 = scmp.lt.u32.totalorder %s5266_s26, %s6921_s6 }
  0x3b   : > { %p5269_p10 = pnand %p5267_p3, %p5706_p8 }
  0x3d   : > { %p5270_p11 = pneg %p5269_p10 }
  0x3f   : > { %p5275_p13 = pnand %p5273_p12, %p5270_p11 }
  0x41   : > { %5278 = shalt.err (!%p5275_p13)
}
  0x42   : > { %s5279_s14 = scalar_lea.vmem %s5694_s18, 8192  ;;  %p5287_p7 = scmp.lt.s32.totalorder %s5694_s18, %s5694_s18 }
  0x43   : > { %p5280_p0 = scmp.ne.s32.totalorder %s5694_s18, %s5279_s14  ;;  %p5288_p9 = scmp.lt.s32.totalorder %s5279_s14, %s5279_s14 }
  0x45   : > { %p5282_p2 = pnand %p5280_p0, %p5706_p8  ;;  %p5289_p3 = por %p5288_p9, %p5287_p7 }
  0x47   : > { %p5283_p5 = pneg %p5282_p2 }
  0x49   : > { %p5290_p10 = pnand %p5289_p3, %p5283_p5 }
  0x4b   : > { %5293 = shalt.err (!%p5290_p10)
}
  0x4c   : > { %s6896_s17 = smov 256   ;;  %s6897_s9 = smov 16  }
  0x4d   : > { %5143 = dma.hbm_to_vmem [thread:$0]  (!%p5690_p6), %s6921_s6, 8192, %s5694_s18, [#allocation13], %s6896_s17, %s6896_s17, %s6897_s9  }
  0x4e   : > { %s6922_s7 = sld [smem:[#allocation32_spill]] }
  0x54   : > { %s5294_s25 = scalar_lea.hbm %s6922_s7, 32 }
  0x55   : > { %p5295_p11 = scmp.ne.s32.totalorder %s6922_s7, %s5294_s25  ;;  %p5301_p0 = scmp.lt.u32.totalorder %s5294_s25, %s6922_s7 }
  0x57   : > { %p5297_p12 = pnand %p5295_p11, %p5706_p8 }
  0x59   : > { %p5298_p13 = pneg %p5297_p12 }
  0x5b   : > { %p5303_p2 = pnand %p5301_p0, %p5298_p13 }
  0x5d   : > { %5306 = shalt.err (!%p5303_p2)
}
  0x5e   : > { %s5307_s14 = scalar_lea.vmem %s321_s21, 32  ;;  %p5315_p3 = scmp.lt.s32.totalorder %s321_s21, %s321_s21 }
  0x5f   : > { %p5308_p5 = scmp.ne.s32.totalorder %s321_s21, %s5307_s14  ;;  %p5316_p10 = scmp.lt.s32.totalorder %s5307_s14, %s5307_s14 }
  0x61   : > { %p5310_p7 = pnand %p5308_p5, %p5706_p8  ;;  %p5317_p1 = por %p5316_p10, %p5315_p3 }
  0x63   : > { %p5311_p9 = pneg %p5310_p7 }
  0x65   : > { %p5318_p4 = pnand %p5317_p1, %p5311_p9 }
  0x67   : > { %5321 = shalt.err (!%p5318_p4)
}
  0x68   : > { %5146 = dma.hbm_to_vmem [thread:$0]  (!%p5690_p6), %s6922_s7, 32, %s321_s21, [#allocation16]  }
  0x69   : > { %s5773_s22 = sadd.s32 1, %s5580_s12   ;;  %s99_s24 = sadd.s32 1, %s5576_s11 }
  0x6a   : > { %6923 = sst [smem:[#allocation27_spill]] %s5773_s22  ;;  %s96_s23 = ssub.s32 %s5580_s12, %s5773_s22 }
  0x6b   : > { %p97_p1 = scmp.eq.s32.totalorder %s96_s23, 0  ;;  %p106_p4 = scmp.ne.s32.totalorder %s5576_s11, %s5572_s10 }
  0x6c   : > { %p107_p11 = scmp.eq.s32.totalorder %s5580_s12, 0  ;;  %p112_p12 = scmp.ne.s32.totalorder %s5572_s10, %s5568_s30 }
  0x6d   : > { %s5784_s25 = scalar_select %p97_p1, %s5576_s11, %s99_s24  }
  0x6e   : > { %p108_p13 = por %p107_p11, %p106_p4  ;;  %p6925_p0 = scmp.eq.s32.totalorder %s5674_s15, 0 }
  0x6f   : > { %6924 = sst [smem:[#allocation28_spill]] %s5784_s25  ;;  %p5166_p5 = scmp.lt.s32.totalorder %s5580_s12, 5 }
  0x70   : > { %p5788_p2 = por %p6925_p0, %p112_p12  ;;  %s6898_s21 = sand.u32 1, %s5580_s12  }
  0x71   : > { %s5795_s28 = sand.u32 1, %s5576_s11   ;;  %s4988_s13 = sshll.u32 %s5580_s12, 16 }
  0x72   : > { %s6926_s26 = scalar_select %p5788_p2, 1, 0 }
  0x73   : > { %s4683_s29 = sshll.u32 %s5795_s28, 12  ;;  %s6927_s3 = sld [smem:[#allocation30_spill]] }
  0x74   : > { %s346_s30 = scalar_lea.vmem [#allocation9], %s4683_s29  ;;  %p5804_p7 = pnand %p5166_p5, %p108_p13 }
  0x75   : > { %s353_s23 = sshll.u32 %s346_s30, 4  ;;  %s5812_s17 = scalar_lea.sflag [#allocation10], %s6898_s21  ;;  %s5808_s23 = int_to_ptr.vmem [resolvable:$true] %s353_s23 }
  0x76   : > { %s6928_s24 = scalar_select %p5804_p7, 1, 0 }
  0x77   : > { %p5818_p3 = pneg %p5804_p7 }
  0x79   : > { %s5802_s20 = scalar_lea.hbm %s6927_s3, %s4988_s13  ;;  %s5327_s18 = scalar_lea.hbm %s6927_s3, 327680 }
  0x7a   : > { %s5322_s9 = scalar_lea.hbm %s5802_s20, 65536  ;;  %p5328_p4 = scmp.lt.u32.totalorder %s5802_s20, %s6927_s3 }
  0x7b   : > { %p5323_p9 = scmp.ne.s32.totalorder %s5802_s20, %s5322_s9  ;;  %p5329_p11 = scmp.lt.u32.totalorder %s5327_s18, %s5322_s9 }
  0x7c   : > { %s6929_s13 = scalar_select %p5818_p3, 1, 0 }
  0x7d   : > { %p5325_p10 = pnand %p5818_p3, %p5323_p9  ;;  %p5330_p12 = por %p5329_p11, %p5328_p4 }
  0x7e   : > { %p5331_p13 = scmp.lt.u32.totalorder %s5322_s9, %s5802_s20 }
  0x7f   : > { %p5326_p1 = pneg %p5325_p10 }
  0x80   : > { %p5332_p0 = por %p5331_p13, %p5330_p12 }
  0x82   : > { %p5333_p5 = pnand %p5332_p0, %p5326_p1 }
  0x84   : > { %5336 = shalt.err (!%p5333_p5)
}
  0x85   : > { %s5337_s21 = scalar_lea.vmem %s5808_s23, 65536  ;;  %s5589_s29 = smov [#allocation9]  }
  0x86   : > { %p5338_p9 = scmp.ne.s32.totalorder %s5808_s23, %s5337_s21  ;;  %s5342_s14 = sshll.u32 %s5589_s29, 4  ;;  %s5343_s14 = int_to_ptr.vmem [resolvable:$false] %s5342_s14 }
  0x87   : > { %s5344_s1 = scalar_lea.vmem %s5343_s14, 131072  ;;  %p5345_p6 = scmp.lt.s32.totalorder %s5808_s23, %s5343_s14 }
  0x88   : > { %p5340_p10 = pnand %p5338_p9, %p5818_p3  ;;  %p5346_p8 = scmp.lt.s32.totalorder %s5344_s1, %s5337_s21 }
  0x8a   : > { %p5341_p2 = pneg %p5340_p10  ;;  %p5347_p4 = por %p5346_p8, %p5345_p6 }
  0x8c   : > { %p5348_p11 = pnand %p5347_p4, %p5341_p2 }
  0x8e   : > { %5351 = shalt.err (!%p5348_p11)
}
  0x8f   : > { %s5590_s9 = smov 1024   ;;  %s5591_s18 = smov 64  }
  0x90   : > { %5153 = dma.hbm_to_vmem [thread:$0]  (!%p5804_p7), %s5802_s20, 65536, %s5808_s23, %s5812_s17, %s5590_s9, %s5590_s9, %s5591_s18  }
  0x91   : > { %s5592_s30 = smov [#allocation3]   ;;  %s5593_s29 = smov [#allocation8]  }
  0x92   : > { %s272_s3 = sshll.u32 %s5592_s30, 4  ;;  %s296_s6 = sshll.u32 %s5593_s29, 4  ;;  %s273_s3 = int_to_ptr.vmem [resolvable:$true] %s272_s3  ;;  %s297_s6 = int_to_ptr.vmem [resolvable:$true] %s296_s6 }
  0x93   : > { %s5352_s21 = scalar_lea.hbm %s6883_s0, 32  ;;  %p6930_p8 = scmp.ne.s32.totalorder %s6920_s27, 0 }
  0x94   : > { %p5353_p6 = scmp.ne.s32.totalorder %s6883_s0, %s5352_s21  ;;  %p5359_p12 = scmp.lt.u32.totalorder %s5352_s21, %s6883_s0 }
  0x96   : > { %p5355_p2 = pnand %p5353_p6, %p6930_p8 }
  0x98   : > { %p5356_p1 = pneg %p5355_p2 }
  0x9a   : > { %p5361_p13 = pnand %p5359_p12, %p5356_p1 }
  0x9c   : > { %5364 = shalt.err (!%p5361_p13)
}
  0x9d   : > { %s5365_s20 = scalar_lea.vmem %s273_s3, 32  ;;  %p5373_p10 = scmp.lt.s32.totalorder %s273_s3, %s273_s3 }
  0x9e   : > { %p5366_p0 = scmp.ne.s32.totalorder %s273_s3, %s5365_s20  ;;  %p5374_p4 = scmp.lt.s32.totalorder %s5365_s20, %s5365_s20 }
  0xa0   : > { %p5368_p5 = pnand %p5366_p0, %p6930_p8  ;;  %p5375_p11 = por %p5374_p4, %p5373_p10 }
  0xa2   : > { %p5369_p9 = pneg %p5368_p5 }
  0xa4   : > { %p5376_p7 = pnand %p5375_p11, %p5369_p9 }
  0xa6   : > { %5379 = shalt.err (!%p5376_p7)
}
  0xa7   : > { %p6931_p6 = scmp.ne.s32.totalorder %s6918_s19, 0  ;;  %s5380_s23 = scalar_lea.hbm %s6885_s2, 256 }
  0xa8   : > { %p5381_p2 = scmp.ne.s32.totalorder %s6885_s2, %s5380_s23  ;;  %p5387_p7 = scmp.lt.u32.totalorder %s5380_s23, %s6885_s2 }
  0xa9   : > { %5134 = dma.hbm_to_vmem [thread:$0]  (!%p6931_p6), %s6883_s0, 32, %s273_s3, [#allocation4]  }
  0xaa   : > { %p5383_p1 = pnand %p5381_p2, %p6930_p8 }
  0xac   : > { %p5384_p12 = pneg %p5383_p1 }
  0xae   : > { %p5389_p13 = pnand %p5387_p7, %p5384_p12 }
  0xb0   : > { %5392 = shalt.err (!%p5389_p13)
}
  0xb1   : > { %s5393_s14 = scalar_lea.vmem %s297_s6, 256  ;;  %p5401_p10 = scmp.lt.s32.totalorder %s297_s6, %s297_s6 }
  0xb2   : > { %p5394_p0 = scmp.ne.s32.totalorder %s297_s6, %s5393_s14  ;;  %p5402_p4 = scmp.lt.s32.totalorder %s5393_s14, %s5393_s14 }
  0xb4   : > { %p5396_p5 = pnand %p5394_p0, %p6930_p8  ;;  %p5403_p11 = por %p5402_p4, %p5401_p10 }
  0xb6   : > { %p5397_p9 = pneg %p5396_p5 }
  0xb8   : > { %p5404_p3 = pnand %p5403_p11, %p5397_p9 }
  0xba   : > { %5407 = shalt.err (!%p5404_p3)
}
  0xbb   : > { %5140 = dma.hbm_to_vmem [thread:$0]  (!%p6931_p6), %s6885_s2, 256, %s297_s6, [#allocation7]  }
  0xbc   : > { %s5594_s1 = smov [#allocation17]   ;;  %s4686_s7 = sshll.u32 %s5795_s28, 4 }
  0xbd   : > { %s331_s20 = sshll.u32 %s5594_s1, 4  ;;  %s5408_s22 = scalar_lea.hbm %s6891_s8, 32  ;;  %s332_s20 = int_to_ptr.vmem [resolvable:$true] %s331_s20 }
  0xbe   : > { %p5409_p3 = scmp.ne.s32.totalorder %s6891_s8, %s5408_s22  ;;  %p5415_p12 = scmp.lt.u32.totalorder %s5408_s22, %s6891_s8 }
  0xc0   : > { %p5411_p2 = pnand %p5409_p3, %p6930_p8 }
  0xc2   : > { %p5412_p1 = pneg %p5411_p2 }
  0xc4   : > { %p5417_p7 = pnand %p5415_p12, %p5412_p1 }
  0xc6   : > { %5420 = shalt.err (!%p5417_p7)
}
  0xc7   : > { %s5421_s6 = scalar_lea.vmem %s332_s20, 32  ;;  %p5429_p9 = scmp.lt.s32.totalorder %s332_s20, %s332_s20 }
  0xc8   : > { %p5422_p13 = scmp.ne.s32.totalorder %s332_s20, %s5421_s6  ;;  %p5430_p10 = scmp.lt.s32.totalorder %s5421_s6, %s5421_s6 }
  0xca   : > { %p5424_p0 = pnand %p5422_p13, %p6930_p8  ;;  %p5431_p4 = por %p5430_p10, %p5429_p9 }
  0xcc   : > { %p5425_p5 = pneg %p5424_p0 }
  0xce   : > { %p5432_p11 = pnand %p5431_p4, %p5425_p5 }
  0xd0   : > { %5435 = shalt.err (!%p5432_p11)
}
  0xd1   : > { %5149 = dma.hbm_to_vmem [thread:$0]  (!%p6931_p6), %s6891_s8, 32, %s332_s20, [#allocation16]  }
  0xd2   : > { %s4989_s3 = sshll.u32 %s5580_s12, 8  ;;  %s367_s21 = scalar_lea.vmem [#allocation11], %s4686_s7 }
  0xd3   : > { %s374_s1 = sshll.u32 %s367_s21, 4  ;;  %s5901_s11 = scalar_lea.hbm %s6887_s4, %s4989_s3  ;;  %s5903_s1 = int_to_ptr.vmem [resolvable:$true] %s374_s1 }
  0xd4   : > { %s5436_s19 = scalar_lea.hbm %s5901_s11, 256  ;;  %p6932_p3 = scmp.ne.s32.totalorder %s6929_s13, 0 }
  0xd5   : > { %p5437_p8 = scmp.ne.s32.totalorder %s5901_s11, %s5436_s19  ;;  %s5441_s7 = scalar_lea.hbm %s6887_s4, 1280 }
  0xd6   : > { %p5442_p6 = scmp.lt.u32.totalorder %s5901_s11, %s6887_s4  ;;  %p5443_p12 = scmp.lt.u32.totalorder %s5441_s7, %s5436_s19 }
  0xd7   : > { %p5439_p2 = pnand %p5437_p8, %p6932_p3  ;;  %p5445_p13 = scmp.lt.u32.totalorder %s5436_s19, %s5901_s11 }
  0xd8   : > { %p5444_p7 = por %p5443_p12, %p5442_p6 }
  0xd9   : > { %p5440_p1 = pneg %p5439_p2 }
  0xda   : > { %p5446_p0 = por %p5445_p13, %p5444_p7 }
  0xdc   : > { %p5447_p5 = pnand %p5446_p0, %p5440_p1 }
  0xde   : > { %5450 = shalt.err (!%p5447_p5)
}
  0xdf   : > { %s5451_s18 = scalar_lea.vmem %s5903_s1, 256  ;;  %s5595_s30 = smov [#allocation11]  }
  0xe0   : > { %p5452_p9 = scmp.ne.s32.totalorder %s5903_s1, %s5451_s18  ;;  %s5456_s6 = sshll.u32 %s5595_s30, 4  ;;  %s5457_s6 = int_to_ptr.vmem [resolvable:$false] %s5456_s6 }
  0xe1   : > { %s5458_s29 = scalar_lea.vmem %s5457_s6, 512  ;;  %p5459_p11 = scmp.lt.s32.totalorder %s5903_s1, %s5457_s6 }
  0xe2   : > { %p5454_p10 = pnand %p5452_p9, %p6932_p3  ;;  %p5460_p8 = scmp.lt.s32.totalorder %s5458_s29, %s5451_s18 }
  0xe4   : > { %p5455_p4 = pneg %p5454_p10  ;;  %p5461_p2 = por %p5460_p8, %p5459_p11 }
  0xe6   : > { %p5462_p6 = pnand %p5461_p2, %p5455_p4 }
  0xe8   : > { %5465 = shalt.err (!%p5462_p6)
}
  0xe9   : > { %s5596_s14 = smov 128   ;;  %s5597_s3 = smov 8  }
  0xea   : > { %p6933_p1 = scmp.ne.s32.totalorder %s6928_s24, 0  ;;  %s4689_s21 = sshll.u32 %s5795_s28, 5 }
  0xeb   : > { %s4990_s25 = sshll.u32 %s5580_s12, 9  ;;  %s388_s22 = scalar_lea.vmem [#allocation12], %s4689_s21 }
  0xec   : > { %5156 = dma.hbm_to_vmem [thread:$0]  (!%p6933_p1), %s5901_s11, 256, %s5903_s1, %s5812_s17, %s5596_s14, %s5596_s14, %s5597_s3  }
  0xed   : > { %s5932_s20 = scalar_lea.hbm %s6888_s5, %s4990_s25  ;;  %s395_s7 = sshll.u32 %s388_s22, 4  ;;  %s5934_s7 = int_to_ptr.vmem [resolvable:$true] %s395_s7 }
  0xee   : > { %s6934_s23 = sand.u32 1, %s5580_s12   ;;  %s5466_s18 = scalar_lea.hbm %s5932_s20, 512 }
  0xef   : > { %s5938_s9 = scalar_lea.sflag [#allocation13], %s6934_s23  ;;  %p5467_p12 = scmp.ne.s32.totalorder %s5932_s20, %s5466_s18 }
  0xf0   : > { %s5471_s1 = scalar_lea.hbm %s6888_s5, 2560  ;;  %p5472_p0 = scmp.lt.u32.totalorder %s5932_s20, %s6888_s5 }
  0xf1   : > { %p5469_p7 = pnand %p5467_p12, %p6932_p3  ;;  %p5473_p5 = scmp.lt.u32.totalorder %s5471_s1, %s5466_s18 }
  0xf2   : > { %p5475_p10 = scmp.lt.u32.totalorder %s5466_s18, %s5932_s20 }
  0xf3   : > { %p5470_p13 = pneg %p5469_p7  ;;  %p5474_p9 = por %p5473_p5, %p5472_p0 }
  0xf5   : > { %p5476_p4 = por %p5475_p10, %p5474_p9 }
  0xf7   : > { %p5477_p11 = pnand %p5476_p4, %p5470_p13 }
  0xf9   : > { %5480 = shalt.err (!%p5477_p11)
}
  0xfa   : > { %s5481_s12 = scalar_lea.vmem %s5934_s7, 512  ;;  %s5598_s6 = smov [#allocation12]  }
  0xfb   : > { %p5482_p8 = scmp.ne.s32.totalorder %s5934_s7, %s5481_s12  ;;  %s5486_s29 = sshll.u32 %s5598_s6, 4  ;;  %s5487_s29 = int_to_ptr.vmem [resolvable:$false] %s5486_s29 }
  0xfc   : > { %s5488_s14 = scalar_lea.vmem %s5487_s29, 1024  ;;  %p5489_p12 = scmp.lt.s32.totalorder %s5934_s7, %s5487_s29 }
  0xfd   : > { %p5484_p2 = pnand %p5482_p8, %p6932_p3  ;;  %p5490_p7 = scmp.lt.s32.totalorder %s5488_s14, %s5481_s12 }
  0xff   : > { %p5485_p6 = pneg %p5484_p2  ;;  %p5491_p0 = por %p5490_p7, %p5489_p12 }
 0x101   : > { %p5492_p5 = pnand %p5491_p0, %p5485_p6 }
 0x103   : > { %5495 = shalt.err (!%p5492_p5)
}
 0x104   : > { %s6935_s3 = smov 16   ;;  %s6936_s21 = smov 256  }
 0x105   : > { %5159 = dma.hbm_to_vmem [thread:$0]  (!%p6933_p1), %s5932_s20, 512, %s5934_s7, %s5938_s9, %s6936_s21, %s6936_s21, %s6935_s3  }
 0x106   : > { %p6937_p3 = scmp.ne.s32.totalorder %s6917_s16, 0 }
 0x107   : > { %p6938_p13 = scmp.eq.s32.totalorder (!%p6937_p3), %s5674_s15, 0 }
 0x108   : > { %407 = sbr.rel (%p6937_p3) target bundleno = 2208 (0x8a0), region = 56 }
 0x10f   : > { %5539 = dma.done.wait (%p6938_p13), [#allocation4], 32   ;;  %p6939_p9 = pmov %p6938_p13 }
 0x111   : > { %5541 = vsyncadd (%p6939_p9), [#allocation4], 4294967264  ;;  %p6940_p10 = pmov %p6939_p9 }
 0x112   : > { %p6941_p4 = pmov %p6939_p9 }
 0x113   : > { %5543 = dma.done.wait (%p6940_p10), [#allocation7], 2304  }
 0x114   : > { %5545 = vsyncadd (%p6941_p4), [#allocation7], 4294964992  ;;  %s421_s24 = sand.u32 1, %s5674_s15   ;;  %s423_s13 = sand.u32 1, %s5572_s10  }
 0x115   : > { %s4696_s25 = sshll.u32 %s423_s13, 12  ;;  %s422_s16 = scalar_lea.sflag [#allocation10], %s421_s24 }
 0x116   : > { %s5977_s27 = scalar_lea.vmem [#allocation9], %s4696_s25  ;;  %p6942_p1 = scmp.ne.s32.totalorder %s6926_s26, 0 }
 0x118   : > { %5547 = dma.done.wait (%p6942_p1), %s422_s16, 65792  }
 0x119   : > { %5549 = vsyncadd (%p6942_p1), %s422_s16, 4294901504  ;;  %s4697_s19 = sshll.u32 %s423_s13, 4  ;;  %s4698_s20 = sshll.u32 %s423_s13, 5 }
 0x11a   : > { %s5983_s22 = scalar_lea.vmem [#allocation11], %s4697_s19  ;;  %s440_s7 = scalar_lea.sflag [#allocation13], %s421_s24 }
 0x11b   : > { %s5985_s23 = scalar_lea.vmem [#allocation12], %s4698_s20 }
 0x11c   : > { %5551 = dma.done.wait (%p6942_p1), %s440_s7, 512  }
 0x11d   : > { %5553 = vsyncadd (%p6942_p1), %s440_s7, 4294966784  ;;  %p6943_p11 = pmov %p6941_p4 }
 0x11e   : > { %p6944_p8 = pmov %p6941_p4 }
 0x11f   : > { %5555 = dma.done.wait (%p6943_p11), [#allocation13], 8192  }
 0x120   : > { %5557 = vsyncadd (%p6944_p8), [#allocation13], 4294959104  ;;  %p6945_p2 = pmov %p6941_p4 }
 0x122   : > { %5559 = dma.done.wait (%p6945_p2), [#allocation16], 64   ;;  %p6946_p6 = pmov %p6945_p2 }
 0x123   : > { %p6947_p12 = scmp.ne.s32.totalorder %s5674_s15, 0 }
 0x124   : > { %5561 = vsyncadd (%p6946_p6), [#allocation16], 4294967232  ;;  %v502_v0 = vld [vmem:[#allocation6] sm:$0xff] (!%p6947_p12)  ;;  %v503_v2 = vld [vmem:[#allocation6 + $0x8] sm:$0xff] (!%p6947_p12)  ;;  %v5599_v8 = vmov (!%p6947_p12), 0   ;;  %vm644_vm0 = vcmask (!%p6947_p12), 261120   ;;  %v606_v37 = vlaneseq (!%p6947_p12) }
 0x125   : > { %499 = sbr.rel (%p6947_p12) target bundleno = 538 (0x21a), region = 96  ;;  %v506_v1 = vld [vmem:[#allocation6 + $0x20] sm:$0xff] (!%p6947_p12)  ;;  %v507_v4 = vld [vmem:[#allocation6 + $0x28] sm:$0xff] (!%p6947_p12)  ;;  %680 = vmatprep.mubr.bf16.mxu0 (!%p6947_p12), %v5599_v8  ;;  %721 = vmatprep.mubr.bf16.mxu1 (!%p6947_p12), %v5599_v8  ;;  %v504_v15 = vld [vmem:[#allocation6 + $0x10] sm:$0xff] (!%p6947_p12)  ;;  %v5600_v35 = vmov (!%p6947_p12), 1983009808  }
 0x126   : > { %v4704_v3 = vcombine.high (!%p6947_p12), %v502_v0, %v506_v1  ;;  %v4703_v5 = vcombine.low (!%p6947_p12), %v502_v0, %v506_v1  ;;  %v510_v6 = vld [vmem:[#allocation6 + $0x40] sm:$0xff] (!%p6947_p12)  ;;  %v4706_v9 = vcombine.high (!%p6947_p12), %v503_v2, %v507_v4  ;;  %v4705_v10 = vcombine.low (!%p6947_p12), %v503_v2, %v507_v4  ;;  %v511_v12 = vld [vmem:[#allocation6 + $0x48] sm:$0xff] (!%p6947_p12)  ;;  %v508_v16 = vld [vmem:[#allocation6 + $0x30] sm:$0xff] (!%p6947_p12) }
 0x127   : > { %v514_v7 = vld [vmem:[#allocation6 + $0x60] sm:$0xff] (!%p6947_p12)  ;;  %v515_v13 = vld [vmem:[#allocation6 + $0x68] sm:$0xff] (!%p6947_p12)  ;;  %v505_v17 = vld [vmem:[#allocation6 + $0x18] sm:$0xff] (!%p6947_p12)  ;;  %v4708_v22 = vcombine.high (!%p6947_p12), %v504_v15, %v508_v16  ;;  %v4707_v29 = vcombine.low (!%p6947_p12), %v504_v15, %v508_v16  ;;  %v604_v36 = vunpack.c.l.s4 (!%p6947_p12), %v5600_v35  ;;  %v607_v39 = vshrl.u32 (!%p6947_p12), %v606_v37, 7 }
 0x128   : > { %v4712_v11 = vcombine.high (!%p6947_p12), %v510_v6, %v514_v7  ;;  %648 = vmatprep.subr.bf16.mxu0 (!%p6947_p12), %v4704_v3  ;;  %v4714_v14 = vcombine.high (!%p6947_p12), %v511_v12, %v515_v13  ;;  %689 = vmatprep.subr.bf16.mxu1 (!%p6947_p12), %v4706_v9  ;;  %v4711_v18 = vcombine.low (!%p6947_p12), %v510_v6, %v514_v7  ;;  %v500_v19 = vld [vmem:[#allocation3] sm:$0x3] (!%p6947_p12)  ;;  %v512_v24 = vld [vmem:[#allocation6 + $0x50] sm:$0xff] (!%p6947_p12)  ;;  %v518_v40 = vld [vmem:[#allocation8] sm:$0xff] (!%p6947_p12) }
 0x129   : > { %649 = vmatpush1.bf16.msra.mxu0 (!%p6947_p12), %v4703_v5  ;;  %v509_v20 = vld [vmem:[#allocation6 + $0x38] sm:$0xff] (!%p6947_p12)  ;;  %690 = vmatpush1.bf16.msra.mxu1 (!%p6947_p12), %v4705_v10  ;;  %v4713_v21 = vcombine.low (!%p6947_p12), %v511_v12, %v515_v13  ;;  %v516_v25 = vld [vmem:[#allocation6 + $0x70] sm:$0xff] (!%p6947_p12)  ;;  %v501_v26 = vpack.c.bf16 (!%p6947_p12), %v500_v19, %v500_v19  ;;  %v605_v38 = vunpack.c.0.s8 (!%p6947_p12), %v604_v36  ;;  %v602_v42 = vcombine.high (!%p6947_p12), %v518_v40, %v518_v40  ;;  %v519_v45 = vld [vmem:[#allocation8 + $0x8] sm:$0xff] (!%p6947_p12) }
 0x12a   : > { %650 = vmatprep.subr.bf16.mxu0 (!%p6947_p12), %v4712_v11  ;;  %691 = vmatprep.subr.bf16.mxu1 (!%p6947_p12), %v4714_v14  ;;  %v4710_v23 = vcombine.high (!%p6947_p12), %v505_v17, %v509_v20  ;;  %v513_v27 = vld [vmem:[#allocation6 + $0x58] sm:$0xff] (!%p6947_p12)  ;;  %v4709_v30 = vcombine.low (!%p6947_p12), %v505_v17, %v509_v20  ;;  %v4716_v31 = vcombine.high (!%p6947_p12), %v512_v24, %v516_v25 }
 0x12b   : > { %v517_v28 = vld [vmem:[#allocation6 + $0x78] sm:$0xff] (!%p6947_p12)  ;;  %v4715_v33 = vcombine.low (!%p6947_p12), %v512_v24, %v516_v25  ;;  %v6005_v41 = vsub.s32 (!%p6947_p12), %v605_v38, %v607_v39  ;;  %v619_v48 = vcombine.high (!%p6947_p12), %v519_v45, %v519_v45 }
 0x12c   : > { %v4718_v32 = vcombine.high %v513_v27, %v517_v28  ;;  %v4717_v34 = vcombine.low %v513_v27, %v517_v28 }
 0x12d   : > { %651 = vmatpush1.bf16.msra.mxu0 %v4711_v18  ;;  %692 = vmatpush1.bf16.msra.mxu1 %v4713_v21  ;;  %v609_v43 = vrot.slane %v518_v40, %v6005_v41  ;;  %v616_v44 = vrot.slane %v602_v42, %v6005_v41  ;;  %v626_v57 = vrot.slane %v519_v45, %v6005_v41 }
 0x12e   : > { %730 = vmatprep.subr.bf16.mxu0 %v4708_v22  ;;  %771 = vmatprep.subr.bf16.mxu1 %v4710_v23  ;;  %v633_v62 = vrot.slane %v619_v48, %v6005_v41 }
 0x12f   : > { %v617_v46 = vcombine.high %v609_v43, %v609_v43  ;;  %v618_v47 = vcombine.high %v616_v44, %v616_v44  ;;  %v634_v6 = vcombine.high %v626_v57, %v626_v57 }
 0x130   : > { %4719 = vmatmul.mubr.msk.bf16.vlgmr.msra.gmra.mrb[0].mxu0 %vm644_vm0, %v501_v26  ;;  %4720 = vmatmul.mubr.msk.bf16.vlgmr.msra.gmra.mrb[0].mxu1 %vm644_vm0, %v501_v26  ;;  %v635_v9 = vcombine.high %v633_v62, %v633_v62 }
 0x131   : > { %731 = vmatpush1.bf16.msra.mxu0 %v4707_v29  ;;  %772 = vmatpush1.bf16.msra.mxu1 %v4709_v30 }
 0x132   : > { %732 = vmatprep.subr.bf16.mxu0 %v4716_v31  ;;  %773 = vmatprep.subr.bf16.mxu1 %v4718_v32 }
 0x133   : > { %762 = vmatprep.mubr.bf16.mxu0 %v5599_v8  ;;  %803 = vmatprep.mubr.bf16.mxu1 %v5599_v8 }
 0x135   : > { %733 = vmatpush1.bf16.msra.mxu0 %v4715_v33  ;;  %774 = vmatpush1.bf16.msra.mxu1 %v4717_v34 }
 0x138   : > { %4721 = vmatmul.mubr.msk.bf16.vlgmr.msra.gmra.mrb[4].mxu0 %vm644_vm0, %v501_v26  ;;  %4722 = vmatmul.mubr.msk.bf16.vlgmr.msra.gmra.mrb[4].mxu1 %vm644_vm0, %v501_v26 }
 0x203   : > { %v682_v49 = vpop.f32.mrb[0].mxu0  ;;  %v723_v51 = vpop.f32.mrb[0].mxu1 }
 0x204   : > { %v683_v50 = vadd.f32 %v682_v49, %v609_v43  ;;  %v684_v52 = vpop.f32.mrb[1].mxu0  ;;  %v724_v53 = vadd.f32 %v723_v51, %v616_v44  ;;  %v725_v55 = vpop.f32.mrb[1].mxu1 }
 0x205   : > { %v685_v54 = vadd.f32 %v684_v52, %v617_v46  ;;  %v686_v56 = vpop.f32.mrb[2].mxu0  ;;  %v726_v59 = vadd.f32 %v725_v55, %v618_v47  ;;  %v727_v60 = vpop.f32.mrb[2].mxu1 }
 0x206   : > { %vm812_vm1 = vcmp.ge.f32.partialorder %v683_v50, 0.0  ;;  %v820_v58 = vmul.f32 0.2, %v683_v50  ;;  %v687_v61 = vpop.f32.mrb[3].mxu0  ;;  %vm814_vm2 = vcmp.ge.f32.partialorder %v724_v53, 0.0  ;;  %v728_v3 = vpop.f32.mrb[3].mxu1 }
 0x207   : > { %v822_v63 = vmul.f32 0.2, %v724_v53  ;;  %vm813_vm3 = vcmp.ge.f32.partialorder %v685_v54, 0.0  ;;  %v821_v0 = vmul.f32 0.2, %v685_v54  ;;  %vm815_vm4 = vcmp.ge.f32.partialorder %v726_v59, 0.0 }
 0x208   : > { %v828_v1 = vsel %vm812_vm1, %v683_v50, %v820_v58  ;;  %v823_v2 = vmul.f32 0.2, %v726_v59 }
 0x209   : > { %v830_v4 = vsel %vm814_vm2, %v724_v53, %v822_v63  ;;  %v829_v5 = vsel %vm813_vm3, %v685_v54, %v821_v0 }
 0x20a   : > { %v844_v7 = vcombine.low %v828_v1, %v829_v5  ;;  %v831_v8 = vsel %vm815_vm4, %v726_v59, %v823_v2 }
 0x20b   : > { %v845_v10 = vcombine.low %v830_v4, %v831_v8  ;;  %v764_v11 = vpop.f32.mrb[4].mxu0  ;;  %v805_v14 = vpop.f32.mrb[4].mxu1 }
 0x20c   : > { %v852_v12 = vrot.slane %v844_v7, %v6005_v41  ;;  %v765_v13 = vadd.f32 %v764_v11, %v626_v57  ;;  %v766_v15 = vpop.f32.mrb[5].mxu0  ;;  %v806_v17 = vadd.f32 %v805_v14, %v633_v62  ;;  %v807_v19 = vpop.f32.mrb[5].mxu1 }
 0x20d   : > { %v859_v16 = vrot.slane %v845_v10, %v6005_v41  ;;  %v767_v18 = vadd.f32 %v766_v15, %v634_v6  ;;  %v768_v20 = vpop.f32.mrb[6].mxu0  ;;  %v808_v22 = vadd.f32 %v807_v19, %v635_v9  ;;  %v809_v23 = vpop.f32.mrb[6].mxu1 }
 0x20e   : > { %vm816_vm5 = vcmp.ge.f32.partialorder %v765_v13, 0.0  ;;  %v824_v21 = vmul.f32 0.2, %v765_v13  ;;  %v769_v24 = vpop.f32.mrb[7].mxu0  ;;  %vm818_vm6 = vcmp.ge.f32.partialorder %v806_v17, 0.0  ;;  %v810_v27 = vpop.f32.mrb[7].mxu1 }
 0x20f   : > { %v860_v25 = vcombine.low %v852_v12, %v859_v16  ;;  %v826_v26 = vmul.f32 0.2, %v806_v17  ;;  %vm817_vm7 = vcmp.ge.f32.partialorder %v767_v18, 0.0  ;;  %v825_v29 = vmul.f32 0.2, %v767_v18 }
 0x210   : > { %v832_v28 = vsel %vm816_vm5, %v765_v13, %v824_v21  ;;  %vm819_vm8 = vcmp.ge.f32.partialorder %v808_v22, 0.0  ;;  %v827_v30 = vmul.f32 0.2, %v808_v22 }
 0x211   : > { %880 = vst [vmem:[#allocation2] sm:$0xff] %v860_v25  ;;  %v834_v31 = vsel %vm818_vm6, %v806_v17, %v826_v26  ;;  %v833_v32 = vsel %vm817_vm7, %v767_v18, %v825_v29 }
 0x212   : > { %v835_v33 = vsel %vm819_vm8, %v808_v22, %v827_v30  ;;  %v861_v34 = vcombine.low %v832_v28, %v833_v32 }
 0x213   : > { %v862_v35 = vcombine.low %v834_v31, %v835_v33 }
 0x214   : > { %v869_v36 = vrot.slane %v861_v34, %v6005_v41 }
 0x215   : > { %v876_v37 = vrot.slane %v862_v35, %v6005_v41 }
 0x217   : > { %v877_v38 = vcombine.low %v869_v36, %v876_v37 }
 0x219   : > { %881 = vst [vmem:[#allocation2 + $0x8] sm:$0xff] %v877_v38 }
 0x21a PF: > { %v885_v39 = vld [vmem:[%s5977_s27 + $0x8] sm:$0xff]  ;;  %v887_v40 = vld [vmem:[%s5977_s27 + $0x18] sm:$0xff]  ;;  %v884_v42 = vld [vmem:[%s5977_s27] sm:$0xff]  ;;  %v2427_v5 = vlaneseq  ;;  %v5601_v10 = vmov 1983009808   ;;  %p4982_p7 = scmp.ne.s32.totalorder %s5674_s15, 4 }
 0x21b   : > { %v1141_v43 = vunpack.c.l.s8.bf16 %v885_v39  ;;  %v1149_v44 = vunpack.c.h.s8.bf16 %v885_v39  ;;  %v1143_v45 = vunpack.c.l.s8.bf16 %v887_v40  ;;  %v1151_v46 = vunpack.c.h.s8.bf16 %v887_v40  ;;  %v886_v47 = vld [vmem:[%s5977_s27 + $0x10] sm:$0xff]  ;;  %v893_v49 = vld [vmem:[%s5977_s27 + $0x48] sm:$0xff]  ;;  %v895_v50 = vld [vmem:[%s5977_s27 + $0x58] sm:$0xff] }
 0x21c   : > { %v1140_v41 = vunpack.c.l.s8.bf16 %v884_v42  ;;  %v1142_v48 = vunpack.c.l.s8.bf16 %v886_v47  ;;  %v1148_v51 = vunpack.c.h.s8.bf16 %v884_v42  ;;  %v1150_v52 = vunpack.c.h.s8.bf16 %v886_v47  ;;  %v892_v55 = vld [vmem:[%s5977_s27 + $0x40] sm:$0xff]  ;;  %v894_v56 = vld [vmem:[%s5977_s27 + $0x50] sm:$0xff]  ;;  %v901_v61 = vld [vmem:[%s5977_s27 + $0x88] sm:$0xff] }
 0x21d   : > { %2473 = vmatprep.subr.bf16.mxu0 %v1141_v43  ;;  %2637 = vmatprep.subr.bf16.mxu1 %v1143_v45  ;;  %v1157_v53 = vunpack.c.l.s8.bf16 %v893_v49  ;;  %v1159_v54 = vunpack.c.l.s8.bf16 %v895_v50  ;;  %v1156_v57 = vunpack.c.l.s8.bf16 %v892_v55  ;;  %v1158_v58 = vunpack.c.l.s8.bf16 %v894_v56  ;;  %v903_v62 = vld [vmem:[%s5977_s27 + $0x98] sm:$0xff]  ;;  %v900_v3 = vld [vmem:[%s5977_s27 + $0x80] sm:$0xff]  ;;  %v902_v4 = vld [vmem:[%s5977_s27 + $0x90] sm:$0xff] }
 0x21e   : > { %2474 = vmatpush1.bf16.msra.mxu0 %v1140_v41  ;;  %2638 = vmatpush1.bf16.msra.mxu1 %v1142_v48  ;;  %v1165_v59 = vunpack.c.h.s8.bf16 %v893_v49  ;;  %v1167_v60 = vunpack.c.h.s8.bf16 %v895_v50  ;;  %v1164_v63 = vunpack.c.h.s8.bf16 %v892_v55  ;;  %v1166_v0 = vunpack.c.h.s8.bf16 %v894_v56  ;;  %v909_v13 = vld [vmem:[%s5977_s27 + $0xc8] sm:$0xff]  ;;  %v911_v14 = vld [vmem:[%s5977_s27 + $0xd8] sm:$0xff]  ;;  %v908_v21 = vld [vmem:[%s5977_s27 + $0xc0] sm:$0xff] }
 0x21f   : > { %2475 = vmatprep.subr.bf16.mxu0 %v1149_v44  ;;  %2639 = vmatprep.subr.bf16.mxu1 %v1151_v46  ;;  %v1173_v1 = vunpack.c.l.s8.bf16 %v901_v61  ;;  %v1175_v2 = vunpack.c.l.s8.bf16 %v903_v62  ;;  %v1172_v6 = vunpack.c.l.s8.bf16 %v900_v3  ;;  %v1174_v7 = vunpack.c.l.s8.bf16 %v902_v4  ;;  %v6031_v18 = vld [vmem:[#allocation2] sm:$0xff]  ;;  %v910_v22 = vld [vmem:[%s5977_s27 + $0xd0] sm:$0xff]  ;;  %v917_v30 = vld [vmem:[%s5977_s27 + $0x108] sm:$0xff] }
 0x220   : > { %v1181_v8 = vunpack.c.h.s8.bf16 %v901_v61  ;;  %v1183_v9 = vunpack.c.h.s8.bf16 %v903_v62  ;;  %v2425_v11 = vunpack.c.l.s4 %v5601_v10  ;;  %v6027_v12 = vshrl.u32 %v2427_v5, 7  ;;  %v919_v31 = vld [vmem:[%s5977_s27 + $0x118] sm:$0xff]  ;;  %v916_v37 = vld [vmem:[%s5977_s27 + $0x100] sm:$0xff]  ;;  %v918_v38 = vld [vmem:[%s5977_s27 + $0x110] sm:$0xff] }
 0x221   : > { %v1180_v16 = vunpack.c.h.s8.bf16 %v900_v3  ;;  %v1182_v17 = vunpack.c.h.s8.bf16 %v902_v4  ;;  %v1189_v19 = vunpack.c.l.s8.bf16 %v909_v13  ;;  %v1191_v20 = vunpack.c.l.s8.bf16 %v911_v14  ;;  %v925_v44 = vld [vmem:[%s5977_s27 + $0x148] sm:$0xff]  ;;  %v927_v45 = vld [vmem:[%s5977_s27 + $0x158] sm:$0xff]  ;;  %v924_v49 = vld [vmem:[%s5977_s27 + $0x140] sm:$0xff] }
 0x222   : > { %2476 = vmatpush1.bf16.msra.mxu0 %v1148_v51  ;;  %2640 = vmatpush1.bf16.msra.mxu1 %v1150_v52  ;;  %v2426_v15 = vunpack.c.0.s8 %v2425_v11  ;;  %v1188_v25 = vunpack.c.l.s8.bf16 %v908_v21  ;;  %v1190_v26 = vunpack.c.l.s8.bf16 %v910_v22  ;;  %v1197_v27 = vunpack.c.h.s8.bf16 %v909_v13  ;;  %v926_v50 = vld [vmem:[%s5977_s27 + $0x150] sm:$0xff]  ;;  %v933_v55 = vld [vmem:[%s5977_s27 + $0x188] sm:$0xff]  ;;  %v935_v56 = vld [vmem:[%s5977_s27 + $0x198] sm:$0xff] }
 0x223   : > { %2477 = vmatprep.subr.bf16.mxu0 %v1157_v53  ;;  %2641 = vmatprep.subr.bf16.mxu1 %v1159_v54  ;;  %v1199_v28 = vunpack.c.h.s8.bf16 %v911_v14  ;;  %v1196_v33 = vunpack.c.h.s8.bf16 %v908_v21  ;;  %v1198_v34 = vunpack.c.h.s8.bf16 %v910_v22  ;;  %v1205_v35 = vunpack.c.l.s8.bf16 %v917_v30  ;;  %v932_v61 = vld [vmem:[%s5977_s27 + $0x180] sm:$0xff]  ;;  %v934_v62 = vld [vmem:[%s5977_s27 + $0x190] sm:$0xff]  ;;  %v941_v3 = vld [vmem:[%s5977_s27 + $0x1c8] sm:$0xff] }
 0x224   : > { %v6036_v23 = vsub.s32 %v2426_v15, %v6027_v12  ;;  %v1207_v36 = vunpack.c.l.s8.bf16 %v919_v31  ;;  %v1204_v39 = vunpack.c.l.s8.bf16 %v916_v37  ;;  %v1206_v40 = vunpack.c.l.s8.bf16 %v918_v38  ;;  %v943_v4 = vld [vmem:[%s5977_s27 + $0x1d8] sm:$0xff]  ;;  %v942_v10 = vld [vmem:[%s5977_s27 + $0x1d0] sm:$0xff] }
 0x225   : > { %v1213_v42 = vunpack.c.h.s8.bf16 %v917_v30  ;;  %v1215_v43 = vunpack.c.h.s8.bf16 %v919_v31  ;;  %v1212_v46 = vunpack.c.h.s8.bf16 %v916_v37  ;;  %v1214_v47 = vunpack.c.h.s8.bf16 %v918_v38  ;;  %v959_v37 = vld [vmem:[%s5977_s27 + $0x258] sm:$0xff] }
 0x226   : > { %2478 = vmatpush1.bf16.msra.mxu0 %v1156_v57  ;;  %2642 = vmatpush1.bf16.msra.mxu1 %v1158_v58  ;;  %v6040_v24 = vrot.slane %v6031_v18, %v6036_v23  ;;  %v1221_v41 = vunpack.c.l.s8.bf16 %v925_v44  ;;  %v1223_v48 = vunpack.c.l.s8.bf16 %v927_v45  ;;  %v1220_v51 = vunpack.c.l.s8.bf16 %v924_v49 }
 0x227   : > { %2479 = vmatprep.subr.bf16.mxu0 %v1165_v59  ;;  %2643 = vmatprep.subr.bf16.mxu1 %v1167_v60  ;;  %v1222_v52 = vunpack.c.l.s8.bf16 %v926_v50  ;;  %v1229_v53 = vunpack.c.h.s8.bf16 %v925_v44  ;;  %v1231_v54 = vunpack.c.h.s8.bf16 %v927_v45  ;;  %v1228_v57 = vunpack.c.h.s8.bf16 %v924_v49  ;;  %v956_v44 = vld [vmem:[%s5977_s27 + $0x240] sm:$0xff]  ;;  %v958_v45 = vld [vmem:[%s5977_s27 + $0x250] sm:$0xff]  ;;  %v965_v49 = vld [vmem:[%s5977_s27 + $0x288] sm:$0xff] }
 0x228   : > { %v6044_v29 = vcombine.high %v6040_v24, %v6040_v24  ;;  %v1230_v58 = vunpack.c.h.s8.bf16 %v926_v50  ;;  %v1237_v59 = vunpack.c.l.s8.bf16 %v933_v55  ;;  %v1239_v60 = vunpack.c.l.s8.bf16 %v935_v56  ;;  %v967_v50 = vld [vmem:[%s5977_s27 + $0x298] sm:$0xff] }
 0x229   : > { %v1244_v5 = vunpack.c.h.s8.bf16 %v932_v61  ;;  %v2423_v11 = vcombine.high %v6031_v18, %v6031_v18  ;;  %v1254_v14 = vunpack.c.l.s8.bf16 %v942_v10  ;;  %v1261_v15 = vunpack.c.h.s8.bf16 %v941_v3 }
 0x22a   : > { %2480 = vmatpush1.bf16.msra.mxu0 %v1164_v63  ;;  %2644 = vmatpush1.bf16.msra.mxu1 %v1166_v0  ;;  %v6050_v32 = vpack.c.bf16 %v6044_v29, %v6044_v29  ;;  %v1236_v63 = vunpack.c.l.s8.bf16 %v932_v61  ;;  %v1238_v0 = vunpack.c.l.s8.bf16 %v934_v62  ;;  %v1262_v22 = vunpack.c.h.s8.bf16 %v942_v10  ;;  %v973_v61 = vld [vmem:[%s5977_s27 + $0x2c8] sm:$0xff]  ;;  %v983_v10 = vld [vmem:[%s5977_s27 + $0x318] sm:$0xff] }
 0x22b   : > { %2481 = vmatprep.subr.bf16.mxu0 %v1173_v1  ;;  %2645 = vmatprep.subr.bf16.mxu1 %v1175_v2  ;;  %v1245_v1 = vunpack.c.h.s8.bf16 %v933_v55  ;;  %v1247_v2 = vunpack.c.h.s8.bf16 %v935_v56  ;;  %v6083_v30 = vpack.c.bf16 %v6040_v24, %v6040_v24  ;;  %v964_v55 = vld [vmem:[%s5977_s27 + $0x280] sm:$0xff]  ;;  %v966_v56 = vld [vmem:[%s5977_s27 + $0x290] sm:$0xff] }
 0x22c   : > { %2505 = vmatprep.mubr.bf16.mxu0 %v6050_v32  ;;  %2669 = vmatprep.mubr.bf16.mxu1 %v6050_v32 }
 0x22e   : > { %2482 = vmatpush1.bf16.msra.mxu0 %v1172_v6  ;;  %2646 = vmatpush1.bf16.msra.mxu1 %v1174_v7  ;;  %v1246_v6 = vunpack.c.h.s8.bf16 %v934_v62  ;;  %v1253_v7 = vunpack.c.l.s8.bf16 %v941_v3  ;;  %v975_v62 = vld [vmem:[%s5977_s27 + $0x2d8] sm:$0xff]  ;;  %v972_v3 = vld [vmem:[%s5977_s27 + $0x2c0] sm:$0xff] }
 0x22f   : > { %2483 = vmatprep.subr.bf16.mxu0 %v1181_v8  ;;  %2647 = vmatprep.subr.bf16.mxu1 %v1183_v9  ;;  %v1255_v8 = vunpack.c.l.s8.bf16 %v943_v4  ;;  %v940_v9 = vld [vmem:[%s5977_s27 + $0x1c0] sm:$0xff] }
 0x230   : > { %v1252_v13 = vunpack.c.l.s8.bf16 %v940_v9  ;;  %v1260_v21 = vunpack.c.h.s8.bf16 %v940_v9  ;;  %v981_v9 = vld [vmem:[%s5977_s27 + $0x308] sm:$0xff] }
 0x232   : > { %2484 = vmatpush1.bf16.msra.mxu0 %v1180_v16  ;;  %2648 = vmatpush1.bf16.msra.mxu1 %v1182_v17  ;;  %v1263_v16 = vunpack.c.h.s8.bf16 %v943_v4  ;;  %v949_v17 = vld [vmem:[%s5977_s27 + $0x208] sm:$0xff]  ;;  %v974_v4 = vld [vmem:[%s5977_s27 + $0x2d0] sm:$0xff] }
 0x233   : > { %2485 = vmatprep.subr.bf16.mxu0 %v1189_v19  ;;  %2649 = vmatprep.subr.bf16.mxu1 %v1191_v20  ;;  %v951_v19 = vld [vmem:[%s5977_s27 + $0x218] sm:$0xff]  ;;  %v6073_v20 = vrot.slane %v2423_v11, %v6036_v23  ;;  %v1269_v18 = vunpack.c.l.s8.bf16 %v949_v17  ;;  %v1324_v11 = vunpack.c.h.s8.bf16 %v972_v3 }
 0x236   : > { %2486 = vmatpush1.bf16.msra.mxu0 %v1188_v25  ;;  %2650 = vmatpush1.bf16.msra.mxu1 %v1190_v26  ;;  %v1271_v25 = vunpack.c.l.s8.bf16 %v951_v19  ;;  %v948_v26 = vld [vmem:[%s5977_s27 + $0x200] sm:$0xff] }
 0x237   : > { %2487 = vmatprep.subr.bf16.mxu0 %v1197_v27  ;;  %2651 = vmatprep.subr.bf16.mxu1 %v1199_v28  ;;  %v950_v27 = vld [vmem:[%s5977_s27 + $0x210] sm:$0xff]  ;;  %v6079_v28 = vcombine.high %v6073_v20, %v6073_v20  ;;  %v1268_v31 = vunpack.c.l.s8.bf16 %v948_v26 }
 0x239   : > { %v6089_v38 = vpack.c.bf16 %v6079_v28, %v6079_v28 }
 0x23a   : > { %2488 = vmatpush1.bf16.msra.mxu0 %v1196_v33  ;;  %2652 = vmatpush1.bf16.msra.mxu1 %v1198_v34  ;;  %v1270_v33 = vunpack.c.l.s8.bf16 %v950_v27  ;;  %v1277_v34 = vunpack.c.h.s8.bf16 %v949_v17  ;;  %v982_v17 = vld [vmem:[%s5977_s27 + $0x310] sm:$0xff] }
 0x23b   : > { %2489 = vmatprep.subr.bf16.mxu0 %v1205_v35  ;;  %2653 = vmatprep.subr.bf16.mxu1 %v1207_v36  ;;  %v1279_v35 = vunpack.c.h.s8.bf16 %v951_v19  ;;  %v957_v36 = vld [vmem:[%s5977_s27 + $0x248] sm:$0xff] }
 0x23e   : > { %2490 = vmatpush1.bf16.msra.mxu0 %v1204_v39  ;;  %2654 = vmatpush1.bf16.msra.mxu1 %v1206_v40  ;;  %v1276_v39 = vunpack.c.h.s8.bf16 %v948_v26  ;;  %v1278_v40 = vunpack.c.h.s8.bf16 %v950_v27  ;;  %v991_v26 = vld [vmem:[%s5977_s27 + $0x358] sm:$0xff] }
 0x23f   : > { %2491 = vmatprep.subr.bf16.mxu0 %v1213_v42  ;;  %2655 = vmatprep.subr.bf16.mxu1 %v1215_v43  ;;  %v1285_v42 = vunpack.c.l.s8.bf16 %v957_v36  ;;  %v1287_v43 = vunpack.c.l.s8.bf16 %v959_v37 }
 0x242   : > { %2492 = vmatpush1.bf16.msra.mxu0 %v1212_v46  ;;  %2656 = vmatpush1.bf16.msra.mxu1 %v1214_v47  ;;  %v1284_v46 = vunpack.c.l.s8.bf16 %v956_v44  ;;  %v1286_v47 = vunpack.c.l.s8.bf16 %v958_v45 }
 0x243   : > { %2493 = vmatprep.subr.bf16.mxu0 %v1221_v41  ;;  %2657 = vmatprep.subr.bf16.mxu1 %v1223_v48  ;;  %v1293_v41 = vunpack.c.h.s8.bf16 %v957_v36  ;;  %v1295_v48 = vunpack.c.h.s8.bf16 %v959_v37  ;;  %v990_v36 = vld [vmem:[%s5977_s27 + $0x350] sm:$0xff] }
 0x246   : > { %2494 = vmatpush1.bf16.msra.mxu0 %v1220_v51  ;;  %2658 = vmatpush1.bf16.msra.mxu1 %v1222_v52  ;;  %v1292_v51 = vunpack.c.h.s8.bf16 %v956_v44  ;;  %v1294_v52 = vunpack.c.h.s8.bf16 %v958_v45  ;;  %v999_v44 = vld [vmem:[%s5977_s27 + $0x398] sm:$0xff] }
 0x247   : > { %2495 = vmatprep.subr.bf16.mxu0 %v1229_v53  ;;  %2659 = vmatprep.subr.bf16.mxu1 %v1231_v54  ;;  %v1301_v53 = vunpack.c.l.s8.bf16 %v965_v49  ;;  %v1303_v54 = vunpack.c.l.s8.bf16 %v967_v50 }
 0x24a   : > { %2496 = vmatpush1.bf16.msra.mxu0 %v1228_v57  ;;  %2660 = vmatpush1.bf16.msra.mxu1 %v1230_v58  ;;  %v1300_v57 = vunpack.c.l.s8.bf16 %v964_v55  ;;  %v1302_v58 = vunpack.c.l.s8.bf16 %v966_v56 }
 0x24b   : > { %2497 = vmatprep.subr.bf16.mxu0 %v1237_v59  ;;  %2661 = vmatprep.subr.bf16.mxu1 %v1239_v60  ;;  %v1309_v59 = vunpack.c.h.s8.bf16 %v965_v49  ;;  %v1311_v60 = vunpack.c.h.s8.bf16 %v967_v50  ;;  %v998_v49 = vld [vmem:[%s5977_s27 + $0x390] sm:$0xff] }
 0x24e   : > { %2498 = vmatpush1.bf16.msra.mxu0 %v1236_v63  ;;  %2662 = vmatpush1.bf16.msra.mxu1 %v1238_v0  ;;  %v1308_v63 = vunpack.c.h.s8.bf16 %v964_v55  ;;  %v1310_v0 = vunpack.c.h.s8.bf16 %v966_v56  ;;  %v1007_v55 = vld [vmem:[%s5977_s27 + $0x3d8] sm:$0xff] }
 0x24f   : > { %2499 = vmatprep.subr.bf16.mxu0 %v1245_v1  ;;  %2663 = vmatprep.subr.bf16.mxu1 %v1247_v2  ;;  %v1317_v1 = vunpack.c.l.s8.bf16 %v973_v61  ;;  %v1319_v2 = vunpack.c.l.s8.bf16 %v975_v62 }
 0x252   : > { %2500 = vmatpush1.bf16.msra.mxu0 %v1244_v5  ;;  %2664 = vmatpush1.bf16.msra.mxu1 %v1246_v6  ;;  %v1316_v5 = vunpack.c.l.s8.bf16 %v972_v3  ;;  %v1318_v6 = vunpack.c.l.s8.bf16 %v974_v4  ;;  %v1013_v3 = vld [vmem:[%s5977_s27 + $0x408] sm:$0xff] }
 0x253   : > { %2501 = vmatprep.subr.bf16.mxu0 %v1253_v7  ;;  %2665 = vmatprep.subr.bf16.mxu1 %v1255_v8  ;;  %v1325_v7 = vunpack.c.h.s8.bf16 %v973_v61  ;;  %v1327_v8 = vunpack.c.h.s8.bf16 %v975_v62  ;;  %v1006_v61 = vld [vmem:[%s5977_s27 + $0x3d0] sm:$0xff]  ;;  %v6121_v62 = vld [vmem:[#allocation2 + $0x8] sm:$0xff] }
 0x256   : > { %2502 = vmatpush1.bf16.msra.mxu0 %v1252_v13  ;;  %2666 = vmatpush1.bf16.msra.mxu1 %v1254_v14  ;;  %v1326_v13 = vunpack.c.h.s8.bf16 %v974_v4  ;;  %v1333_v14 = vunpack.c.l.s8.bf16 %v981_v9  ;;  %v1015_v4 = vld [vmem:[%s5977_s27 + $0x418] sm:$0xff] }
 0x257   : > { %2503 = vmatprep.subr.bf16.mxu0 %v1261_v15  ;;  %2667 = vmatprep.subr.bf16.mxu1 %v1263_v16  ;;  %v1335_v15 = vunpack.c.l.s8.bf16 %v983_v10  ;;  %v980_v16 = vld [vmem:[%s5977_s27 + $0x300] sm:$0xff] }
 0x258   : > { %v1332_v19 = vunpack.c.l.s8.bf16 %v980_v16  ;;  %v1340_v27 = vunpack.c.h.s8.bf16 %v980_v16 }
 0x25a   : > { %2504 = vmatpush1.bf16.msra.mxu0 %v1260_v21  ;;  %2668 = vmatpush1.bf16.msra.mxu1 %v1262_v22  ;;  %v1334_v21 = vunpack.c.l.s8.bf16 %v982_v17  ;;  %v1341_v22 = vunpack.c.h.s8.bf16 %v981_v9  ;;  %v1399_v9 = vunpack.c.l.s8.bf16 %v1015_v4 }
 0x25b   : > { %2514 = vmatprep.subr.bf16.mxu0 %v1269_v18  ;;  %2678 = vmatprep.subr.bf16.mxu1 %v1271_v25  ;;  %v1343_v18 = vunpack.c.h.s8.bf16 %v983_v10  ;;  %v989_v25 = vld [vmem:[%s5977_s27 + $0x348] sm:$0xff]  ;;  %v1012_v10 = vld [vmem:[%s5977_s27 + $0x400] sm:$0xff] }
 0x25d   : > { %2506 = vmatmul.mubr.bf16.vlgmr.msra.gmra.mrb[0].mxu0 %v6083_v30  ;;  %2670 = vmatmul.mubr.bf16.vlgmr.msra.gmra.mrb[0].mxu1 %v6083_v30 }
 0x25e   : > { %2515 = vmatpush1.bf16.msra.mxu0 %v1268_v31  ;;  %2679 = vmatpush1.bf16.msra.mxu1 %v1270_v33  ;;  %v1342_v31 = vunpack.c.h.s8.bf16 %v982_v17  ;;  %v1349_v33 = vunpack.c.l.s8.bf16 %v989_v25  ;;  %v1405_v17 = vunpack.c.h.s8.bf16 %v1013_v3 }
 0x25f   : > { %2516 = vmatprep.subr.bf16.mxu0 %v1277_v34  ;;  %2680 = vmatprep.subr.bf16.mxu1 %v1279_v35  ;;  %v1351_v34 = vunpack.c.l.s8.bf16 %v991_v26  ;;  %v988_v35 = vld [vmem:[%s5977_s27 + $0x340] sm:$0xff] }
 0x260   : > { %2546 = vmatprep.mubr.bf16.mxu0 %v6089_v38  ;;  %2710 = vmatprep.mubr.bf16.mxu1 %v6089_v38  ;;  %v1348_v37 = vunpack.c.l.s8.bf16 %v988_v35  ;;  %v1356_v45 = vunpack.c.h.s8.bf16 %v988_v35 }
 0x262   : > { %2517 = vmatpush1.bf16.msra.mxu0 %v1276_v39  ;;  %2681 = vmatpush1.bf16.msra.mxu1 %v1278_v40  ;;  %v1350_v39 = vunpack.c.l.s8.bf16 %v990_v36  ;;  %v1357_v40 = vunpack.c.h.s8.bf16 %v989_v25  ;;  %v1404_v25 = vunpack.c.h.s8.bf16 %v1012_v10 }
 0x263   : > { %2518 = vmatprep.subr.bf16.mxu0 %v1285_v42  ;;  %2682 = vmatprep.subr.bf16.mxu1 %v1287_v43  ;;  %v1359_v42 = vunpack.c.h.s8.bf16 %v991_v26  ;;  %v997_v43 = vld [vmem:[%s5977_s27 + $0x388] sm:$0xff] }
 0x266   : > { %2519 = vmatpush1.bf16.msra.mxu0 %v1284_v46  ;;  %2683 = vmatpush1.bf16.msra.mxu1 %v1286_v47  ;;  %v1358_v46 = vunpack.c.h.s8.bf16 %v990_v36  ;;  %v1365_v47 = vunpack.c.l.s8.bf16 %v997_v43 }
 0x267   : > { %2520 = vmatprep.subr.bf16.mxu0 %v1293_v41  ;;  %2684 = vmatprep.subr.bf16.mxu1 %v1295_v48  ;;  %v1367_v41 = vunpack.c.l.s8.bf16 %v999_v44  ;;  %v996_v48 = vld [vmem:[%s5977_s27 + $0x380] sm:$0xff] }
 0x268   : > { %v1364_v50 = vunpack.c.l.s8.bf16 %v996_v48  ;;  %v1372_v56 = vunpack.c.h.s8.bf16 %v996_v48 }
 0x26a   : > { %2521 = vmatpush1.bf16.msra.mxu0 %v1292_v51  ;;  %2685 = vmatpush1.bf16.msra.mxu1 %v1294_v52  ;;  %v1366_v51 = vunpack.c.l.s8.bf16 %v998_v49  ;;  %v1373_v52 = vunpack.c.h.s8.bf16 %v997_v43 }
 0x26b   : > { %2522 = vmatprep.subr.bf16.mxu0 %v1301_v53  ;;  %2686 = vmatprep.subr.bf16.mxu1 %v1303_v54  ;;  %v1375_v53 = vunpack.c.h.s8.bf16 %v999_v44  ;;  %v1005_v54 = vld [vmem:[%s5977_s27 + $0x3c8] sm:$0xff] }
 0x26e   : > { %2523 = vmatpush1.bf16.msra.mxu0 %v1300_v57  ;;  %2687 = vmatpush1.bf16.msra.mxu1 %v1302_v58  ;;  %v1374_v57 = vunpack.c.h.s8.bf16 %v998_v49  ;;  %v1381_v58 = vunpack.c.l.s8.bf16 %v1005_v54 }
 0x26f   : > { %2524 = vmatprep.subr.bf16.mxu0 %v1309_v59  ;;  %2688 = vmatprep.subr.bf16.mxu1 %v1311_v60  ;;  %v1383_v59 = vunpack.c.l.s8.bf16 %v1007_v55  ;;  %v1004_v60 = vld [vmem:[%s5977_s27 + $0x3c0] sm:$0xff] }
 0x272   : > { %2525 = vmatpush1.bf16.msra.mxu0 %v1308_v63  ;;  %2689 = vmatpush1.bf16.msra.mxu1 %v1310_v0  ;;  %v1380_v63 = vunpack.c.l.s8.bf16 %v1004_v60  ;;  %v1382_v0 = vunpack.c.l.s8.bf16 %v1006_v61 }
 0x273   : > { %2526 = vmatprep.subr.bf16.mxu0 %v1317_v1  ;;  %2690 = vmatprep.subr.bf16.mxu1 %v1319_v2  ;;  %v1389_v1 = vunpack.c.h.s8.bf16 %v1005_v54  ;;  %v1391_v2 = vunpack.c.h.s8.bf16 %v1007_v55 }
 0x276   : > { %2527 = vmatpush1.bf16.msra.mxu0 %v1316_v5  ;;  %2691 = vmatpush1.bf16.msra.mxu1 %v1318_v6  ;;  %v6127_v5 = vrot.slane %v6121_v62, %v6036_v23  ;;  %v1388_v6 = vunpack.c.h.s8.bf16 %v1004_v60 }
 0x277   : > { %2528 = vmatprep.subr.bf16.mxu0 %v1325_v7  ;;  %2692 = vmatprep.subr.bf16.mxu1 %v1327_v8  ;;  %v1390_v7 = vunpack.c.h.s8.bf16 %v1006_v61  ;;  %v1397_v8 = vunpack.c.l.s8.bf16 %v1013_v3 }
 0x27a   : > { %2529 = vmatpush1.bf16.msra.mxu0 %v1324_v11  ;;  %2693 = vmatpush1.bf16.msra.mxu1 %v1326_v13  ;;  %v1014_v11 = vld [vmem:[%s5977_s27 + $0x410] sm:$0xff]  ;;  %v6133_v13 = vcombine.high %v6127_v5, %v6127_v5 }
 0x27b   : > { %2530 = vmatprep.subr.bf16.mxu0 %v1333_v14  ;;  %2694 = vmatprep.subr.bf16.mxu1 %v1335_v15  ;;  %v6137_v14 = vpack.c.bf16 %v6073_v20, %v6073_v20  ;;  %v1396_v15 = vunpack.c.l.s8.bf16 %v1012_v10  ;;  %v1398_v16 = vunpack.c.l.s8.bf16 %v1014_v11  ;;  %v1406_v26 = vunpack.c.h.s8.bf16 %v1014_v11 }
 0x27e   : > { %2531 = vmatpush1.bf16.msra.mxu0 %v1332_v19  ;;  %2695 = vmatpush1.bf16.msra.mxu1 %v1334_v21  ;;  %v1407_v19 = vunpack.c.h.s8.bf16 %v1015_v4  ;;  %v1021_v21 = vld [vmem:[%s5977_s27 + $0x448] sm:$0xff] }
 0x27f   : > { %2532 = vmatprep.subr.bf16.mxu0 %v1341_v22  ;;  %2696 = vmatprep.subr.bf16.mxu1 %v1343_v18  ;;  %v1023_v22 = vld [vmem:[%s5977_s27 + $0x458] sm:$0xff]  ;;  %v6143_v18 = vpack.c.bf16 %v6133_v13, %v6133_v13 }
 0x282   : > { %2533 = vmatpush1.bf16.msra.mxu0 %v1340_v27  ;;  %2697 = vmatpush1.bf16.msra.mxu1 %v1342_v31  ;;  %v1413_v27 = vunpack.c.l.s8.bf16 %v1021_v21  ;;  %v1415_v31 = vunpack.c.l.s8.bf16 %v1023_v22 }
 0x283   : > { %2534 = vmatprep.subr.bf16.mxu0 %v1349_v33  ;;  %2698 = vmatprep.subr.bf16.mxu1 %v1351_v34  ;;  %v1020_v33 = vld [vmem:[%s5977_s27 + $0x440] sm:$0xff]  ;;  %v1022_v34 = vld [vmem:[%s5977_s27 + $0x450] sm:$0xff] }
 0x284   : > { %v1412_v35 = vunpack.c.l.s8.bf16 %v1020_v33  ;;  %v1414_v36 = vunpack.c.l.s8.bf16 %v1022_v34  ;;  %v1420_v43 = vunpack.c.h.s8.bf16 %v1020_v33  ;;  %v1422_v44 = vunpack.c.h.s8.bf16 %v1022_v34 }
 0x286   : > { %2535 = vmatpush1.bf16.msra.mxu0 %v1348_v37  ;;  %2699 = vmatpush1.bf16.msra.mxu1 %v1350_v39  ;;  %v1421_v37 = vunpack.c.h.s8.bf16 %v1021_v21  ;;  %v1423_v39 = vunpack.c.h.s8.bf16 %v1023_v22 }
 0x287   : > { %2536 = vmatprep.subr.bf16.mxu0 %v1357_v40  ;;  %2700 = vmatprep.subr.bf16.mxu1 %v1359_v42  ;;  %v1029_v40 = vld [vmem:[%s5977_s27 + $0x488] sm:$0xff]  ;;  %v1031_v42 = vld [vmem:[%s5977_s27 + $0x498] sm:$0xff] }
 0x28a   : > { %2537 = vmatpush1.bf16.msra.mxu0 %v1356_v45  ;;  %2701 = vmatpush1.bf16.msra.mxu1 %v1358_v46  ;;  %v1429_v45 = vunpack.c.l.s8.bf16 %v1029_v40  ;;  %v1431_v46 = vunpack.c.l.s8.bf16 %v1031_v42 }
 0x28b   : > { %2538 = vmatprep.subr.bf16.mxu0 %v1365_v47  ;;  %2702 = vmatprep.subr.bf16.mxu1 %v1367_v41  ;;  %v1028_v47 = vld [vmem:[%s5977_s27 + $0x480] sm:$0xff]  ;;  %v1030_v41 = vld [vmem:[%s5977_s27 + $0x490] sm:$0xff] }
 0x28c   : > { %v1428_v48 = vunpack.c.l.s8.bf16 %v1028_v47  ;;  %v1430_v49 = vunpack.c.l.s8.bf16 %v1030_v41  ;;  %v1436_v54 = vunpack.c.h.s8.bf16 %v1028_v47  ;;  %v1438_v55 = vunpack.c.h.s8.bf16 %v1030_v41 }
 0x28e   : > { %2539 = vmatpush1.bf16.msra.mxu0 %v1364_v50  ;;  %2703 = vmatpush1.bf16.msra.mxu1 %v1366_v51  ;;  %v1437_v50 = vunpack.c.h.s8.bf16 %v1029_v40  ;;  %v1439_v51 = vunpack.c.h.s8.bf16 %v1031_v42 }
 0x28f   : > { %2540 = vmatprep.subr.bf16.mxu0 %v1373_v52  ;;  %2704 = vmatprep.subr.bf16.mxu1 %v1375_v53  ;;  %v1037_v52 = vld [vmem:[%s5977_s27 + $0x4c8] sm:$0xff]  ;;  %v1039_v53 = vld [vmem:[%s5977_s27 + $0x4d8] sm:$0xff] }
 0x292   : > { %2541 = vmatpush1.bf16.msra.mxu0 %v1372_v56  ;;  %2705 = vmatpush1.bf16.msra.mxu1 %v1374_v57  ;;  %v1445_v56 = vunpack.c.l.s8.bf16 %v1037_v52  ;;  %v1447_v57 = vunpack.c.l.s8.bf16 %v1039_v53 }
 0x293   : > { %2542 = vmatprep.subr.bf16.mxu0 %v1381_v58  ;;  %2706 = vmatprep.subr.bf16.mxu1 %v1383_v59  ;;  %v1036_v58 = vld [vmem:[%s5977_s27 + $0x4c0] sm:$0xff]  ;;  %v1038_v59 = vld [vmem:[%s5977_s27 + $0x4d0] sm:$0xff] }
 0x294   : > { %v1444_v60 = vunpack.c.l.s8.bf16 %v1036_v58  ;;  %v1446_v61 = vunpack.c.l.s8.bf16 %v1038_v59  ;;  %v1452_v3 = vunpack.c.h.s8.bf16 %v1036_v58  ;;  %v1454_v4 = vunpack.c.h.s8.bf16 %v1038_v59 }
 0x295   : > { %v2440_v58 = vcombine.high %v6121_v62, %v6121_v62 }
 0x296   : > { %2543 = vmatpush1.bf16.msra.mxu0 %v1380_v63  ;;  %2707 = vmatpush1.bf16.msra.mxu1 %v1382_v0  ;;  %v1453_v63 = vunpack.c.h.s8.bf16 %v1037_v52  ;;  %v1455_v0 = vunpack.c.h.s8.bf16 %v1039_v53 }
 0x297   : > { %2544 = vmatprep.subr.bf16.mxu0 %v1389_v1  ;;  %2708 = vmatprep.subr.bf16.mxu1 %v1391_v2  ;;  %v1045_v1 = vld [vmem:[%s5977_s27 + $0x508] sm:$0xff]  ;;  %v1047_v2 = vld [vmem:[%s5977_s27 + $0x518] sm:$0xff] }
 0x29a   : > { %2545 = vmatpush1.bf16.msra.mxu0 %v1388_v6  ;;  %2709 = vmatpush1.bf16.msra.mxu1 %v1390_v7  ;;  %v1461_v6 = vunpack.c.l.s8.bf16 %v1045_v1  ;;  %v1463_v7 = vunpack.c.l.s8.bf16 %v1047_v2 }
 0x29b   : > { %2555 = vmatprep.subr.bf16.mxu0 %v1397_v8  ;;  %2719 = vmatprep.subr.bf16.mxu1 %v1399_v9  ;;  %v1044_v8 = vld [vmem:[%s5977_s27 + $0x500] sm:$0xff]  ;;  %v1046_v9 = vld [vmem:[%s5977_s27 + $0x510] sm:$0xff] }
 0x29c   : > { %v1460_v10 = vunpack.c.l.s8.bf16 %v1044_v8  ;;  %v1462_v11 = vunpack.c.l.s8.bf16 %v1046_v9  ;;  %v1468_v21 = vunpack.c.h.s8.bf16 %v1044_v8  ;;  %v1470_v22 = vunpack.c.h.s8.bf16 %v1046_v9  ;;  %v1078_v8 = vld [vmem:[%s5977_s27 + $0x610] sm:$0xff] }
 0x29d   : > { %2547 = vmatmul.mubr.bf16.vlgmr.msra.gmra.mrb[0].mxu0 %v6137_v14  ;;  %2711 = vmatmul.mubr.bf16.vlgmr.msra.gmra.mrb[0].mxu1 %v6137_v14 }
 0x29e   : > { %2556 = vmatpush1.bf16.msra.mxu0 %v1396_v15  ;;  %2720 = vmatpush1.bf16.msra.mxu1 %v1398_v16  ;;  %v1469_v15 = vunpack.c.h.s8.bf16 %v1045_v1  ;;  %v1471_v16 = vunpack.c.h.s8.bf16 %v1047_v2  ;;  %v1079_v1 = vld [vmem:[%s5977_s27 + $0x618] sm:$0xff]  ;;  %v6180_v2 = vrot.slane %v2440_v58, %v6036_v23  ;;  %v1100_v58 = vld [vmem:[%s5977_s27 + $0x6c0] sm:$0xff] }
 0x29f   : > { %2557 = vmatprep.subr.bf16.mxu0 %v1405_v17  ;;  %2721 = vmatprep.subr.bf16.mxu1 %v1407_v19  ;;  %v1053_v17 = vld [vmem:[%s5977_s27 + $0x548] sm:$0xff]  ;;  %v1055_v19 = vld [vmem:[%s5977_s27 + $0x558] sm:$0xff] }
 0x2a0   : > { %2587 = vmatprep.mubr.bf16.mxu0 %v6143_v18  ;;  %2751 = vmatprep.mubr.bf16.mxu1 %v6143_v18  ;;  %v6186_v9 = vcombine.high %v6180_v2, %v6180_v2 }
 0x2a2   : > { %2558 = vmatpush1.bf16.msra.mxu0 %v1404_v25  ;;  %2722 = vmatpush1.bf16.msra.mxu1 %v1406_v26  ;;  %v1477_v25 = vunpack.c.l.s8.bf16 %v1053_v17  ;;  %v1479_v26 = vunpack.c.l.s8.bf16 %v1055_v19 }
 0x2a3   : > { %2559 = vmatprep.subr.bf16.mxu0 %v1413_v27  ;;  %2723 = vmatprep.subr.bf16.mxu1 %v1415_v31  ;;  %v1052_v27 = vld [vmem:[%s5977_s27 + $0x540] sm:$0xff]  ;;  %v1054_v31 = vld [vmem:[%s5977_s27 + $0x550] sm:$0xff] }
 0x2a4   : > { %v1476_v33 = vunpack.c.l.s8.bf16 %v1052_v27  ;;  %v1478_v34 = vunpack.c.l.s8.bf16 %v1054_v31  ;;  %v1484_v40 = vunpack.c.h.s8.bf16 %v1052_v27  ;;  %v1486_v42 = vunpack.c.h.s8.bf16 %v1054_v31 }
 0x2a6   : > { %2560 = vmatpush1.bf16.msra.mxu0 %v1412_v35  ;;  %2724 = vmatpush1.bf16.msra.mxu1 %v1414_v36  ;;  %v1485_v35 = vunpack.c.h.s8.bf16 %v1053_v17  ;;  %v1487_v36 = vunpack.c.h.s8.bf16 %v1055_v19  ;;  %v1535_v17 = vunpack.c.h.s8.bf16 %v1079_v1  ;;  %v1085_v19 = vld [vmem:[%s5977_s27 + $0x648] sm:$0xff] }
 0x2a7   : > { %2561 = vmatprep.subr.bf16.mxu0 %v1421_v37  ;;  %2725 = vmatprep.subr.bf16.mxu1 %v1423_v39  ;;  %v1061_v37 = vld [vmem:[%s5977_s27 + $0x588] sm:$0xff]  ;;  %v1063_v39 = vld [vmem:[%s5977_s27 + $0x598] sm:$0xff]  ;;  %v1541_v27 = vunpack.c.l.s8.bf16 %v1085_v19 }
 0x2aa   : > { %2562 = vmatpush1.bf16.msra.mxu0 %v1420_v43  ;;  %2726 = vmatpush1.bf16.msra.mxu1 %v1422_v44  ;;  %v1493_v43 = vunpack.c.l.s8.bf16 %v1061_v37  ;;  %v1495_v44 = vunpack.c.l.s8.bf16 %v1063_v39 }
 0x2ab   : > { %2563 = vmatprep.subr.bf16.mxu0 %v1429_v45  ;;  %2727 = vmatprep.subr.bf16.mxu1 %v1431_v46  ;;  %v1060_v45 = vld [vmem:[%s5977_s27 + $0x580] sm:$0xff]  ;;  %v1062_v46 = vld [vmem:[%s5977_s27 + $0x590] sm:$0xff] }
 0x2ac   : > { %v1492_v47 = vunpack.c.l.s8.bf16 %v1060_v45  ;;  %v1494_v41 = vunpack.c.l.s8.bf16 %v1062_v46  ;;  %v1500_v52 = vunpack.c.h.s8.bf16 %v1060_v45  ;;  %v1502_v53 = vunpack.c.h.s8.bf16 %v1062_v46 }
 0x2ae   : > { %2564 = vmatpush1.bf16.msra.mxu0 %v1428_v48  ;;  %2728 = vmatpush1.bf16.msra.mxu1 %v1430_v49  ;;  %v1501_v48 = vunpack.c.h.s8.bf16 %v1061_v37  ;;  %v1503_v49 = vunpack.c.h.s8.bf16 %v1063_v39  ;;  %v1549_v37 = vunpack.c.h.s8.bf16 %v1085_v19 }
 0x2af   : > { %2565 = vmatprep.subr.bf16.mxu0 %v1437_v50  ;;  %2729 = vmatprep.subr.bf16.mxu1 %v1439_v51  ;;  %v1069_v50 = vld [vmem:[%s5977_s27 + $0x5c8] sm:$0xff]  ;;  %v1071_v51 = vld [vmem:[%s5977_s27 + $0x5d8] sm:$0xff] }
 0x2b2   : > { %2566 = vmatpush1.bf16.msra.mxu0 %v1436_v54  ;;  %2730 = vmatpush1.bf16.msra.mxu1 %v1438_v55  ;;  %v1509_v54 = vunpack.c.l.s8.bf16 %v1069_v50  ;;  %v1511_v55 = vunpack.c.l.s8.bf16 %v1071_v51 }
 0x2b3   : > { %2567 = vmatprep.subr.bf16.mxu0 %v1445_v56  ;;  %2731 = vmatprep.subr.bf16.mxu1 %v1447_v57  ;;  %v1068_v56 = vld [vmem:[%s5977_s27 + $0x5c0] sm:$0xff]  ;;  %v1070_v57 = vld [vmem:[%s5977_s27 + $0x5d0] sm:$0xff] }
 0x2b4   : > { %v1508_v59 = vunpack.c.l.s8.bf16 %v1068_v56 }
 0x2b6   : > { %2568 = vmatpush1.bf16.msra.mxu0 %v1444_v60  ;;  %2732 = vmatpush1.bf16.msra.mxu1 %v1446_v61  ;;  %v1510_v60 = vunpack.c.l.s8.bf16 %v1070_v57  ;;  %v1517_v61 = vunpack.c.h.s8.bf16 %v1069_v50 }
 0x2b7   : > { %2569 = vmatprep.subr.bf16.mxu0 %v1453_v63  ;;  %2733 = vmatprep.subr.bf16.mxu1 %v1455_v0  ;;  %v1519_v63 = vunpack.c.h.s8.bf16 %v1071_v51  ;;  %v1077_v0 = vld [vmem:[%s5977_s27 + $0x608] sm:$0xff] }
 0x2b8   : > { %v1525_v62 = vunpack.c.l.s8.bf16 %v1077_v0 }
 0x2ba   : > { %2570 = vmatpush1.bf16.msra.mxu0 %v1452_v3  ;;  %2734 = vmatpush1.bf16.msra.mxu1 %v1454_v4  ;;  %v1516_v3 = vunpack.c.h.s8.bf16 %v1068_v56  ;;  %v1518_v4 = vunpack.c.h.s8.bf16 %v1070_v57 }
 0x2bb   : > { %2571 = vmatprep.subr.bf16.mxu0 %v1461_v6  ;;  %2735 = vmatprep.subr.bf16.mxu1 %v1463_v7  ;;  %v1527_v6 = vunpack.c.l.s8.bf16 %v1079_v1  ;;  %v1076_v7 = vld [vmem:[%s5977_s27 + $0x600] sm:$0xff]  ;;  %v1109_v1 = vld [vmem:[%s5977_s27 + $0x708] sm:$0xff] }
 0x2be   : > { %2572 = vmatpush1.bf16.msra.mxu0 %v1460_v10  ;;  %2736 = vmatpush1.bf16.msra.mxu1 %v1462_v11  ;;  %v6190_v10 = vpack.c.bf16 %v6127_v5, %v6127_v5  ;;  %v1524_v11 = vunpack.c.l.s8.bf16 %v1076_v7 }
 0x2bf   : > { %2573 = vmatprep.subr.bf16.mxu0 %v1469_v15  ;;  %2737 = vmatprep.subr.bf16.mxu1 %v1471_v16  ;;  %v1526_v15 = vunpack.c.l.s8.bf16 %v1078_v8  ;;  %v1533_v16 = vunpack.c.h.s8.bf16 %v1077_v0 }
 0x2c2   : > { %2574 = vmatpush1.bf16.msra.mxu0 %v1468_v21  ;;  %2738 = vmatpush1.bf16.msra.mxu1 %v1470_v22  ;;  %v1087_v21 = vld [vmem:[%s5977_s27 + $0x658] sm:$0xff]  ;;  %v6196_v22 = vpack.c.bf16 %v6186_v9, %v6186_v9 }
 0x2c3   : > { %2575 = vmatprep.subr.bf16.mxu0 %v1477_v25  ;;  %2739 = vmatprep.subr.bf16.mxu1 %v1479_v26  ;;  %v1532_v25 = vunpack.c.h.s8.bf16 %v1076_v7  ;;  %v1534_v26 = vunpack.c.h.s8.bf16 %v1078_v8  ;;  %v1543_v31 = vunpack.c.l.s8.bf16 %v1087_v21  ;;  %v1551_v39 = vunpack.c.h.s8.bf16 %v1087_v21  ;;  %v1108_v8 = vld [vmem:[%s5977_s27 + $0x700] sm:$0xff]  ;;  %v1117_v21 = vld [vmem:[%s5977_s27 + $0x748] sm:$0xff] }
 0x2c6   : > { %2576 = vmatpush1.bf16.msra.mxu0 %v1476_v33  ;;  %2740 = vmatpush1.bf16.msra.mxu1 %v1478_v34  ;;  %v1084_v33 = vld [vmem:[%s5977_s27 + $0x640] sm:$0xff]  ;;  %v1086_v34 = vld [vmem:[%s5977_s27 + $0x650] sm:$0xff] }
 0x2c7   : > { %2577 = vmatprep.subr.bf16.mxu0 %v1485_v35  ;;  %2741 = vmatprep.subr.bf16.mxu1 %v1487_v36  ;;  %v1540_v35 = vunpack.c.l.s8.bf16 %v1084_v33  ;;  %v1542_v36 = vunpack.c.l.s8.bf16 %v1086_v34 }
 0x2ca   : > { %2578 = vmatpush1.bf16.msra.mxu0 %v1484_v40  ;;  %2742 = vmatpush1.bf16.msra.mxu1 %v1486_v42  ;;  %v1093_v40 = vld [vmem:[%s5977_s27 + $0x688] sm:$0xff]  ;;  %v1095_v42 = vld [vmem:[%s5977_s27 + $0x698] sm:$0xff] }
 0x2cb   : > { %2579 = vmatprep.subr.bf16.mxu0 %v1493_v43  ;;  %2743 = vmatprep.subr.bf16.mxu1 %v1495_v44  ;;  %v1548_v43 = vunpack.c.h.s8.bf16 %v1084_v33  ;;  %v1550_v44 = vunpack.c.h.s8.bf16 %v1086_v34  ;;  %v1557_v45 = vunpack.c.l.s8.bf16 %v1093_v40  ;;  %v1559_v46 = vunpack.c.l.s8.bf16 %v1095_v42  ;;  %v1116_v34 = vld [vmem:[%s5977_s27 + $0x740] sm:$0xff] }
 0x2cc   : > { %v1565_v50 = vunpack.c.h.s8.bf16 %v1093_v40  ;;  %v1567_v51 = vunpack.c.h.s8.bf16 %v1095_v42  ;;  %v1125_v42 = vld [vmem:[%s5977_s27 + $0x788] sm:$0xff] }
 0x2ce   : > { %2580 = vmatpush1.bf16.msra.mxu0 %v1492_v47  ;;  %2744 = vmatpush1.bf16.msra.mxu1 %v1494_v41  ;;  %v1092_v47 = vld [vmem:[%s5977_s27 + $0x680] sm:$0xff]  ;;  %v1094_v41 = vld [vmem:[%s5977_s27 + $0x690] sm:$0xff] }
 0x2cf   : > { %2581 = vmatprep.subr.bf16.mxu0 %v1501_v48  ;;  %2745 = vmatprep.subr.bf16.mxu1 %v1503_v49  ;;  %v1556_v48 = vunpack.c.l.s8.bf16 %v1092_v47  ;;  %v1558_v49 = vunpack.c.l.s8.bf16 %v1094_v41 }
 0x2d2   : > { %2582 = vmatpush1.bf16.msra.mxu0 %v1500_v52  ;;  %2746 = vmatpush1.bf16.msra.mxu1 %v1502_v53  ;;  %v1101_v52 = vld [vmem:[%s5977_s27 + $0x6c8] sm:$0xff]  ;;  %v1103_v53 = vld [vmem:[%s5977_s27 + $0x6d8] sm:$0xff] }
 0x2d3   : > { %2583 = vmatprep.subr.bf16.mxu0 %v1509_v54  ;;  %2747 = vmatprep.subr.bf16.mxu1 %v1511_v55  ;;  %v1564_v54 = vunpack.c.h.s8.bf16 %v1092_v47  ;;  %v1566_v55 = vunpack.c.h.s8.bf16 %v1094_v41  ;;  %v1573_v56 = vunpack.c.l.s8.bf16 %v1101_v52  ;;  %v1575_v57 = vunpack.c.l.s8.bf16 %v1103_v53  ;;  %v1124_v41 = vld [vmem:[%s5977_s27 + $0x780] sm:$0xff] }
 0x2d4   : > { %v1583_v0 = vunpack.c.h.s8.bf16 %v1103_v53  ;;  %v1133_v53 = vld [vmem:[%s5977_s27 + $0x7c8] sm:$0xff] }
 0x2d6   : > { %2584 = vmatpush1.bf16.msra.mxu0 %v1508_v59  ;;  %2748 = vmatpush1.bf16.msra.mxu1 %v1510_v60  ;;  %v1102_v59 = vld [vmem:[%s5977_s27 + $0x6d0] sm:$0xff]  ;;  %v1572_v60 = vunpack.c.l.s8.bf16 %v1100_v58 }
 0x2d7   : > { %2585 = vmatprep.subr.bf16.mxu0 %v1517_v61  ;;  %2749 = vmatprep.subr.bf16.mxu1 %v1519_v63  ;;  %v1574_v61 = vunpack.c.l.s8.bf16 %v1102_v59  ;;  %v1581_v63 = vunpack.c.h.s8.bf16 %v1101_v52 }
 0x2da   : > { %2586 = vmatpush1.bf16.msra.mxu0 %v1516_v3  ;;  %2750 = vmatpush1.bf16.msra.mxu1 %v1518_v4  ;;  %v1111_v3 = vld [vmem:[%s5977_s27 + $0x718] sm:$0xff]  ;;  %v1580_v4 = vunpack.c.h.s8.bf16 %v1100_v58 }
 0x2db   : > { %2596 = vmatprep.subr.bf16.mxu0 %v1525_v62  ;;  %2760 = vmatprep.subr.bf16.mxu1 %v1527_v6  ;;  %v1582_v62 = vunpack.c.h.s8.bf16 %v1102_v59  ;;  %v1589_v6 = vunpack.c.l.s8.bf16 %v1109_v1  ;;  %v1591_v7 = vunpack.c.l.s8.bf16 %v1111_v3  ;;  %v1599_v19 = vunpack.c.h.s8.bf16 %v1111_v3  ;;  %v1132_v59 = vld [vmem:[%s5977_s27 + $0x7c0] sm:$0xff]  ;;  %v889_v3 = vld [vmem:[%s5977_s27 + $0x28] sm:$0xff] }
 0x2dd   : > { %2588 = vmatmul.mubr.bf16.vlgmr.msra.gmra.mrb[0].mxu0 %v6190_v10  ;;  %2752 = vmatmul.mubr.bf16.vlgmr.msra.gmra.mrb[0].mxu1 %v6190_v10 }
 0x2de   : > { %2597 = vmatpush1.bf16.msra.mxu0 %v1524_v11  ;;  %2761 = vmatpush1.bf16.msra.mxu1 %v1526_v15  ;;  %v1110_v11 = vld [vmem:[%s5977_s27 + $0x710] sm:$0xff]  ;;  %v1588_v15 = vunpack.c.l.s8.bf16 %v1108_v8 }
 0x2df   : > { %2598 = vmatprep.subr.bf16.mxu0 %v1533_v16  ;;  %2762 = vmatprep.subr.bf16.mxu1 %v1535_v17  ;;  %v1590_v16 = vunpack.c.l.s8.bf16 %v1110_v11  ;;  %v1597_v17 = vunpack.c.h.s8.bf16 %v1109_v1 }
 0x2e0   : > { %2628 = vmatprep.mubr.bf16.mxu0 %v6196_v22  ;;  %2792 = vmatprep.mubr.bf16.mxu1 %v6196_v22 }
 0x2e2   : > { %2599 = vmatpush1.bf16.msra.mxu0 %v1532_v25  ;;  %2763 = vmatpush1.bf16.msra.mxu1 %v1534_v26  ;;  %v1119_v25 = vld [vmem:[%s5977_s27 + $0x758] sm:$0xff]  ;;  %v1596_v26 = vunpack.c.h.s8.bf16 %v1108_v8 }
 0x2e3   : > { %2600 = vmatprep.subr.bf16.mxu0 %v1541_v27  ;;  %2764 = vmatprep.subr.bf16.mxu1 %v1543_v31  ;;  %v1598_v27 = vunpack.c.h.s8.bf16 %v1110_v11  ;;  %v1605_v31 = vunpack.c.l.s8.bf16 %v1117_v21  ;;  %v1607_v33 = vunpack.c.l.s8.bf16 %v1119_v25  ;;  %v1615_v40 = vunpack.c.h.s8.bf16 %v1119_v25  ;;  %v888_v11 = vld [vmem:[%s5977_s27 + $0x20] sm:$0xff] }
 0x2e6   : > { %2601 = vmatpush1.bf16.msra.mxu0 %v1540_v35  ;;  %2765 = vmatpush1.bf16.msra.mxu1 %v1542_v36  ;;  %v1118_v35 = vld [vmem:[%s5977_s27 + $0x750] sm:$0xff]  ;;  %v1604_v36 = vunpack.c.l.s8.bf16 %v1116_v34 }
 0x2e7   : > { %2602 = vmatprep.subr.bf16.mxu0 %v1549_v37  ;;  %2766 = vmatprep.subr.bf16.mxu1 %v1551_v39  ;;  %v1606_v37 = vunpack.c.l.s8.bf16 %v1118_v35  ;;  %v1613_v39 = vunpack.c.h.s8.bf16 %v1117_v21  ;;  %v1153_v21 = vunpack.c.h.s8.bf16 %v889_v3 }
 0x2ea   : > { %2603 = vmatpush1.bf16.msra.mxu0 %v1548_v43  ;;  %2767 = vmatpush1.bf16.msra.mxu1 %v1550_v44  ;;  %v1127_v43 = vld [vmem:[%s5977_s27 + $0x798] sm:$0xff]  ;;  %v1612_v44 = vunpack.c.h.s8.bf16 %v1116_v34 }
 0x2eb   : > { %2604 = vmatprep.subr.bf16.mxu0 %v1557_v45  ;;  %2768 = vmatprep.subr.bf16.mxu1 %v1559_v46  ;;  %v1614_v45 = vunpack.c.h.s8.bf16 %v1118_v35  ;;  %v1621_v46 = vunpack.c.l.s8.bf16 %v1125_v42  ;;  %v1623_v47 = vunpack.c.l.s8.bf16 %v1127_v43  ;;  %v1631_v52 = vunpack.c.h.s8.bf16 %v1127_v43 }
 0x2ee   : > { %2605 = vmatpush1.bf16.msra.mxu0 %v1556_v48  ;;  %2769 = vmatpush1.bf16.msra.mxu1 %v1558_v49  ;;  %v1126_v48 = vld [vmem:[%s5977_s27 + $0x790] sm:$0xff]  ;;  %v1620_v49 = vunpack.c.l.s8.bf16 %v1124_v41 }
 0x2ef   : > { %2606 = vmatprep.subr.bf16.mxu0 %v1565_v50  ;;  %2770 = vmatprep.subr.bf16.mxu1 %v1567_v51  ;;  %v1622_v50 = vunpack.c.l.s8.bf16 %v1126_v48  ;;  %v1629_v51 = vunpack.c.h.s8.bf16 %v1125_v42 }
 0x2f2   : > { %2607 = vmatpush1.bf16.msra.mxu0 %v1564_v54  ;;  %2771 = vmatpush1.bf16.msra.mxu1 %v1566_v55  ;;  %v1135_v54 = vld [vmem:[%s5977_s27 + $0x7d8] sm:$0xff]  ;;  %v1628_v55 = vunpack.c.h.s8.bf16 %v1124_v41 }
 0x2f3   : > { %2608 = vmatprep.subr.bf16.mxu0 %v1573_v56  ;;  %2772 = vmatprep.subr.bf16.mxu1 %v1575_v57  ;;  %v1630_v56 = vunpack.c.h.s8.bf16 %v1126_v48  ;;  %v1637_v57 = vunpack.c.l.s8.bf16 %v1133_v53  ;;  %v1639_v58 = vunpack.c.l.s8.bf16 %v1135_v54  ;;  %v1647_v1 = vunpack.c.h.s8.bf16 %v1135_v54  ;;  %v904_v48 = vld [vmem:[%s5977_s27 + $0xa0] sm:$0xff]  ;;  %v913_v54 = vld [vmem:[%s5977_s27 + $0xe8] sm:$0xff] }
 0x2f6   : > { %2609 = vmatpush1.bf16.msra.mxu0 %v1572_v60  ;;  %2773 = vmatpush1.bf16.msra.mxu1 %v1574_v61  ;;  %v1134_v60 = vld [vmem:[%s5977_s27 + $0x7d0] sm:$0xff]  ;;  %v1636_v61 = vunpack.c.l.s8.bf16 %v1132_v59 }
 0x2f7   : > { %2610 = vmatprep.subr.bf16.mxu0 %v1581_v63  ;;  %2774 = vmatprep.subr.bf16.mxu1 %v1583_v0  ;;  %v1638_v63 = vunpack.c.l.s8.bf16 %v1134_v60  ;;  %v1645_v0 = vunpack.c.h.s8.bf16 %v1133_v53 }
 0x2fa   : > { %2611 = vmatpush1.bf16.msra.mxu0 %v1580_v4  ;;  %2775 = vmatpush1.bf16.msra.mxu1 %v1582_v62  ;;  %v891_v4 = vld [vmem:[%s5977_s27 + $0x38] sm:$0xff]  ;;  %v1644_v62 = vunpack.c.h.s8.bf16 %v1132_v59 }
 0x2fb   : > { %2612 = vmatprep.subr.bf16.mxu0 %v1589_v6  ;;  %2776 = vmatprep.subr.bf16.mxu1 %v1591_v7  ;;  %v1646_v6 = vunpack.c.h.s8.bf16 %v1134_v60  ;;  %v1145_v7 = vunpack.c.l.s8.bf16 %v889_v3  ;;  %v1147_v8 = vunpack.c.l.s8.bf16 %v891_v4  ;;  %v1155_v25 = vunpack.c.h.s8.bf16 %v891_v4  ;;  %v912_v60 = vld [vmem:[%s5977_s27 + $0xe0] sm:$0xff]  ;;  %v921_v4 = vld [vmem:[%s5977_s27 + $0x128] sm:$0xff] }
 0x2fe   : > { %2613 = vmatpush1.bf16.msra.mxu0 %v1588_v15  ;;  %2777 = vmatpush1.bf16.msra.mxu1 %v1590_v16  ;;  %v890_v15 = vld [vmem:[%s5977_s27 + $0x30] sm:$0xff]  ;;  %v6234_v16 = vpack.c.bf16 %v6180_v2, %v6180_v2 }
 0x2ff   : > { %2614 = vmatprep.subr.bf16.mxu0 %v1597_v17  ;;  %2778 = vmatprep.subr.bf16.mxu1 %v1599_v19  ;;  %v1144_v17 = vunpack.c.l.s8.bf16 %v888_v11  ;;  %v1146_v19 = vunpack.c.l.s8.bf16 %v890_v15 }
 0x302   : > { %2615 = vmatpush1.bf16.msra.mxu0 %v1596_v26  ;;  %2779 = vmatpush1.bf16.msra.mxu1 %v1598_v27  ;;  %v897_v26 = vld [vmem:[%s5977_s27 + $0x68] sm:$0xff]  ;;  %v899_v27 = vld [vmem:[%s5977_s27 + $0x78] sm:$0xff] }
 0x303   : > { %2616 = vmatprep.subr.bf16.mxu0 %v1605_v31  ;;  %2780 = vmatprep.subr.bf16.mxu1 %v1607_v33  ;;  %v1152_v31 = vunpack.c.h.s8.bf16 %v888_v11  ;;  %v1154_v33 = vunpack.c.h.s8.bf16 %v890_v15  ;;  %v1161_v34 = vunpack.c.l.s8.bf16 %v897_v26  ;;  %v1163_v35 = vunpack.c.l.s8.bf16 %v899_v27  ;;  %v920_v15 = vld [vmem:[%s5977_s27 + $0x120] sm:$0xff] }
 0x304   : > { %v1169_v42 = vunpack.c.h.s8.bf16 %v897_v26  ;;  %v1171_v43 = vunpack.c.h.s8.bf16 %v899_v27  ;;  %v929_v27 = vld [vmem:[%s5977_s27 + $0x168] sm:$0xff] }
 0x306   : > { %2617 = vmatpush1.bf16.msra.mxu0 %v1604_v36  ;;  %2781 = vmatpush1.bf16.msra.mxu1 %v1606_v37  ;;  %v896_v36 = vld [vmem:[%s5977_s27 + $0x60] sm:$0xff]  ;;  %v898_v37 = vld [vmem:[%s5977_s27 + $0x70] sm:$0xff] }
 0x307   : > { %2618 = vmatprep.subr.bf16.mxu0 %v1613_v39  ;;  %2782 = vmatprep.subr.bf16.mxu1 %v1615_v40  ;;  %v1160_v39 = vunpack.c.l.s8.bf16 %v896_v36  ;;  %v1162_v40 = vunpack.c.l.s8.bf16 %v898_v37 }
 0x30a   : > { %2619 = vmatpush1.bf16.msra.mxu0 %v1612_v44  ;;  %2783 = vmatpush1.bf16.msra.mxu1 %v1614_v45  ;;  %v905_v44 = vld [vmem:[%s5977_s27 + $0xa8] sm:$0xff]  ;;  %v907_v45 = vld [vmem:[%s5977_s27 + $0xb8] sm:$0xff] }
 0x30b   : > { %2620 = vmatprep.subr.bf16.mxu0 %v1621_v46  ;;  %2784 = vmatprep.subr.bf16.mxu1 %v1623_v47  ;;  %v1168_v46 = vunpack.c.h.s8.bf16 %v896_v36  ;;  %v1170_v47 = vunpack.c.h.s8.bf16 %v898_v37  ;;  %v1179_v41 = vunpack.c.l.s8.bf16 %v907_v45  ;;  %v1187_v53 = vunpack.c.h.s8.bf16 %v907_v45  ;;  %v928_v37 = vld [vmem:[%s5977_s27 + $0x160] sm:$0xff]  ;;  %v937_v45 = vld [vmem:[%s5977_s27 + $0x1a8] sm:$0xff] }
 0x30e   : > { %2621 = vmatpush1.bf16.msra.mxu0 %v1620_v49  ;;  %2785 = vmatpush1.bf16.msra.mxu1 %v1622_v50  ;;  %v906_v49 = vld [vmem:[%s5977_s27 + $0xb0] sm:$0xff]  ;;  %v1176_v50 = vunpack.c.l.s8.bf16 %v904_v48 }
 0x30f   : > { %2622 = vmatprep.subr.bf16.mxu0 %v1629_v51  ;;  %2786 = vmatprep.subr.bf16.mxu1 %v1631_v52  ;;  %v1178_v51 = vunpack.c.l.s8.bf16 %v906_v49  ;;  %v1185_v52 = vunpack.c.h.s8.bf16 %v905_v44 }
 0x312   : > { %2623 = vmatpush1.bf16.msra.mxu0 %v1628_v55  ;;  %2787 = vmatpush1.bf16.msra.mxu1 %v1630_v56  ;;  %v915_v55 = vld [vmem:[%s5977_s27 + $0xf8] sm:$0xff]  ;;  %v1184_v56 = vunpack.c.h.s8.bf16 %v904_v48 }
 0x313   : > { %2624 = vmatprep.subr.bf16.mxu0 %v1637_v57  ;;  %2788 = vmatprep.subr.bf16.mxu1 %v1639_v58  ;;  %v1186_v57 = vunpack.c.h.s8.bf16 %v906_v49  ;;  %v1193_v58 = vunpack.c.l.s8.bf16 %v913_v54  ;;  %v1195_v59 = vunpack.c.l.s8.bf16 %v915_v55  ;;  %v1203_v3 = vunpack.c.h.s8.bf16 %v915_v55  ;;  %v936_v49 = vld [vmem:[%s5977_s27 + $0x1a0] sm:$0xff]  ;;  %v945_v55 = vld [vmem:[%s5977_s27 + $0x1e8] sm:$0xff] }
 0x316   : > { %2625 = vmatpush1.bf16.msra.mxu0 %v1636_v61  ;;  %2789 = vmatpush1.bf16.msra.mxu1 %v1638_v63  ;;  %v914_v61 = vld [vmem:[%s5977_s27 + $0xf0] sm:$0xff]  ;;  %v1192_v63 = vunpack.c.l.s8.bf16 %v912_v60 }
 0x317   : > { %2626 = vmatprep.subr.bf16.mxu0 %v1645_v0  ;;  %2790 = vmatprep.subr.bf16.mxu1 %v1647_v1  ;;  %v1194_v0 = vunpack.c.l.s8.bf16 %v914_v61  ;;  %v1201_v1 = vunpack.c.h.s8.bf16 %v913_v54 }
 0x31a   : > { %2627 = vmatpush1.bf16.msra.mxu0 %v1644_v62  ;;  %2791 = vmatpush1.bf16.msra.mxu1 %v1646_v6  ;;  %v923_v62 = vld [vmem:[%s5977_s27 + $0x138] sm:$0xff]  ;;  %v1200_v6 = vunpack.c.h.s8.bf16 %v912_v60 }
 0x31b   : > { %2801 = vmatprep.subr.bf16.mxu0 %v1145_v7  ;;  %2965 = vmatprep.subr.bf16.mxu1 %v1147_v8  ;;  %v1202_v7 = vunpack.c.h.s8.bf16 %v914_v61  ;;  %v1209_v8 = vunpack.c.l.s8.bf16 %v921_v4  ;;  %v1211_v11 = vunpack.c.l.s8.bf16 %v923_v62  ;;  %v1219_v26 = vunpack.c.h.s8.bf16 %v923_v62  ;;  %v944_v61 = vld [vmem:[%s5977_s27 + $0x1e0] sm:$0xff]  ;;  %v953_v62 = vld [vmem:[%s5977_s27 + $0x228] sm:$0xff] }
 0x31d   : > { %2629 = vmatmul.mubr.bf16.vlgmr.msra.gmra.mrb[0].mxu0 %v6234_v16  ;;  %2793 = vmatmul.mubr.bf16.vlgmr.msra.gmra.mrb[0].mxu1 %v6234_v16 }
 0x31e   : > { %2802 = vmatpush1.bf16.msra.mxu0 %v1144_v17  ;;  %2966 = vmatpush1.bf16.msra.mxu1 %v1146_v19  ;;  %v922_v17 = vld [vmem:[%s5977_s27 + $0x130] sm:$0xff]  ;;  %v1208_v19 = vunpack.c.l.s8.bf16 %v920_v15 }
 0x31f   : > { %2803 = vmatprep.subr.bf16.mxu0 %v1153_v21  ;;  %2967 = vmatprep.subr.bf16.mxu1 %v1155_v25  ;;  %v1210_v21 = vunpack.c.l.s8.bf16 %v922_v17  ;;  %v1217_v25 = vunpack.c.h.s8.bf16 %v921_v4 }
 0x320   : > { %2833 = vmatprep.mubr.bf16.mxu0 %v6050_v32  ;;  %2997 = vmatprep.mubr.bf16.mxu1 %v6050_v32  ;;  %v1177_v32 = vunpack.c.l.s8.bf16 %v905_v44 }
 0x322   : > { %2804 = vmatpush1.bf16.msra.mxu0 %v1152_v31  ;;  %2968 = vmatpush1.bf16.msra.mxu1 %v1154_v33  ;;  %v931_v31 = vld [vmem:[%s5977_s27 + $0x178] sm:$0xff]  ;;  %v1216_v33 = vunpack.c.h.s8.bf16 %v920_v15 }
 0x323   : > { %2805 = vmatprep.subr.bf16.mxu0 %v1161_v34  ;;  %2969 = vmatprep.subr.bf16.mxu1 %v1163_v35  ;;  %v1218_v34 = vunpack.c.h.s8.bf16 %v922_v17  ;;  %v1225_v35 = vunpack.c.l.s8.bf16 %v929_v27  ;;  %v1227_v36 = vunpack.c.l.s8.bf16 %v931_v31  ;;  %v1235_v44 = vunpack.c.h.s8.bf16 %v931_v31  ;;  %v952_v17 = vld [vmem:[%s5977_s27 + $0x220] sm:$0xff]  ;;  %v961_v31 = vld [vmem:[%s5977_s27 + $0x268] sm:$0xff] }
 0x326   : > { %2806 = vmatpush1.bf16.msra.mxu0 %v1160_v39  ;;  %2970 = vmatpush1.bf16.msra.mxu1 %v1162_v40  ;;  %v930_v39 = vld [vmem:[%s5977_s27 + $0x170] sm:$0xff]  ;;  %v1224_v40 = vunpack.c.l.s8.bf16 %v928_v37 }
 0x327   : > { %2807 = vmatprep.subr.bf16.mxu0 %v1169_v42  ;;  %2971 = vmatprep.subr.bf16.mxu1 %v1171_v43  ;;  %v1226_v42 = vunpack.c.l.s8.bf16 %v930_v39  ;;  %v1233_v43 = vunpack.c.h.s8.bf16 %v929_v27 }
 0x32a   : > { %2808 = vmatpush1.bf16.msra.mxu0 %v1168_v46  ;;  %2972 = vmatpush1.bf16.msra.mxu1 %v1170_v47  ;;  %v939_v46 = vld [vmem:[%s5977_s27 + $0x1b8] sm:$0xff]  ;;  %v1232_v47 = vunpack.c.h.s8.bf16 %v928_v37 }
 0x32b   : > { %2809 = vmatprep.subr.bf16.mxu0 %v1177_v32  ;;  %2973 = vmatprep.subr.bf16.mxu1 %v1179_v41  ;;  %v1234_v32 = vunpack.c.h.s8.bf16 %v930_v39  ;;  %v1241_v41 = vunpack.c.l.s8.bf16 %v937_v45  ;;  %v1243_v48 = vunpack.c.l.s8.bf16 %v939_v46  ;;  %v1251_v54 = vunpack.c.h.s8.bf16 %v939_v46  ;;  %v960_v39 = vld [vmem:[%s5977_s27 + $0x260] sm:$0xff]  ;;  %v971_v46 = vld [vmem:[%s5977_s27 + $0x2b8] sm:$0xff] }
 0x32e   : > { %2810 = vmatpush1.bf16.msra.mxu0 %v1176_v50  ;;  %2974 = vmatpush1.bf16.msra.mxu1 %v1178_v51  ;;  %v938_v50 = vld [vmem:[%s5977_s27 + $0x1b0] sm:$0xff]  ;;  %v1240_v51 = vunpack.c.l.s8.bf16 %v936_v49 }
 0x32f   : > { %2811 = vmatprep.subr.bf16.mxu0 %v1185_v52  ;;  %2975 = vmatprep.subr.bf16.mxu1 %v1187_v53  ;;  %v1242_v52 = vunpack.c.l.s8.bf16 %v938_v50  ;;  %v1249_v53 = vunpack.c.h.s8.bf16 %v937_v45  ;;  %v969_v45 = vld [vmem:[%s5977_s27 + $0x2a8] sm:$0xff] }
 0x332   : > { %2812 = vmatpush1.bf16.msra.mxu0 %v1184_v56  ;;  %2976 = vmatpush1.bf16.msra.mxu1 %v1186_v57  ;;  %v947_v56 = vld [vmem:[%s5977_s27 + $0x1f8] sm:$0xff]  ;;  %v1248_v57 = vunpack.c.h.s8.bf16 %v936_v49  ;;  %v970_v49 = vld [vmem:[%s5977_s27 + $0x2b0] sm:$0xff] }
 0x333   : > { %2813 = vmatprep.subr.bf16.mxu0 %v1193_v58  ;;  %2977 = vmatprep.subr.bf16.mxu1 %v1195_v59  ;;  %v1250_v58 = vunpack.c.h.s8.bf16 %v938_v50  ;;  %v1257_v59 = vunpack.c.l.s8.bf16 %v945_v55  ;;  %v1259_v60 = vunpack.c.l.s8.bf16 %v947_v56  ;;  %v1267_v4 = vunpack.c.h.s8.bf16 %v947_v56 }
 0x336   : > { %2814 = vmatpush1.bf16.msra.mxu0 %v1192_v63  ;;  %2978 = vmatpush1.bf16.msra.mxu1 %v1194_v0  ;;  %v946_v63 = vld [vmem:[%s5977_s27 + $0x1f0] sm:$0xff]  ;;  %v1256_v0 = vunpack.c.l.s8.bf16 %v944_v61 }
 0x337   : > { %2815 = vmatprep.subr.bf16.mxu0 %v1201_v1  ;;  %2979 = vmatprep.subr.bf16.mxu1 %v1203_v3  ;;  %v1258_v1 = vunpack.c.l.s8.bf16 %v946_v63  ;;  %v1265_v3 = vunpack.c.h.s8.bf16 %v945_v55  ;;  %v979_v55 = vld [vmem:[%s5977_s27 + $0x2f8] sm:$0xff] }
 0x33a   : > { %2816 = vmatpush1.bf16.msra.mxu0 %v1200_v6  ;;  %2980 = vmatpush1.bf16.msra.mxu1 %v1202_v7  ;;  %v955_v6 = vld [vmem:[%s5977_s27 + $0x238] sm:$0xff]  ;;  %v1264_v7 = vunpack.c.h.s8.bf16 %v944_v61  ;;  %v978_v61 = vld [vmem:[%s5977_s27 + $0x2f0] sm:$0xff] }
 0x33b   : > { %2817 = vmatprep.subr.bf16.mxu0 %v1209_v8  ;;  %2981 = vmatprep.subr.bf16.mxu1 %v1211_v11  ;;  %v1266_v8 = vunpack.c.h.s8.bf16 %v946_v63  ;;  %v1273_v11 = vunpack.c.l.s8.bf16 %v953_v62  ;;  %v1275_v15 = vunpack.c.l.s8.bf16 %v955_v6  ;;  %v1283_v27 = vunpack.c.h.s8.bf16 %v955_v6 }
 0x33e   : > { %2818 = vmatpush1.bf16.msra.mxu0 %v1208_v19  ;;  %2982 = vmatpush1.bf16.msra.mxu1 %v1210_v21  ;;  %v954_v19 = vld [vmem:[%s5977_s27 + $0x230] sm:$0xff]  ;;  %v1272_v21 = vunpack.c.l.s8.bf16 %v952_v17 }
 0x33f   : > { %2819 = vmatprep.subr.bf16.mxu0 %v1217_v25  ;;  %2983 = vmatprep.subr.bf16.mxu1 %v1219_v26  ;;  %v1274_v25 = vunpack.c.l.s8.bf16 %v954_v19  ;;  %v1281_v26 = vunpack.c.h.s8.bf16 %v953_v62  ;;  %v987_v62 = vld [vmem:[%s5977_s27 + $0x338] sm:$0xff] }
 0x342   : > { %2820 = vmatpush1.bf16.msra.mxu0 %v1216_v33  ;;  %2984 = vmatpush1.bf16.msra.mxu1 %v1218_v34  ;;  %v963_v33 = vld [vmem:[%s5977_s27 + $0x278] sm:$0xff]  ;;  %v1280_v34 = vunpack.c.h.s8.bf16 %v952_v17  ;;  %v986_v17 = vld [vmem:[%s5977_s27 + $0x330] sm:$0xff] }
 0x343   : > { %2821 = vmatprep.subr.bf16.mxu0 %v1225_v35  ;;  %2985 = vmatprep.subr.bf16.mxu1 %v1227_v36  ;;  %v1282_v35 = vunpack.c.h.s8.bf16 %v954_v19  ;;  %v1289_v36 = vunpack.c.l.s8.bf16 %v961_v31  ;;  %v1291_v37 = vunpack.c.l.s8.bf16 %v963_v33 }
 0x346   : > { %2822 = vmatpush1.bf16.msra.mxu0 %v1224_v40  ;;  %2986 = vmatpush1.bf16.msra.mxu1 %v1226_v42  ;;  %v962_v40 = vld [vmem:[%s5977_s27 + $0x270] sm:$0xff]  ;;  %v1288_v42 = vunpack.c.l.s8.bf16 %v960_v39 }
 0x347   : > { %2823 = vmatprep.subr.bf16.mxu0 %v1233_v43  ;;  %2987 = vmatprep.subr.bf16.mxu1 %v1235_v44  ;;  %v1297_v43 = vunpack.c.h.s8.bf16 %v961_v31  ;;  %v1299_v44 = vunpack.c.h.s8.bf16 %v963_v33  ;;  %v995_v31 = vld [vmem:[%s5977_s27 + $0x378] sm:$0xff] }
 0x34a   : > { %2824 = vmatpush1.bf16.msra.mxu0 %v1232_v47  ;;  %2988 = vmatpush1.bf16.msra.mxu1 %v1234_v32  ;;  %v1296_v47 = vunpack.c.h.s8.bf16 %v960_v39  ;;  %v1298_v32 = vunpack.c.h.s8.bf16 %v962_v40  ;;  %v994_v39 = vld [vmem:[%s5977_s27 + $0x370] sm:$0xff] }
 0x34b   : > { %2825 = vmatprep.subr.bf16.mxu0 %v1241_v41  ;;  %2989 = vmatprep.subr.bf16.mxu1 %v1243_v48  ;;  %v1307_v41 = vunpack.c.l.s8.bf16 %v971_v46  ;;  %v968_v48 = vld [vmem:[%s5977_s27 + $0x2a0] sm:$0xff] }
 0x34c   : > { %v1304_v50 = vunpack.c.l.s8.bf16 %v968_v48  ;;  %v1312_v56 = vunpack.c.h.s8.bf16 %v968_v48  ;;  %v1002_v48 = vld [vmem:[%s5977_s27 + $0x3b0] sm:$0xff] }
 0x34e   : > { %2826 = vmatpush1.bf16.msra.mxu0 %v1240_v51  ;;  %2990 = vmatpush1.bf16.msra.mxu1 %v1242_v52  ;;  %v1306_v51 = vunpack.c.l.s8.bf16 %v970_v49  ;;  %v1313_v52 = vunpack.c.h.s8.bf16 %v969_v45 }
 0x34f   : > { %2827 = vmatprep.subr.bf16.mxu0 %v1249_v53  ;;  %2991 = vmatprep.subr.bf16.mxu1 %v1251_v54  ;;  %v1315_v53 = vunpack.c.h.s8.bf16 %v971_v46  ;;  %v977_v54 = vld [vmem:[%s5977_s27 + $0x2e8] sm:$0xff] }
 0x352   : > { %2828 = vmatpush1.bf16.msra.mxu0 %v1248_v57  ;;  %2992 = vmatpush1.bf16.msra.mxu1 %v1250_v58  ;;  %v1314_v57 = vunpack.c.h.s8.bf16 %v970_v49  ;;  %v1321_v58 = vunpack.c.l.s8.bf16 %v977_v54 }
 0x353   : > { %2829 = vmatprep.subr.bf16.mxu0 %v1257_v59  ;;  %2993 = vmatprep.subr.bf16.mxu1 %v1259_v60  ;;  %v1323_v59 = vunpack.c.l.s8.bf16 %v979_v55  ;;  %v976_v60 = vld [vmem:[%s5977_s27 + $0x2e0] sm:$0xff] }
 0x354   : > { %v1320_v63 = vunpack.c.l.s8.bf16 %v976_v60  ;;  %v1328_v6 = vunpack.c.h.s8.bf16 %v976_v60  ;;  %v1010_v60 = vld [vmem:[%s5977_s27 + $0x3f0] sm:$0xff] }
 0x356   : > { %2830 = vmatpush1.bf16.msra.mxu0 %v1256_v0  ;;  %2994 = vmatpush1.bf16.msra.mxu1 %v1258_v1  ;;  %v1322_v0 = vunpack.c.l.s8.bf16 %v978_v61  ;;  %v1329_v1 = vunpack.c.h.s8.bf16 %v977_v54  ;;  %v1011_v54 = vld [vmem:[%s5977_s27 + $0x3f8] sm:$0xff] }
 0x357   : > { %2831 = vmatprep.subr.bf16.mxu0 %v1265_v3  ;;  %2995 = vmatprep.subr.bf16.mxu1 %v1267_v4  ;;  %v1331_v3 = vunpack.c.h.s8.bf16 %v979_v55  ;;  %v985_v4 = vld [vmem:[%s5977_s27 + $0x328] sm:$0xff] }
 0x35a   : > { %2832 = vmatpush1.bf16.msra.mxu0 %v1264_v7  ;;  %2996 = vmatpush1.bf16.msra.mxu1 %v1266_v8  ;;  %v1330_v7 = vunpack.c.h.s8.bf16 %v978_v61  ;;  %v1337_v8 = vunpack.c.l.s8.bf16 %v985_v4 }
 0x35b   : > { %2842 = vmatprep.subr.bf16.mxu0 %v1273_v11  ;;  %3006 = vmatprep.subr.bf16.mxu1 %v1275_v15  ;;  %v1339_v11 = vunpack.c.l.s8.bf16 %v987_v62  ;;  %v984_v15 = vld [vmem:[%s5977_s27 + $0x320] sm:$0xff] }
 0x35c   : > { %v1336_v19 = vunpack.c.l.s8.bf16 %v984_v15  ;;  %v1344_v33 = vunpack.c.h.s8.bf16 %v984_v15  ;;  %v1018_v15 = vld [vmem:[%s5977_s27 + $0x430] sm:$0xff] }
 0x35d   : > { %2834 = vmatmul.mubr.bf16.vlgmr.msra.gmra.mrb[4].mxu0 %v6083_v30  ;;  %2998 = vmatmul.mubr.bf16.vlgmr.msra.gmra.mrb[4].mxu1 %v6083_v30  ;;  %v1290_v30 = vunpack.c.l.s8.bf16 %v962_v40 }
 0x35e   : > { %2843 = vmatpush1.bf16.msra.mxu0 %v1272_v21  ;;  %3007 = vmatpush1.bf16.msra.mxu1 %v1274_v25  ;;  %v1338_v21 = vunpack.c.l.s8.bf16 %v986_v17  ;;  %v1345_v25 = vunpack.c.h.s8.bf16 %v985_v4  ;;  %v1019_v4 = vld [vmem:[%s5977_s27 + $0x438] sm:$0xff] }
 0x35f   : > { %2844 = vmatprep.subr.bf16.mxu0 %v1281_v26  ;;  %3008 = vmatprep.subr.bf16.mxu1 %v1283_v27  ;;  %v1347_v26 = vunpack.c.h.s8.bf16 %v987_v62  ;;  %v993_v27 = vld [vmem:[%s5977_s27 + $0x368] sm:$0xff] }
 0x360   : > { %2874 = vmatprep.mubr.bf16.mxu0 %v6089_v38  ;;  %3038 = vmatprep.mubr.bf16.mxu1 %v6089_v38  ;;  %v1305_v38 = vunpack.c.l.s8.bf16 %v969_v45  ;;  %v1003_v45 = vld [vmem:[%s5977_s27 + $0x3b8] sm:$0xff] }
 0x362   : > { %2845 = vmatpush1.bf16.msra.mxu0 %v1280_v34  ;;  %3009 = vmatpush1.bf16.msra.mxu1 %v1282_v35  ;;  %v1346_v34 = vunpack.c.h.s8.bf16 %v986_v17  ;;  %v1353_v35 = vunpack.c.l.s8.bf16 %v993_v27 }
 0x363   : > { %2846 = vmatprep.subr.bf16.mxu0 %v1289_v36  ;;  %3010 = vmatprep.subr.bf16.mxu1 %v1291_v37  ;;  %v1355_v36 = vunpack.c.l.s8.bf16 %v995_v31  ;;  %v992_v37 = vld [vmem:[%s5977_s27 + $0x360] sm:$0xff] }
 0x364   : > { %v1352_v40 = vunpack.c.l.s8.bf16 %v992_v37  ;;  %v1360_v46 = vunpack.c.h.s8.bf16 %v992_v37  ;;  %v1026_v37 = vld [vmem:[%s5977_s27 + $0x470] sm:$0xff] }
 0x366   : > { %2847 = vmatpush1.bf16.msra.mxu0 %v1288_v42  ;;  %3011 = vmatpush1.bf16.msra.mxu1 %v1290_v30  ;;  %v1354_v42 = vunpack.c.l.s8.bf16 %v994_v39  ;;  %v1361_v30 = vunpack.c.h.s8.bf16 %v993_v27  ;;  %v1027_v27 = vld [vmem:[%s5977_s27 + $0x478] sm:$0xff] }
 0x367   : > { %2848 = vmatprep.subr.bf16.mxu0 %v1297_v43  ;;  %3012 = vmatprep.subr.bf16.mxu1 %v1299_v44  ;;  %v1363_v43 = vunpack.c.h.s8.bf16 %v995_v31  ;;  %v1001_v44 = vld [vmem:[%s5977_s27 + $0x3a8] sm:$0xff] }
 0x36a   : > { %2849 = vmatpush1.bf16.msra.mxu0 %v1296_v47  ;;  %3013 = vmatpush1.bf16.msra.mxu1 %v1298_v32  ;;  %v1362_v47 = vunpack.c.h.s8.bf16 %v994_v39  ;;  %v1369_v32 = vunpack.c.l.s8.bf16 %v1001_v44 }
 0x36b   : > { %2850 = vmatprep.subr.bf16.mxu0 %v1305_v38  ;;  %3014 = vmatprep.subr.bf16.mxu1 %v1307_v41  ;;  %v1371_v38 = vunpack.c.l.s8.bf16 %v1003_v45  ;;  %v1000_v41 = vld [vmem:[%s5977_s27 + $0x3a0] sm:$0xff] }
 0x36c   : > { %v1368_v49 = vunpack.c.l.s8.bf16 %v1000_v41  ;;  %v1376_v55 = vunpack.c.h.s8.bf16 %v1000_v41 }
 0x36e   : > { %2851 = vmatpush1.bf16.msra.mxu0 %v1304_v50  ;;  %3015 = vmatpush1.bf16.msra.mxu1 %v1306_v51  ;;  %v1370_v50 = vunpack.c.l.s8.bf16 %v1002_v48  ;;  %v1377_v51 = vunpack.c.h.s8.bf16 %v1001_v44 }
 0x36f   : > { %2852 = vmatprep.subr.bf16.mxu0 %v1313_v52  ;;  %3016 = vmatprep.subr.bf16.mxu1 %v1315_v53  ;;  %v1379_v52 = vunpack.c.h.s8.bf16 %v1003_v45  ;;  %v1009_v53 = vld [vmem:[%s5977_s27 + $0x3e8] sm:$0xff]  ;;  %v1426_v45 = vunpack.c.h.s8.bf16 %v1026_v37 }
 0x372   : > { %2853 = vmatpush1.bf16.msra.mxu0 %v1312_v56  ;;  %3017 = vmatpush1.bf16.msra.mxu1 %v1314_v57  ;;  %v1378_v56 = vunpack.c.h.s8.bf16 %v1002_v48  ;;  %v1385_v57 = vunpack.c.l.s8.bf16 %v1009_v53 }
 0x373   : > { %2854 = vmatprep.subr.bf16.mxu0 %v1321_v58  ;;  %3018 = vmatprep.subr.bf16.mxu1 %v1323_v59  ;;  %v1387_v58 = vunpack.c.l.s8.bf16 %v1011_v54  ;;  %v1008_v59 = vld [vmem:[%s5977_s27 + $0x3e0] sm:$0xff] }
 0x374   : > { %v1384_v61 = vunpack.c.l.s8.bf16 %v1008_v59  ;;  %v1392_v62 = vunpack.c.h.s8.bf16 %v1008_v59 }
 0x376   : > { %2855 = vmatpush1.bf16.msra.mxu0 %v1320_v63  ;;  %3019 = vmatpush1.bf16.msra.mxu1 %v1322_v0  ;;  %v1386_v63 = vunpack.c.l.s8.bf16 %v1010_v60  ;;  %v1393_v0 = vunpack.c.h.s8.bf16 %v1009_v53 }
 0x377   : > { %2856 = vmatprep.subr.bf16.mxu0 %v1329_v1  ;;  %3020 = vmatprep.subr.bf16.mxu1 %v1331_v3  ;;  %v1395_v1 = vunpack.c.h.s8.bf16 %v1011_v54  ;;  %v1017_v3 = vld [vmem:[%s5977_s27 + $0x428] sm:$0xff] }
 0x37a   : > { %2857 = vmatpush1.bf16.msra.mxu0 %v1328_v6  ;;  %3021 = vmatpush1.bf16.msra.mxu1 %v1330_v7  ;;  %v1394_v6 = vunpack.c.h.s8.bf16 %v1010_v60  ;;  %v1401_v7 = vunpack.c.l.s8.bf16 %v1017_v3 }
 0x37b   : > { %2858 = vmatprep.subr.bf16.mxu0 %v1337_v8  ;;  %3022 = vmatprep.subr.bf16.mxu1 %v1339_v11  ;;  %v1403_v8 = vunpack.c.l.s8.bf16 %v1019_v4  ;;  %v1016_v11 = vld [vmem:[%s5977_s27 + $0x420] sm:$0xff] }
 0x37c   : > { %v1400_v17 = vunpack.c.l.s8.bf16 %v1016_v11  ;;  %v1408_v31 = vunpack.c.h.s8.bf16 %v1016_v11 }
 0x37e   : > { %2859 = vmatpush1.bf16.msra.mxu0 %v1336_v19  ;;  %3023 = vmatpush1.bf16.msra.mxu1 %v1338_v21  ;;  %v1402_v19 = vunpack.c.l.s8.bf16 %v1018_v15  ;;  %v1409_v21 = vunpack.c.h.s8.bf16 %v1017_v3 }
 0x37f   : > { %2860 = vmatprep.subr.bf16.mxu0 %v1345_v25  ;;  %3024 = vmatprep.subr.bf16.mxu1 %v1347_v26  ;;  %v1411_v25 = vunpack.c.h.s8.bf16 %v1019_v4  ;;  %v1025_v26 = vld [vmem:[%s5977_s27 + $0x468] sm:$0xff] }
 0x382   : > { %2861 = vmatpush1.bf16.msra.mxu0 %v1344_v33  ;;  %3025 = vmatpush1.bf16.msra.mxu1 %v1346_v34  ;;  %v1410_v33 = vunpack.c.h.s8.bf16 %v1018_v15  ;;  %v1417_v34 = vunpack.c.l.s8.bf16 %v1025_v26 }
 0x383   : > { %2862 = vmatprep.subr.bf16.mxu0 %v1353_v35  ;;  %3026 = vmatprep.subr.bf16.mxu1 %v1355_v36  ;;  %v1419_v35 = vunpack.c.l.s8.bf16 %v1027_v27  ;;  %v1024_v36 = vld [vmem:[%s5977_s27 + $0x460] sm:$0xff] }
 0x384   : > { %v1416_v39 = vunpack.c.l.s8.bf16 %v1024_v36  ;;  %v1424_v44 = vunpack.c.h.s8.bf16 %v1024_v36 }
 0x386   : > { %2863 = vmatpush1.bf16.msra.mxu0 %v1352_v40  ;;  %3027 = vmatpush1.bf16.msra.mxu1 %v1354_v42  ;;  %v1425_v40 = vunpack.c.h.s8.bf16 %v1025_v26  ;;  %v1427_v42 = vunpack.c.h.s8.bf16 %v1027_v27 }
 0x387   : > { %2864 = vmatprep.subr.bf16.mxu0 %v1361_v30  ;;  %3028 = vmatprep.subr.bf16.mxu1 %v1363_v43  ;;  %v1033_v30 = vld [vmem:[%s5977_s27 + $0x4a8] sm:$0xff]  ;;  %v1035_v43 = vld [vmem:[%s5977_s27 + $0x4b8] sm:$0xff] }
 0x388   : > { %v1441_v48 = vunpack.c.h.s8.bf16 %v1033_v30 }
 0x38a   : > { %2865 = vmatpush1.bf16.msra.mxu0 %v1360_v46  ;;  %3029 = vmatpush1.bf16.msra.mxu1 %v1362_v47  ;;  %v1435_v46 = vunpack.c.l.s8.bf16 %v1035_v43  ;;  %v1032_v47 = vld [vmem:[%s5977_s27 + $0x4a0] sm:$0xff] }
 0x38b   : > { %2866 = vmatprep.subr.bf16.mxu0 %v1369_v32  ;;  %3030 = vmatprep.subr.bf16.mxu1 %v1371_v38  ;;  %v1034_v32 = vld [vmem:[%s5977_s27 + $0x4b0] sm:$0xff]  ;;  %v1432_v38 = vunpack.c.l.s8.bf16 %v1032_v47 }
 0x38c   : > { %v1434_v41 = vunpack.c.l.s8.bf16 %v1034_v32  ;;  %v1442_v53 = vunpack.c.h.s8.bf16 %v1034_v32 }
 0x38e   : > { %2867 = vmatpush1.bf16.msra.mxu0 %v1368_v49  ;;  %3031 = vmatpush1.bf16.msra.mxu1 %v1370_v50  ;;  %v1443_v49 = vunpack.c.h.s8.bf16 %v1035_v43  ;;  %v1041_v50 = vld [vmem:[%s5977_s27 + $0x4e8] sm:$0xff] }
 0x38f   : > { %2868 = vmatprep.subr.bf16.mxu0 %v1377_v51  ;;  %3032 = vmatprep.subr.bf16.mxu1 %v1379_v52  ;;  %v1043_v51 = vld [vmem:[%s5977_s27 + $0x4f8] sm:$0xff]  ;;  %v1440_v52 = vunpack.c.h.s8.bf16 %v1032_v47  ;;  %v1449_v54 = vunpack.c.l.s8.bf16 %v1041_v50  ;;  %v1457_v60 = vunpack.c.h.s8.bf16 %v1041_v50 }
 0x392   : > { %2869 = vmatpush1.bf16.msra.mxu0 %v1376_v55  ;;  %3033 = vmatpush1.bf16.msra.mxu1 %v1378_v56  ;;  %v1451_v55 = vunpack.c.l.s8.bf16 %v1043_v51  ;;  %v1040_v56 = vld [vmem:[%s5977_s27 + $0x4e0] sm:$0xff] }
 0x393   : > { %2870 = vmatprep.subr.bf16.mxu0 %v1385_v57  ;;  %3034 = vmatprep.subr.bf16.mxu1 %v1387_v58  ;;  %v1042_v57 = vld [vmem:[%s5977_s27 + $0x4f0] sm:$0xff]  ;;  %v1448_v58 = vunpack.c.l.s8.bf16 %v1040_v56 }
 0x394   : > { %v1450_v59 = vunpack.c.l.s8.bf16 %v1042_v57  ;;  %v1458_v3 = vunpack.c.h.s8.bf16 %v1042_v57 }
 0x396   : > { %2871 = vmatpush1.bf16.msra.mxu0 %v1384_v61  ;;  %3035 = vmatpush1.bf16.msra.mxu1 %v1386_v63  ;;  %v1459_v61 = vunpack.c.h.s8.bf16 %v1043_v51  ;;  %v1049_v63 = vld [vmem:[%s5977_s27 + $0x528] sm:$0xff] }
 0x397   : > { %2872 = vmatprep.subr.bf16.mxu0 %v1393_v0  ;;  %3036 = vmatprep.subr.bf16.mxu1 %v1395_v1  ;;  %v1051_v0 = vld [vmem:[%s5977_s27 + $0x538] sm:$0xff]  ;;  %v1456_v1 = vunpack.c.h.s8.bf16 %v1040_v56  ;;  %v1465_v4 = vunpack.c.l.s8.bf16 %v1049_v63  ;;  %v1473_v15 = vunpack.c.h.s8.bf16 %v1049_v63 }
 0x39a   : > { %2873 = vmatpush1.bf16.msra.mxu0 %v1392_v62  ;;  %3037 = vmatpush1.bf16.msra.mxu1 %v1394_v6  ;;  %v1467_v62 = vunpack.c.l.s8.bf16 %v1051_v0  ;;  %v1048_v6 = vld [vmem:[%s5977_s27 + $0x520] sm:$0xff] }
 0x39b   : > { %2883 = vmatprep.subr.bf16.mxu0 %v1401_v7  ;;  %3047 = vmatprep.subr.bf16.mxu1 %v1403_v8  ;;  %v1050_v7 = vld [vmem:[%s5977_s27 + $0x530] sm:$0xff]  ;;  %v1464_v8 = vunpack.c.l.s8.bf16 %v1048_v6 }
 0x39c   : > { %v1466_v11 = vunpack.c.l.s8.bf16 %v1050_v7  ;;  %v1474_v26 = vunpack.c.h.s8.bf16 %v1050_v7 }
 0x39d   : > { %2875 = vmatmul.mubr.bf16.vlgmr.msra.gmra.mrb[4].mxu0 %v6137_v14  ;;  %3039 = vmatmul.mubr.bf16.vlgmr.msra.gmra.mrb[4].mxu1 %v6137_v14  ;;  %v1418_v14 = vunpack.c.l.s8.bf16 %v1026_v37 }
 0x39e   : > { %2884 = vmatpush1.bf16.msra.mxu0 %v1400_v17  ;;  %3048 = vmatpush1.bf16.msra.mxu1 %v1402_v19  ;;  %v1475_v17 = vunpack.c.h.s8.bf16 %v1051_v0  ;;  %v1057_v19 = vld [vmem:[%s5977_s27 + $0x568] sm:$0xff] }
 0x39f   : > { %2885 = vmatprep.subr.bf16.mxu0 %v1409_v21  ;;  %3049 = vmatprep.subr.bf16.mxu1 %v1411_v25  ;;  %v1059_v21 = vld [vmem:[%s5977_s27 + $0x578] sm:$0xff]  ;;  %v1472_v25 = vunpack.c.h.s8.bf16 %v1048_v6  ;;  %v1481_v27 = vunpack.c.l.s8.bf16 %v1057_v19  ;;  %v1489_v37 = vunpack.c.h.s8.bf16 %v1057_v19 }
 0x3a0   : > { %2915 = vmatprep.mubr.bf16.mxu0 %v6143_v18  ;;  %3079 = vmatprep.mubr.bf16.mxu1 %v6143_v18  ;;  %v1433_v18 = vunpack.c.l.s8.bf16 %v1033_v30 }
 0x3a2   : > { %2886 = vmatpush1.bf16.msra.mxu0 %v1408_v31  ;;  %3050 = vmatpush1.bf16.msra.mxu1 %v1410_v33  ;;  %v1483_v31 = vunpack.c.l.s8.bf16 %v1059_v21  ;;  %v1056_v33 = vld [vmem:[%s5977_s27 + $0x560] sm:$0xff] }
 0x3a3   : > { %2887 = vmatprep.subr.bf16.mxu0 %v1417_v34  ;;  %3051 = vmatprep.subr.bf16.mxu1 %v1419_v35  ;;  %v1058_v34 = vld [vmem:[%s5977_s27 + $0x570] sm:$0xff]  ;;  %v1480_v35 = vunpack.c.l.s8.bf16 %v1056_v33 }
 0x3a4   : > { %v1482_v36 = vunpack.c.l.s8.bf16 %v1058_v34  ;;  %v1490_v30 = vunpack.c.h.s8.bf16 %v1058_v34 }
 0x3a6   : > { %2888 = vmatpush1.bf16.msra.mxu0 %v1416_v39  ;;  %3052 = vmatpush1.bf16.msra.mxu1 %v1418_v14  ;;  %v1491_v39 = vunpack.c.h.s8.bf16 %v1059_v21  ;;  %v1065_v14 = vld [vmem:[%s5977_s27 + $0x5a8] sm:$0xff] }
 0x3a7   : > { %2889 = vmatprep.subr.bf16.mxu0 %v1425_v40  ;;  %3053 = vmatprep.subr.bf16.mxu1 %v1427_v42  ;;  %v1067_v40 = vld [vmem:[%s5977_s27 + $0x5b8] sm:$0xff]  ;;  %v1488_v42 = vunpack.c.h.s8.bf16 %v1056_v33  ;;  %v1497_v43 = vunpack.c.l.s8.bf16 %v1065_v14  ;;  %v1505_v32 = vunpack.c.h.s8.bf16 %v1065_v14 }
 0x3aa   : > { %2890 = vmatpush1.bf16.msra.mxu0 %v1424_v44  ;;  %3054 = vmatpush1.bf16.msra.mxu1 %v1426_v45  ;;  %v1499_v44 = vunpack.c.l.s8.bf16 %v1067_v40  ;;  %v1064_v45 = vld [vmem:[%s5977_s27 + $0x5a0] sm:$0xff] }
 0x3ab   : > { %2891 = vmatprep.subr.bf16.mxu0 %v1433_v18  ;;  %3055 = vmatprep.subr.bf16.mxu1 %v1435_v46  ;;  %v1066_v18 = vld [vmem:[%s5977_s27 + $0x5b0] sm:$0xff]  ;;  %v1496_v46 = vunpack.c.l.s8.bf16 %v1064_v45 }
 0x3ac   : > { %v1498_v47 = vunpack.c.l.s8.bf16 %v1066_v18  ;;  %v1506_v50 = vunpack.c.h.s8.bf16 %v1066_v18  ;;  %v6361_v18 = vld [vmem:[%s5983_s22] sm:$0xff] }
 0x3ae   : > { %2892 = vmatpush1.bf16.msra.mxu0 %v1432_v38  ;;  %3056 = vmatpush1.bf16.msra.mxu1 %v1434_v41  ;;  %v1507_v38 = vunpack.c.h.s8.bf16 %v1067_v40  ;;  %v1073_v41 = vld [vmem:[%s5977_s27 + $0x5e8] sm:$0xff]  ;;  %v1096_v40 = vld [vmem:[%s5977_s27 + $0x6a0] sm:$0xff] }
 0x3af   : > { %2893 = vmatprep.subr.bf16.mxu0 %v1441_v48  ;;  %3057 = vmatprep.subr.bf16.mxu1 %v1443_v49  ;;  %v1075_v48 = vld [vmem:[%s5977_s27 + $0x5f8] sm:$0xff]  ;;  %v1504_v49 = vunpack.c.h.s8.bf16 %v1064_v45  ;;  %v1513_v51 = vunpack.c.l.s8.bf16 %v1073_v41  ;;  %v1521_v57 = vunpack.c.h.s8.bf16 %v1073_v41 }
 0x3b0   : > { %v1107_v41 = vld [vmem:[%s5977_s27 + $0x6f8] sm:$0xff] }
 0x3b2   : > { %2894 = vmatpush1.bf16.msra.mxu0 %v1440_v52  ;;  %3058 = vmatpush1.bf16.msra.mxu1 %v1442_v53  ;;  %v1515_v52 = vunpack.c.l.s8.bf16 %v1075_v48  ;;  %v1072_v53 = vld [vmem:[%s5977_s27 + $0x5e0] sm:$0xff] }
 0x3b3   : > { %2895 = vmatprep.subr.bf16.mxu0 %v1449_v54  ;;  %3059 = vmatprep.subr.bf16.mxu1 %v1451_v55  ;;  %v1074_v54 = vld [vmem:[%s5977_s27 + $0x5f0] sm:$0xff]  ;;  %v1512_v55 = vunpack.c.l.s8.bf16 %v1072_v53 }
 0x3b4   : > { %v1514_v56 = vunpack.c.l.s8.bf16 %v1074_v54  ;;  %v1522_v63 = vunpack.c.h.s8.bf16 %v1074_v54  ;;  %v1104_v54 = vld [vmem:[%s5977_s27 + $0x6e0] sm:$0xff] }
 0x3b6   : > { %2896 = vmatpush1.bf16.msra.mxu0 %v1448_v58  ;;  %3060 = vmatpush1.bf16.msra.mxu1 %v1450_v59  ;;  %v1523_v58 = vunpack.c.h.s8.bf16 %v1075_v48  ;;  %v1081_v59 = vld [vmem:[%s5977_s27 + $0x628] sm:$0xff] }
 0x3b7   : > { %2897 = vmatprep.subr.bf16.mxu0 %v1457_v60  ;;  %3061 = vmatprep.subr.bf16.mxu1 %v1459_v61  ;;  %v1083_v60 = vld [vmem:[%s5977_s27 + $0x638] sm:$0xff]  ;;  %v1520_v61 = vunpack.c.h.s8.bf16 %v1072_v53  ;;  %v1529_v0 = vunpack.c.l.s8.bf16 %v1081_v59  ;;  %v1537_v7 = vunpack.c.h.s8.bf16 %v1081_v59  ;;  %v1579_v53 = vunpack.c.l.s8.bf16 %v1107_v41 }
 0x3ba   : > { %2898 = vmatpush1.bf16.msra.mxu0 %v1456_v1  ;;  %3062 = vmatpush1.bf16.msra.mxu1 %v1458_v3  ;;  %v1531_v1 = vunpack.c.l.s8.bf16 %v1083_v60  ;;  %v1080_v3 = vld [vmem:[%s5977_s27 + $0x620] sm:$0xff] }
 0x3bb   : > { %2899 = vmatprep.subr.bf16.mxu0 %v1465_v4  ;;  %3063 = vmatprep.subr.bf16.mxu1 %v1467_v62  ;;  %v1082_v4 = vld [vmem:[%s5977_s27 + $0x630] sm:$0xff]  ;;  %v1528_v62 = vunpack.c.l.s8.bf16 %v1080_v3 }
 0x3bc   : > { %v1530_v6 = vunpack.c.l.s8.bf16 %v1082_v4  ;;  %v1538_v19 = vunpack.c.h.s8.bf16 %v1082_v4 }
 0x3be   : > { %2900 = vmatpush1.bf16.msra.mxu0 %v1464_v8  ;;  %3064 = vmatpush1.bf16.msra.mxu1 %v1466_v11  ;;  %v1539_v8 = vunpack.c.h.s8.bf16 %v1083_v60  ;;  %v1089_v11 = vld [vmem:[%s5977_s27 + $0x668] sm:$0xff] }
 0x3bf   : > { %2901 = vmatprep.subr.bf16.mxu0 %v1473_v15  ;;  %3065 = vmatprep.subr.bf16.mxu1 %v1475_v17  ;;  %v1091_v15 = vld [vmem:[%s5977_s27 + $0x678] sm:$0xff]  ;;  %v1536_v17 = vunpack.c.h.s8.bf16 %v1080_v3  ;;  %v1545_v21 = vunpack.c.l.s8.bf16 %v1089_v11  ;;  %v1553_v33 = vunpack.c.h.s8.bf16 %v1089_v11 }
 0x3c0   : > { %v1555_v34 = vunpack.c.h.s8.bf16 %v1091_v15  ;;  %v1115_v11 = vld [vmem:[%s5977_s27 + $0x738] sm:$0xff] }
 0x3c2   : > { %2902 = vmatpush1.bf16.msra.mxu0 %v1472_v25  ;;  %3066 = vmatpush1.bf16.msra.mxu1 %v1474_v26  ;;  %v1547_v25 = vunpack.c.l.s8.bf16 %v1091_v15  ;;  %v1088_v26 = vld [vmem:[%s5977_s27 + $0x660] sm:$0xff]  ;;  %v1584_v15 = vunpack.c.h.s8.bf16 %v1104_v54 }
 0x3c3   : > { %2903 = vmatprep.subr.bf16.mxu0 %v1481_v27  ;;  %3067 = vmatprep.subr.bf16.mxu1 %v1483_v31  ;;  %v1090_v27 = vld [vmem:[%s5977_s27 + $0x670] sm:$0xff]  ;;  %v1544_v31 = vunpack.c.l.s8.bf16 %v1088_v26 }
 0x3c6   : > { %2904 = vmatpush1.bf16.msra.mxu0 %v1480_v35  ;;  %3068 = vmatpush1.bf16.msra.mxu1 %v1482_v36  ;;  %v1097_v35 = vld [vmem:[%s5977_s27 + $0x6a8] sm:$0xff]  ;;  %v1099_v36 = vld [vmem:[%s5977_s27 + $0x6b8] sm:$0xff] }
 0x3c7   : > { %2905 = vmatprep.subr.bf16.mxu0 %v1489_v37  ;;  %3069 = vmatprep.subr.bf16.mxu1 %v1491_v39  ;;  %v1552_v37 = vunpack.c.h.s8.bf16 %v1088_v26  ;;  %v1554_v39 = vunpack.c.h.s8.bf16 %v1090_v27  ;;  %v1563_v14 = vunpack.c.l.s8.bf16 %v1099_v36  ;;  %v1114_v26 = vld [vmem:[%s5977_s27 + $0x730] sm:$0xff] }
 0x3ca   : > { %2906 = vmatpush1.bf16.msra.mxu0 %v1488_v42  ;;  %3070 = vmatpush1.bf16.msra.mxu1 %v1490_v30  ;;  %v1098_v42 = vld [vmem:[%s5977_s27 + $0x6b0] sm:$0xff]  ;;  %v6357_v30 = vld [vmem:[%s5985_s23] sm:$0xff] }
 0x3cb   : > { %2907 = vmatprep.subr.bf16.mxu0 %v1497_v43  ;;  %3071 = vmatprep.subr.bf16.mxu1 %v1499_v44  ;;  %v3141_v43 = vsub.s32 2, %v6027_v12  ;;  %v1560_v44 = vunpack.c.l.s8.bf16 %v1096_v40  ;;  %v1562_v45 = vunpack.c.l.s8.bf16 %v1098_v42 }
 0x3cd   : > { %v3142_v48 = vrot.slane %v6361_v18, %v3141_v43 }
 0x3ce   : > { %2908 = vmatpush1.bf16.msra.mxu0 %v1496_v46  ;;  %3072 = vmatpush1.bf16.msra.mxu1 %v1498_v47  ;;  %v3183_v46 = vcombine.high %v6357_v30, %v6357_v30  ;;  %v1569_v47 = vunpack.c.h.s8.bf16 %v1097_v35 }
 0x3cf   : > { %2909 = vmatprep.subr.bf16.mxu0 %v1505_v32  ;;  %3073 = vmatprep.subr.bf16.mxu1 %v1507_v38  ;;  %v1571_v32 = vunpack.c.h.s8.bf16 %v1099_v36  ;;  %v1105_v38 = vld [vmem:[%s5977_s27 + $0x6e8] sm:$0xff] }
 0x3d2   : > { %2910 = vmatpush1.bf16.msra.mxu0 %v1504_v49  ;;  %3074 = vmatpush1.bf16.msra.mxu1 %v1506_v50  ;;  %v1568_v49 = vunpack.c.h.s8.bf16 %v1096_v40  ;;  %v1570_v50 = vunpack.c.h.s8.bf16 %v1098_v42  ;;  %v1122_v40 = vld [vmem:[%s5977_s27 + $0x770] sm:$0xff] }
 0x3d3   : > { %2911 = vmatprep.subr.bf16.mxu0 %v1513_v51  ;;  %3075 = vmatprep.subr.bf16.mxu1 %v1515_v52  ;;  %v6371_v51 = vrot.slane %v3183_v46, %v6036_v23  ;;  %v1577_v52 = vunpack.c.l.s8.bf16 %v1105_v38 }
 0x3d6   : > { %2912 = vmatpush1.bf16.msra.mxu0 %v1512_v55  ;;  %3076 = vmatpush1.bf16.msra.mxu1 %v1514_v56  ;;  %v1106_v55 = vld [vmem:[%s5977_s27 + $0x6f0] sm:$0xff] }
 0x3d7   : > { %2913 = vmatprep.subr.bf16.mxu0 %v1521_v57  ;;  %3077 = vmatprep.subr.bf16.mxu1 %v1523_v58 }
 0x3da   : > { %2914 = vmatpush1.bf16.msra.mxu0 %v1520_v61  ;;  %3078 = vmatpush1.bf16.msra.mxu1 %v1522_v63 }
 0x3db   : > { %2924 = vmatprep.subr.bf16.mxu0 %v1529_v0  ;;  %3088 = vmatprep.subr.bf16.mxu1 %v1531_v1  ;;  %v1576_v0 = vunpack.c.l.s8.bf16 %v1104_v54  ;;  %v1578_v1 = vunpack.c.l.s8.bf16 %v1106_v55  ;;  %v6401_v54 = vrot.slane %v6357_v30, %v6036_v23 }
 0x3dd   : > { %2916 = vmatmul.mubr.bf16.vlgmr.msra.gmra.mrb[4].mxu0 %v6190_v10  ;;  %3080 = vmatmul.mubr.bf16.vlgmr.msra.gmra.mrb[4].mxu1 %v6190_v10  ;;  %v1546_v10 = vunpack.c.l.s8.bf16 %v1090_v27  ;;  %v3198_v30 = vcombine.high %v6401_v54, %v6401_v54 }
 0x3de   : > { %2925 = vmatpush1.bf16.msra.mxu0 %v1528_v62  ;;  %3089 = vmatpush1.bf16.msra.mxu1 %v1530_v6  ;;  %v1585_v6 = vunpack.c.h.s8.bf16 %v1105_v38  ;;  %v6395_v38 = vsub.s32 1, %v6027_v12 }
 0x3df   : > { %2926 = vmatprep.subr.bf16.mxu0 %v1537_v7  ;;  %3090 = vmatprep.subr.bf16.mxu1 %v1539_v8  ;;  %v1587_v7 = vunpack.c.h.s8.bf16 %v1107_v41  ;;  %v1113_v8 = vld [vmem:[%s5977_s27 + $0x728] sm:$0xff] }
 0x3e0   : > { %2956 = vmatprep.mubr.bf16.mxu0 %v6196_v22  ;;  %3120 = vmatprep.mubr.bf16.mxu1 %v6196_v22  ;;  %v1561_v22 = vunpack.c.l.s8.bf16 %v1097_v35  ;;  %v1123_v35 = vld [vmem:[%s5977_s27 + $0x778] sm:$0xff] }
 0x3e1   : > { %v1619_v46 = vunpack.c.h.s8.bf16 %v1123_v35 }
 0x3e2   : > { %2927 = vmatpush1.bf16.msra.mxu0 %v1536_v17  ;;  %3091 = vmatpush1.bf16.msra.mxu1 %v1538_v19  ;;  %v1586_v17 = vunpack.c.h.s8.bf16 %v1106_v55  ;;  %v1593_v19 = vunpack.c.l.s8.bf16 %v1113_v8  ;;  %v3138_v55 = vrot.slane %v6361_v18, %v6395_v38 }
 0x3e3   : > { %2928 = vmatprep.subr.bf16.mxu0 %v1545_v21  ;;  %3092 = vmatprep.subr.bf16.mxu1 %v1547_v25  ;;  %v1595_v21 = vunpack.c.l.s8.bf16 %v1115_v11  ;;  %v1112_v25 = vld [vmem:[%s5977_s27 + $0x720] sm:$0xff] }
 0x3e4   : > { %v1592_v27 = vunpack.c.l.s8.bf16 %v1112_v25  ;;  %v1600_v36 = vunpack.c.h.s8.bf16 %v1112_v25 }
 0x3e6   : > { %2929 = vmatpush1.bf16.msra.mxu0 %v1544_v31  ;;  %3093 = vmatpush1.bf16.msra.mxu1 %v1546_v10  ;;  %v1594_v31 = vunpack.c.l.s8.bf16 %v1114_v26  ;;  %v1601_v10 = vunpack.c.h.s8.bf16 %v1113_v8 }
 0x3e7   : > { %2930 = vmatprep.subr.bf16.mxu0 %v1553_v33  ;;  %3094 = vmatprep.subr.bf16.mxu1 %v1555_v34  ;;  %v1603_v33 = vunpack.c.h.s8.bf16 %v1115_v11  ;;  %v1121_v34 = vld [vmem:[%s5977_s27 + $0x768] sm:$0xff]  ;;  %v1136_v11 = vld [vmem:[%s5977_s27 + $0x7e0] sm:$0xff] }
 0x3ea   : > { %2931 = vmatpush1.bf16.msra.mxu0 %v1552_v37  ;;  %3095 = vmatpush1.bf16.msra.mxu1 %v1554_v39  ;;  %v1602_v37 = vunpack.c.h.s8.bf16 %v1114_v26  ;;  %v1609_v39 = vunpack.c.l.s8.bf16 %v1121_v34  ;;  %v4724_v26 = vld [vmem:[%s5977_s27 + $0x808] sm:$0xff] }
 0x3eb   : > { %2932 = vmatprep.subr.bf16.mxu0 %v1561_v22  ;;  %3096 = vmatprep.subr.bf16.mxu1 %v1563_v14  ;;  %v1611_v22 = vunpack.c.l.s8.bf16 %v1123_v35  ;;  %v1120_v14 = vld [vmem:[%s5977_s27 + $0x760] sm:$0xff] }
 0x3ec   : > { %v1608_v42 = vunpack.c.l.s8.bf16 %v1120_v14  ;;  %v1616_v41 = vunpack.c.h.s8.bf16 %v1120_v14 }
 0x3ee   : > { %2933 = vmatpush1.bf16.msra.mxu0 %v1560_v44  ;;  %3097 = vmatpush1.bf16.msra.mxu1 %v1562_v45  ;;  %v1610_v44 = vunpack.c.l.s8.bf16 %v1122_v40  ;;  %v1617_v45 = vunpack.c.h.s8.bf16 %v1121_v34  ;;  %v1910_v34 = vunpack.c.l.s8.bf16 %v4724_v26 }
 0x3ef   : > { %2934 = vmatprep.subr.bf16.mxu0 %v1569_v47  ;;  %3098 = vmatprep.subr.bf16.mxu1 %v1571_v32  ;;  %v1129_v47 = vld [vmem:[%s5977_s27 + $0x7a8] sm:$0xff]  ;;  %v1131_v32 = vld [vmem:[%s5977_s27 + $0x7b8] sm:$0xff] }
 0x3f0   : > { %v6375_v56 = vpop.f32.mrb[0].mxu0  ;;  %v2794_v57 = vpop.f32.mrb[0].mxu1 }
 0x3f1   : > { %v3173_v58 = vmul.f32 %v3142_v48, %v2794_v57  ;;  %v6377_v59 = vpop.f32.mrb[1].mxu0  ;;  %v6379_v60 = vpop.f32.mrb[1].mxu1  ;;  %v1618_v48 = vunpack.c.h.s8.bf16 %v1122_v40 }
 0x3f2   : > { %v2634_v61 = vpop.f32.mrb[2].mxu0  ;;  %v2798_v63 = vpop.f32.mrb[2].mxu1  ;;  %2935 = vmatpush1.bf16.msra.mxu0 %v1568_v49  ;;  %3099 = vmatpush1.bf16.msra.mxu1 %v1570_v50  ;;  %v1625_v49 = vunpack.c.l.s8.bf16 %v1129_v47  ;;  %v1627_v50 = vunpack.c.l.s8.bf16 %v1131_v32 }
 0x3f3   : > { %v6382_v3 = vadd.f32 %v6371_v51, %v3173_v58  ;;  %v2635_v4 = vpop.f32.mrb[3].mxu0  ;;  %v2799_v62 = vpop.f32.mrb[3].mxu1  ;;  %2936 = vmatprep.subr.bf16.mxu0 %v1577_v52  ;;  %3100 = vmatprep.subr.bf16.mxu1 %v1579_v53  ;;  %v1128_v52 = vld [vmem:[%s5977_s27 + $0x7a0] sm:$0xff]  ;;  %v1130_v53 = vld [vmem:[%s5977_s27 + $0x7b0] sm:$0xff]  ;;  %v1633_v61 = vunpack.c.h.s8.bf16 %v1129_v47  ;;  %v1635_v63 = vunpack.c.h.s8.bf16 %v1131_v32 }
 0x3f4   : > { %v1624_v57 = vunpack.c.l.s8.bf16 %v1128_v52  ;;  %v1626_v58 = vunpack.c.l.s8.bf16 %v1130_v53  ;;  %v3172_v4 = vmul.f32 %v3138_v55, %v6377_v59  ;;  %v1632_v62 = vunpack.c.h.s8.bf16 %v1128_v52 }
 0x3f5   : > { %vm3235_vm12 = vcmp.ge.f32.partialorder %v6382_v3, 0.0 }
 0x3f6   : > { %2937 = vmatpush1.bf16.msra.mxu0 %v1576_v0  ;;  %3101 = vmatpush1.bf16.msra.mxu1 %v1578_v1  ;;  %v1137_v0 = vld [vmem:[%s5977_s27 + $0x7e8] sm:$0xff]  ;;  %v1139_v1 = vld [vmem:[%s5977_s27 + $0x7f8] sm:$0xff] }
 0x3f7   : > { %2938 = vmatprep.subr.bf16.mxu0 %v1585_v6  ;;  %3102 = vmatprep.subr.bf16.mxu1 %v1587_v7  ;;  %v1634_v6 = vunpack.c.h.s8.bf16 %v1130_v53  ;;  %v1641_v7 = vunpack.c.l.s8.bf16 %v1137_v0  ;;  %v1643_v8 = vunpack.c.l.s8.bf16 %v1139_v1  ;;  %v1651_v25 = vunpack.c.h.s8.bf16 %v1139_v1  ;;  %v4739_v1 = vld [vmem:[%s5977_s27 + $0x880] sm:$0xff] }
 0x3fa   : > { %2939 = vmatpush1.bf16.msra.mxu0 %v1584_v15  ;;  %3103 = vmatpush1.bf16.msra.mxu1 %v1586_v17  ;;  %v1138_v15 = vld [vmem:[%s5977_s27 + $0x7f0] sm:$0xff]  ;;  %v3226_v17 = vadd.f32 %v3198_v30, %v3172_v4 }
 0x3fb   : > { %2940 = vmatprep.subr.bf16.mxu0 %v1593_v19  ;;  %3104 = vmatprep.subr.bf16.mxu1 %v1595_v21  ;;  %v1640_v19 = vunpack.c.l.s8.bf16 %v1136_v11  ;;  %v1642_v59 = vunpack.c.l.s8.bf16 %v1138_v15  ;;  %v1649_v21 = vunpack.c.h.s8.bf16 %v1137_v0  ;;  %v4741_v30 = vld [vmem:[%s5977_s27 + $0x890] sm:$0xff] }
 0x3fc   : > { %vm3234_vm9 = vcmp.ge.f32.partialorder %v3226_v17, 0.0 }
 0x3fe   : > { %2941 = vmatpush1.bf16.msra.mxu0 %v1592_v27  ;;  %3105 = vmatpush1.bf16.msra.mxu1 %v1594_v31  ;;  %v4726_v27 = vld [vmem:[%s5977_s27 + $0x818] sm:$0xff]  ;;  %v3242_v31 = vmul.f32 0.2, %v3226_v17 }
 0x3ff   : > { %2942 = vmatprep.subr.bf16.mxu0 %v1601_v10  ;;  %3106 = vmatprep.subr.bf16.mxu1 %v1603_v33  ;;  %v1648_v10 = vunpack.c.h.s8.bf16 %v1136_v11  ;;  %v1650_v33 = vunpack.c.h.s8.bf16 %v1138_v15  ;;  %v1912_v35 = vunpack.c.l.s8.bf16 %v4726_v27  ;;  %v4748_v11 = vld [vmem:[%s5977_s27 + $0x8c8] sm:$0xff]  ;;  %v4750_v15 = vld [vmem:[%s5977_s27 + $0x8d8] sm:$0xff] }
 0x402   : > { %2943 = vmatpush1.bf16.msra.mxu0 %v1600_v36  ;;  %3107 = vmatpush1.bf16.msra.mxu1 %v1602_v37  ;;  %v4723_v36 = vld [vmem:[%s5977_s27 + $0x800] sm:$0xff]  ;;  %v4725_v37 = vld [vmem:[%s5977_s27 + $0x810] sm:$0xff] }
 0x403   : > { %2944 = vmatprep.subr.bf16.mxu0 %v1609_v39  ;;  %3108 = vmatprep.subr.bf16.mxu1 %v1611_v22  ;;  %v3250_v39 = vsel %vm3234_vm9, %v3226_v17, %v3242_v31  ;;  %v1909_v22 = vunpack.c.l.s8.bf16 %v4723_v36  ;;  %v1911_v14 = vunpack.c.l.s8.bf16 %v4725_v37  ;;  %v1917_v47 = vunpack.c.h.s8.bf16 %v4723_v36 }
 0x404   : > { %v6416_v40 = vpack.c.bf16 %v3250_v39, %v3250_v39  ;;  %v1919_v32 = vunpack.c.h.s8.bf16 %v4725_v37  ;;  %v1949_v17 = vunpack.c.h.s8.bf16 %v4739_v1 }
 0x406   : > { %2945 = vmatpush1.bf16.msra.mxu0 %v1608_v42  ;;  %3109 = vmatpush1.bf16.msra.mxu1 %v1610_v44  ;;  %v1918_v42 = vunpack.c.h.s8.bf16 %v4724_v26  ;;  %v1920_v44 = vunpack.c.h.s8.bf16 %v4726_v27  ;;  %v4749_v26 = vld [vmem:[%s5977_s27 + $0x8d0] sm:$0xff] }
 0x407   : > { %2946 = vmatprep.subr.bf16.mxu0 %v1617_v45  ;;  %3110 = vmatprep.subr.bf16.mxu1 %v1619_v46  ;;  %v4732_v45 = vld [vmem:[%s5977_s27 + $0x848] sm:$0xff]  ;;  %v4734_v46 = vld [vmem:[%s5977_s27 + $0x858] sm:$0xff]  ;;  %v1959_v31 = vunpack.c.l.s8.bf16 %v4749_v26  ;;  %v1967_v37 = vunpack.c.h.s8.bf16 %v4749_v26 }
 0x408   : > { %v1934_v53 = vunpack.c.h.s8.bf16 %v4732_v45  ;;  %v1936_v55 = vunpack.c.h.s8.bf16 %v4734_v46 }
 0x40a   : > { %2947 = vmatpush1.bf16.msra.mxu0 %v1616_v41  ;;  %3111 = vmatpush1.bf16.msra.mxu1 %v1618_v48  ;;  %v1926_v41 = vunpack.c.l.s8.bf16 %v4732_v45  ;;  %v4731_v48 = vld [vmem:[%s5977_s27 + $0x840] sm:$0xff] }
 0x40b   : > { %2948 = vmatprep.subr.bf16.mxu0 %v1625_v49  ;;  %3112 = vmatprep.subr.bf16.mxu1 %v1627_v50  ;;  %v1928_v49 = vunpack.c.l.s8.bf16 %v4734_v46  ;;  %v4733_v50 = vld [vmem:[%s5977_s27 + $0x850] sm:$0xff] }
 0x40c   : > { %v1927_v52 = vunpack.c.l.s8.bf16 %v4733_v50 }
 0x40e   : > { %2949 = vmatpush1.bf16.msra.mxu0 %v1624_v57  ;;  %3113 = vmatpush1.bf16.msra.mxu1 %v1626_v58  ;;  %v4740_v57 = vld [vmem:[%s5977_s27 + $0x888] sm:$0xff]  ;;  %v4742_v58 = vld [vmem:[%s5977_s27 + $0x898] sm:$0xff] }
 0x40f   : > { %2950 = vmatprep.subr.bf16.mxu0 %v1633_v61  ;;  %3114 = vmatprep.subr.bf16.mxu1 %v1635_v63  ;;  %v1933_v61 = vunpack.c.h.s8.bf16 %v4731_v48  ;;  %v1935_v63 = vunpack.c.h.s8.bf16 %v4733_v50  ;;  %v1942_v0 = vunpack.c.l.s8.bf16 %v4740_v57  ;;  %v1944_v4 = vunpack.c.l.s8.bf16 %v4742_v58 }
 0x412   : > { %2951 = vmatpush1.bf16.msra.mxu0 %v1632_v62  ;;  %3115 = vmatpush1.bf16.msra.mxu1 %v1634_v6  ;;  %v1941_v62 = vunpack.c.l.s8.bf16 %v4739_v1  ;;  %v1943_v6 = vunpack.c.l.s8.bf16 %v4741_v30  ;;  %v4774_v1 = vld [vmem:[%s5977_s27 + $0x998] sm:$0xff] }
 0x413   : > { %2952 = vmatprep.subr.bf16.mxu0 %v1641_v7  ;;  %3116 = vmatprep.subr.bf16.mxu1 %v1643_v8  ;;  %v1950_v7 = vunpack.c.h.s8.bf16 %v4740_v57  ;;  %v1952_v8 = vunpack.c.h.s8.bf16 %v4742_v58  ;;  %v2016_v26 = vunpack.c.h.s8.bf16 %v4774_v1 }
 0x416   : > { %2953 = vmatpush1.bf16.msra.mxu0 %v1640_v19  ;;  %3117 = vmatpush1.bf16.msra.mxu1 %v1642_v59  ;;  %v1951_v19 = vunpack.c.h.s8.bf16 %v4741_v30  ;;  %v1958_v59 = vunpack.c.l.s8.bf16 %v4748_v11 }
 0x417   : > { %2954 = vmatprep.subr.bf16.mxu0 %v1649_v21  ;;  %3118 = vmatprep.subr.bf16.mxu1 %v1651_v25  ;;  %v4747_v21 = vld [vmem:[%s5977_s27 + $0x8c0] sm:$0xff]  ;;  %v1960_v25 = vunpack.c.l.s8.bf16 %v4750_v15 }
 0x418   : > { %v1957_v27 = vunpack.c.l.s8.bf16 %v4747_v21  ;;  %v1965_v36 = vunpack.c.h.s8.bf16 %v4747_v21 }
 0x41a   : > { %2955 = vmatpush1.bf16.msra.mxu0 %v1648_v10  ;;  %3119 = vmatpush1.bf16.msra.mxu1 %v1650_v33  ;;  %v1966_v10 = vunpack.c.h.s8.bf16 %v4748_v11  ;;  %v1968_v33 = vunpack.c.h.s8.bf16 %v4750_v15  ;;  %v2008_v11 = vunpack.c.l.s8.bf16 %v4774_v1  ;;  %v4773_v15 = vld [vmem:[%s5977_s27 + $0x990] sm:$0xff] }
 0x41b   : > { %3265 = vmatprep.subr.bf16.mxu0 %v1910_v34  ;;  %3429 = vmatprep.subr.bf16.mxu1 %v1912_v35  ;;  %v4756_v34 = vld [vmem:[%s5977_s27 + $0x908] sm:$0xff]  ;;  %v4758_v35 = vld [vmem:[%s5977_s27 + $0x918] sm:$0xff] }
 0x41c   : > { %v1974_v39 = vunpack.c.l.s8.bf16 %v4756_v34  ;;  %v1982_v46 = vunpack.c.h.s8.bf16 %v4756_v34  ;;  %v2015_v34 = vunpack.c.h.s8.bf16 %v4773_v15 }
 0x41d   : > { %2957 = vmatmul.mubr.bf16.vlgmr.msra.gmra.mrb[4].mxu0 %v6234_v16  ;;  %3121 = vmatmul.mubr.bf16.vlgmr.msra.gmra.mrb[4].mxu1 %v6234_v16  ;;  %v1925_v16 = vunpack.c.l.s8.bf16 %v4731_v48 }
 0x41e   : > { %3266 = vmatpush1.bf16.msra.mxu0 %v1909_v22  ;;  %3297 = vmatprep.mubr.bf16.mxu0 %v6416_v40  ;;  %v4755_v22 = vld [vmem:[%s5977_s27 + $0x900] sm:$0xff] }
 0x41f   : > { %3430 = vmatpush1.bf16.msra.mxu1 %v1911_v14  ;;  %3461 = vmatprep.mubr.bf16.mxu1 %v6416_v40  ;;  %v1976_v14 = vunpack.c.l.s8.bf16 %v4758_v35  ;;  %v1981_v48 = vunpack.c.h.s8.bf16 %v4755_v22 }
 0x420   : > { %3267 = vmatprep.subr.bf16.mxu0 %v1918_v42  ;;  %3431 = vmatprep.subr.bf16.mxu1 %v1920_v44  ;;  %v4757_v42 = vld [vmem:[%s5977_s27 + $0x910] sm:$0xff]  ;;  %v1973_v44 = vunpack.c.l.s8.bf16 %v4755_v22 }
 0x421   : > { %v1975_v45 = vunpack.c.l.s8.bf16 %v4757_v42 }
 0x422   : > { %3268 = vmatpush1.bf16.msra.mxu0 %v1917_v47  ;;  %v1984_v47 = vunpack.c.h.s8.bf16 %v4758_v35 }
 0x423   : > { %3432 = vmatpush1.bf16.msra.mxu1 %v1919_v32  ;;  %3269 = vmatprep.subr.bf16.mxu0 %v1926_v41  ;;  %v4764_v32 = vld [vmem:[%s5977_s27 + $0x948] sm:$0xff]  ;;  %v4766_v41 = vld [vmem:[%s5977_s27 + $0x958] sm:$0xff] }
 0x424   : > { %3433 = vmatprep.subr.bf16.mxu1 %v1928_v49  ;;  %v1983_v49 = vunpack.c.h.s8.bf16 %v4757_v42  ;;  %v1990_v50 = vunpack.c.l.s8.bf16 %v4764_v32  ;;  %v1998_v58 = vunpack.c.h.s8.bf16 %v4764_v32 }
 0x426   : > { %3270 = vmatpush1.bf16.msra.mxu0 %v1925_v16  ;;  %v4763_v16 = vld [vmem:[%s5977_s27 + $0x940] sm:$0xff] }
 0x427   : > { %3434 = vmatpush1.bf16.msra.mxu1 %v1927_v52  ;;  %3271 = vmatprep.subr.bf16.mxu0 %v1934_v53  ;;  %v1992_v52 = vunpack.c.l.s8.bf16 %v4766_v41  ;;  %v4765_v53 = vld [vmem:[%s5977_s27 + $0x950] sm:$0xff]  ;;  %v1997_v30 = vunpack.c.h.s8.bf16 %v4763_v16 }
 0x428   : > { %3435 = vmatprep.subr.bf16.mxu1 %v1936_v55  ;;  %v1989_v55 = vunpack.c.l.s8.bf16 %v4763_v16  ;;  %v1991_v57 = vunpack.c.l.s8.bf16 %v4765_v53  ;;  %v4789_v16 = vld [vmem:[%s5977_s27 + $0xa10] sm:$0xff] }
 0x42a   : > { %3272 = vmatpush1.bf16.msra.mxu0 %v1933_v61  ;;  %v6443_v61 = vsub.s32 0, %v6027_v12 }
 0x42b   : > { %3436 = vmatpush1.bf16.msra.mxu1 %v1935_v63  ;;  %3273 = vmatprep.subr.bf16.mxu0 %v1942_v0  ;;  %v2000_v63 = vunpack.c.h.s8.bf16 %v4766_v41  ;;  %v4772_v0 = vld [vmem:[%s5977_s27 + $0x988] sm:$0xff] }
 0x42c   : > { %3437 = vmatprep.subr.bf16.mxu1 %v1944_v4  ;;  %v3145_v4 = vsub.s32 3, %v6027_v12  ;;  %v2014_v21 = vunpack.c.h.s8.bf16 %v4772_v0 }
 0x42e   : > { %3274 = vmatpush1.bf16.msra.mxu0 %v1941_v62  ;;  %v1999_v62 = vunpack.c.h.s8.bf16 %v4765_v53 }
 0x42f   : > { %3438 = vmatpush1.bf16.msra.mxu1 %v1943_v6  ;;  %3275 = vmatprep.subr.bf16.mxu0 %v1950_v7  ;;  %v2006_v6 = vunpack.c.l.s8.bf16 %v4772_v0  ;;  %v4771_v7 = vld [vmem:[%s5977_s27 + $0x980] sm:$0xff] }
 0x430   : > { %3439 = vmatprep.subr.bf16.mxu1 %v1952_v8  ;;  %v3134_v8 = vrot.slane %v6361_v18, %v6443_v61 }
 0x432   : > { %3276 = vmatpush1.bf16.msra.mxu0 %v1949_v17  ;;  %v3146_v17 = vrot.slane %v6361_v18, %v3145_v4  ;;  %v2013_v18 = vunpack.c.h.s8.bf16 %v4771_v7 }
 0x433   : > { %3440 = vmatpush1.bf16.msra.mxu1 %v1951_v19  ;;  %3277 = vmatprep.subr.bf16.mxu0 %v1958_v59  ;;  %v2005_v19 = vunpack.c.l.s8.bf16 %v4771_v7  ;;  %v2007_v59 = vunpack.c.l.s8.bf16 %v4773_v15  ;;  %v4797_v15 = vld [vmem:[%s5977_s27 + $0xa50] sm:$0xff] }
 0x434   : > { %3441 = vmatprep.subr.bf16.mxu1 %v1960_v25  ;;  %v3171_v25 = vmul.f32 %v3134_v8, %v6375_v56  ;;  %v4795_v8 = vld [vmem:[%s5977_s27 + $0xa40] sm:$0xff] }
 0x436   : > { %3278 = vmatpush1.bf16.msra.mxu0 %v1957_v27  ;;  %v4780_v27 = vld [vmem:[%s5977_s27 + $0x9c8] sm:$0xff]  ;;  %v3225_v56 = vadd.f32 %v6401_v54, %v3171_v25 }
 0x437   : > { %3442 = vmatpush1.bf16.msra.mxu1 %v1959_v31  ;;  %3279 = vmatprep.subr.bf16.mxu0 %v1966_v10  ;;  %v4782_v31 = vld [vmem:[%s5977_s27 + $0x9d8] sm:$0xff]  ;;  %v3174_v10 = vmul.f32 %v3146_v17, %v6379_v60  ;;  %v2022_v35 = vunpack.c.l.s8.bf16 %v4780_v27  ;;  %v2053_v17 = vunpack.c.l.s8.bf16 %v4795_v8  ;;  %v4804_v25 = vld [vmem:[%s5977_s27 + $0xa88] sm:$0xff] }
 0x438   : > { %3443 = vmatprep.subr.bf16.mxu1 %v1968_v33  ;;  %v3199_v33 = vcombine.high %v6371_v51, %v6371_v51  ;;  %v3241_v42 = vmul.f32 0.2, %v3225_v56  ;;  %vm3233_vm10 = vcmp.ge.f32.partialorder %v3225_v56, 0.0 }
 0x43a   : > { %3280 = vmatpush1.bf16.msra.mxu0 %v1965_v36  ;;  %v4779_v36 = vld [vmem:[%s5977_s27 + $0x9c0] sm:$0xff]  ;;  %v3228_v22 = vadd.f32 %v3199_v33, %v3174_v10  ;;  %v2070_v10 = vunpack.c.l.s8.bf16 %v4804_v25 }
 0x43b   : > { %3444 = vmatpush1.bf16.msra.mxu1 %v1967_v37  ;;  %3281 = vmatprep.subr.bf16.mxu0 %v1974_v39  ;;  %v2024_v37 = vunpack.c.l.s8.bf16 %v4782_v31  ;;  %v4781_v39 = vld [vmem:[%s5977_s27 + $0x9d0] sm:$0xff]  ;;  %v2021_v60 = vunpack.c.l.s8.bf16 %v4779_v36  ;;  %v4803_v33 = vld [vmem:[%s5977_s27 + $0xa80] sm:$0xff] }
 0x43c   : > { %3445 = vmatprep.subr.bf16.mxu1 %v1976_v14  ;;  %v2023_v51 = vunpack.c.l.s8.bf16 %v4781_v39  ;;  %v2030_v14 = vunpack.c.h.s8.bf16 %v4780_v27  ;;  %v3244_v54 = vmul.f32 0.2, %v3228_v22  ;;  %vm3236_vm11 = vcmp.ge.f32.partialorder %v3228_v22, 0.0 }
 0x43d   : > { %v2031_v32 = vunpack.c.h.s8.bf16 %v4781_v39  ;;  %v2061_v27 = vunpack.c.h.s8.bf16 %v4795_v8  ;;  %v4812_v39 = vld [vmem:[%s5977_s27 + $0xac8] sm:$0xff] }
 0x43e   : > { %3282 = vmatpush1.bf16.msra.mxu0 %v1973_v44  ;;  %v2032_v44 = vunpack.c.h.s8.bf16 %v4782_v31  ;;  %v2063_v31 = vunpack.c.h.s8.bf16 %v4797_v15 }
 0x43f   : > { %3446 = vmatpush1.bf16.msra.mxu1 %v1975_v45  ;;  %3283 = vmatprep.subr.bf16.mxu0 %v1982_v46  ;;  %v4788_v45 = vld [vmem:[%s5977_s27 + $0xa08] sm:$0xff]  ;;  %v4790_v46 = vld [vmem:[%s5977_s27 + $0xa18] sm:$0xff] }
 0x440   : > { %3447 = vmatprep.subr.bf16.mxu1 %v1984_v47  ;;  %v2029_v47 = vunpack.c.h.s8.bf16 %v4779_v36  ;;  %v2038_v41 = vunpack.c.l.s8.bf16 %v4788_v45  ;;  %v2048_v1 = vunpack.c.h.s8.bf16 %v4790_v46 }
 0x442   : > { %3284 = vmatpush1.bf16.msra.mxu0 %v1981_v48  ;;  %v4787_v48 = vld [vmem:[%s5977_s27 + $0xa00] sm:$0xff] }
 0x443   : > { %3448 = vmatpush1.bf16.msra.mxu1 %v1983_v49  ;;  %3285 = vmatprep.subr.bf16.mxu0 %v1990_v50  ;;  %v3249_v49 = vsel %vm3233_vm10, %v3225_v56, %v3241_v42  ;;  %v2040_v50 = vunpack.c.l.s8.bf16 %v4790_v46  ;;  %v2037_v53 = vunpack.c.l.s8.bf16 %v4787_v48  ;;  %v2078_v56 = vunpack.c.h.s8.bf16 %v4804_v25  ;;  %v4811_v42 = vld [vmem:[%s5977_s27 + $0xac0] sm:$0xff] }
 0x444   : > { %3449 = vmatprep.subr.bf16.mxu1 %v1992_v52  ;;  %v3252_v52 = vsel %vm3236_vm11, %v3228_v22, %v3244_v54  ;;  %v4814_v22 = vld [vmem:[%s5977_s27 + $0xad8] sm:$0xff]  ;;  %v2085_v46 = vunpack.c.l.s8.bf16 %v4811_v42 }
 0x445   : > { %v6471_v0 = vpack.c.bf16 %v3252_v52, %v3252_v52  ;;  %v4819_v52 = vld [vmem:[%s5977_s27 + $0xb00] sm:$0xff] }
 0x446   : > { %3286 = vmatpush1.bf16.msra.mxu0 %v1989_v55  ;;  %v6468_v55 = vpack.c.bf16 %v3249_v49, %v3249_v49  ;;  %v2093_v49 = vunpack.c.h.s8.bf16 %v4811_v42 }
 0x447   : > { %3450 = vmatpush1.bf16.msra.mxu1 %v1991_v57  ;;  %3287 = vmatprep.subr.bf16.mxu0 %v1998_v58  ;;  %v2039_v57 = vunpack.c.l.s8.bf16 %v4789_v16  ;;  %v2046_v58 = vunpack.c.h.s8.bf16 %v4788_v45  ;;  %v4813_v45 = vld [vmem:[%s5977_s27 + $0xad0] sm:$0xff] }
 0x448   : > { %3451 = vmatprep.subr.bf16.mxu1 %v2000_v63  ;;  %v4796_v63 = vld [vmem:[%s5977_s27 + $0xa48] sm:$0xff]  ;;  %v2087_v54 = vunpack.c.l.s8.bf16 %v4813_v45 }
 0x449   : > { %v2054_v7 = vunpack.c.l.s8.bf16 %v4796_v63 }
 0x44a   : > { %3288 = vmatpush1.bf16.msra.mxu0 %v1997_v30  ;;  %v4798_v30 = vld [vmem:[%s5977_s27 + $0xa58] sm:$0xff] }
 0x44b   : > { %3452 = vmatpush1.bf16.msra.mxu1 %v1999_v62  ;;  %3289 = vmatprep.subr.bf16.mxu0 %v2006_v6  ;;  %v2045_v62 = vunpack.c.h.s8.bf16 %v4787_v48  ;;  %v2047_v6 = vunpack.c.h.s8.bf16 %v4789_v16  ;;  %v4822_v48 = vld [vmem:[%s5977_s27 + $0xb18] sm:$0xff] }
 0x44c   : > { %3453 = vmatprep.subr.bf16.mxu1 %v2008_v11  ;;  %v2056_v11 = vunpack.c.l.s8.bf16 %v4798_v30 }
 0x44e   : > { %3290 = vmatpush1.bf16.msra.mxu0 %v2005_v19  ;;  %v2055_v19 = vunpack.c.l.s8.bf16 %v4797_v15  ;;  %v4827_v15 = vld [vmem:[%s5977_s27 + $0xb40] sm:$0xff] }
 0x44f   : > { %3454 = vmatpush1.bf16.msra.mxu1 %v2007_v59  ;;  %3291 = vmatprep.subr.bf16.mxu0 %v2014_v21  ;;  %v2062_v59 = vunpack.c.h.s8.bf16 %v4796_v63  ;;  %v2064_v21 = vunpack.c.h.s8.bf16 %v4798_v30  ;;  %v2112_v30 = vunpack.c.h.s8.bf16 %v4822_v48 }
 0x450   : > { %3455 = vmatprep.subr.bf16.mxu1 %v2016_v26  ;;  %v4806_v26 = vld [vmem:[%s5977_s27 + $0xa98] sm:$0xff] }
 0x452   : > { %3292 = vmatpush1.bf16.msra.mxu0 %v2013_v18  ;;  %v2072_v18 = vunpack.c.l.s8.bf16 %v4806_v26 }
 0x453   : > { %3456 = vmatpush1.bf16.msra.mxu1 %v2015_v34  ;;  %3293 = vmatprep.subr.bf16.mxu0 %v2022_v35  ;;  %v4805_v34 = vld [vmem:[%s5977_s27 + $0xa90] sm:$0xff]  ;;  %v2069_v35 = vunpack.c.l.s8.bf16 %v4803_v33 }
 0x454   : > { %3457 = vmatprep.subr.bf16.mxu1 %v2024_v37  ;;  %v2071_v36 = vunpack.c.l.s8.bf16 %v4805_v34  ;;  %v2080_v37 = vunpack.c.h.s8.bf16 %v4806_v26 }
 0x456   : > { %3294 = vmatpush1.bf16.msra.mxu0 %v2021_v60  ;;  %v2077_v60 = vunpack.c.h.s8.bf16 %v4803_v33 }
 0x457   : > { %3458 = vmatpush1.bf16.msra.mxu1 %v2023_v51  ;;  %3295 = vmatprep.subr.bf16.mxu0 %v2030_v14  ;;  %v2079_v51 = vunpack.c.h.s8.bf16 %v4805_v34  ;;  %v2086_v14 = vunpack.c.l.s8.bf16 %v4812_v39  ;;  %v4835_v34 = vld [vmem:[%s5977_s27 + $0xb80] sm:$0xff] }
 0x458   : > { %3459 = vmatprep.subr.bf16.mxu1 %v2032_v44  ;;  %v2088_v44 = vunpack.c.l.s8.bf16 %v4814_v22 }
 0x45a   : > { %3296 = vmatpush1.bf16.msra.mxu0 %v2029_v47  ;;  %v2094_v47 = vunpack.c.h.s8.bf16 %v4812_v39 }
 0x45b   : > { %3460 = vmatpush1.bf16.msra.mxu1 %v2031_v32  ;;  %3306 = vmatprep.subr.bf16.mxu0 %v2038_v41  ;;  %v2096_v32 = vunpack.c.h.s8.bf16 %v4814_v22  ;;  %v4820_v41 = vld [vmem:[%s5977_s27 + $0xb08] sm:$0xff] }
 0x45c   : > { %3470 = vmatprep.subr.bf16.mxu1 %v2040_v50  ;;  %v2095_v50 = vunpack.c.h.s8.bf16 %v4813_v45  ;;  %v2102_v16 = vunpack.c.l.s8.bf16 %v4820_v41  ;;  %v4843_v45 = vld [vmem:[%s5977_s27 + $0xbc0] sm:$0xff] }
 0x45d   : > { %3298 = vmatmul.mubr.bf16.vlgmr.msra.gmra.mrb[8].mxu0 %v6468_v55 }
 0x45e   : > { %3462 = vmatmul.mubr.bf16.vlgmr.msra.gmra.mrb[8].mxu1 %v6468_v55  ;;  %3307 = vmatpush1.bf16.msra.mxu0 %v2037_v53  ;;  %v2104_v53 = vunpack.c.l.s8.bf16 %v4822_v48  ;;  %v3243_v48 = vmul.f32 0.2, %v6382_v3 }
 0x45f   : > { %3338 = vmatprep.mubr.bf16.mxu0 %v6471_v0  ;;  %3471 = vmatpush1.bf16.msra.mxu1 %v2039_v57  ;;  %v4821_v57 = vld [vmem:[%s5977_s27 + $0xb10] sm:$0xff] }
 0x460   : > { %3502 = vmatprep.mubr.bf16.mxu1 %v6471_v0  ;;  %3308 = vmatprep.subr.bf16.mxu0 %v2046_v58  ;;  %v2101_v58 = vunpack.c.l.s8.bf16 %v4819_v52  ;;  %v2103_v63 = vunpack.c.l.s8.bf16 %v4821_v57  ;;  %v2111_v8 = vunpack.c.h.s8.bf16 %v4821_v57 }
 0x461   : > { %3472 = vmatprep.subr.bf16.mxu1 %v2048_v1  ;;  %v2110_v1 = vunpack.c.h.s8.bf16 %v4820_v41 }
 0x462   : > { %3309 = vmatpush1.bf16.msra.mxu0 %v2045_v62  ;;  %v4828_v62 = vld [vmem:[%s5977_s27 + $0xb48] sm:$0xff] }
 0x463   : > { %3473 = vmatpush1.bf16.msra.mxu1 %v2047_v6  ;;  %3310 = vmatprep.subr.bf16.mxu0 %v2054_v7  ;;  %v4830_v6 = vld [vmem:[%s5977_s27 + $0xb58] sm:$0xff]  ;;  %v2109_v7 = vunpack.c.h.s8.bf16 %v4819_v52  ;;  %v2126_v25 = vunpack.c.h.s8.bf16 %v4828_v62  ;;  %v2157_v52 = vunpack.c.h.s8.bf16 %v4843_v45 }
 0x464   : > { %3474 = vmatprep.subr.bf16.mxu1 %v2056_v11  ;;  %v2118_v11 = vunpack.c.l.s8.bf16 %v4828_v62  ;;  %v2128_v26 = vunpack.c.h.s8.bf16 %v4830_v6 }
 0x466   : > { %3311 = vmatpush1.bf16.msra.mxu0 %v2053_v17  ;;  %v2120_v17 = vunpack.c.l.s8.bf16 %v4830_v6 }
 0x467   : > { %3475 = vmatpush1.bf16.msra.mxu1 %v2055_v19  ;;  %3312 = vmatprep.subr.bf16.mxu0 %v2062_v59  ;;  %v4829_v19 = vld [vmem:[%s5977_s27 + $0xb50] sm:$0xff]  ;;  %v2117_v59 = vunpack.c.l.s8.bf16 %v4827_v15 }
 0x468   : > { %3476 = vmatprep.subr.bf16.mxu1 %v2064_v21  ;;  %v2119_v21 = vunpack.c.l.s8.bf16 %v4829_v19  ;;  %v2127_v33 = vunpack.c.h.s8.bf16 %v4829_v19 }
 0x46a   : > { %3313 = vmatpush1.bf16.msra.mxu0 %v2061_v27  ;;  %v4836_v27 = vld [vmem:[%s5977_s27 + $0xb88] sm:$0xff] }
 0x46b   : > { %3477 = vmatpush1.bf16.msra.mxu1 %v2063_v31  ;;  %3314 = vmatprep.subr.bf16.mxu0 %v2070_v10  ;;  %v4838_v31 = vld [vmem:[%s5977_s27 + $0xb98] sm:$0xff]  ;;  %v2125_v10 = vunpack.c.h.s8.bf16 %v4827_v15  ;;  %v2142_v39 = vunpack.c.h.s8.bf16 %v4836_v27  ;;  %v4860_v15 = vld [vmem:[%s5977_s27 + $0xc48] sm:$0xff] }
 0x46c   : > { %3478 = vmatprep.subr.bf16.mxu1 %v2072_v18  ;;  %v2134_v18 = vunpack.c.l.s8.bf16 %v4836_v27  ;;  %v2144_v22 = vunpack.c.h.s8.bf16 %v4838_v31 }
 0x46e   : > { %3315 = vmatpush1.bf16.msra.mxu0 %v2069_v35  ;;  %v2136_v35 = vunpack.c.l.s8.bf16 %v4838_v31 }
 0x46f   : > { %3479 = vmatpush1.bf16.msra.mxu1 %v2071_v36  ;;  %3316 = vmatprep.subr.bf16.mxu0 %v2078_v56  ;;  %v4837_v36 = vld [vmem:[%s5977_s27 + $0xb90] sm:$0xff]  ;;  %v2133_v56 = vunpack.c.l.s8.bf16 %v4835_v34 }
 0x470   : > { %3480 = vmatprep.subr.bf16.mxu1 %v2080_v37  ;;  %v2135_v37 = vunpack.c.l.s8.bf16 %v4837_v36  ;;  %v2143_v42 = vunpack.c.h.s8.bf16 %v4837_v36 }
 0x472   : > { %3317 = vmatpush1.bf16.msra.mxu0 %v2077_v60  ;;  %v4844_v60 = vld [vmem:[%s5977_s27 + $0xbc8] sm:$0xff] }
 0x473   : > { %3481 = vmatpush1.bf16.msra.mxu1 %v2079_v51  ;;  %3318 = vmatprep.subr.bf16.mxu0 %v2086_v14  ;;  %v4846_v51 = vld [vmem:[%s5977_s27 + $0xbd8] sm:$0xff]  ;;  %v2141_v14 = vunpack.c.h.s8.bf16 %v4835_v34  ;;  %v2158_v41 = vunpack.c.h.s8.bf16 %v4844_v60 }
 0x474   : > { %3482 = vmatprep.subr.bf16.mxu1 %v2088_v44  ;;  %v2150_v44 = vunpack.c.l.s8.bf16 %v4844_v60  ;;  %v4870_v34 = vld [vmem:[%s5977_s27 + $0xc98] sm:$0xff] }
 0x476   : > { %3319 = vmatpush1.bf16.msra.mxu0 %v2085_v46  ;;  %v2152_v46 = vunpack.c.l.s8.bf16 %v4846_v51 }
 0x477   : > { %3483 = vmatpush1.bf16.msra.mxu1 %v2087_v54  ;;  %3320 = vmatprep.subr.bf16.mxu0 %v2094_v47  ;;  %v4845_v54 = vld [vmem:[%s5977_s27 + $0xbd0] sm:$0xff]  ;;  %v2149_v47 = vunpack.c.l.s8.bf16 %v4843_v45  ;;  %v4878_v45 = vld [vmem:[%s5977_s27 + $0xcd8] sm:$0xff] }
 0x478   : > { %3484 = vmatprep.subr.bf16.mxu1 %v2096_v32  ;;  %v2151_v32 = vunpack.c.l.s8.bf16 %v4845_v54 }
 0x47a   : > { %3321 = vmatpush1.bf16.msra.mxu0 %v2093_v49  ;;  %v2160_v49 = vunpack.c.h.s8.bf16 %v4846_v51 }
 0x47b   : > { %3485 = vmatpush1.bf16.msra.mxu1 %v2095_v50  ;;  %3322 = vmatprep.subr.bf16.mxu0 %v2102_v16  ;;  %v4852_v50 = vld [vmem:[%s5977_s27 + $0xc08] sm:$0xff]  ;;  %v4854_v16 = vld [vmem:[%s5977_s27 + $0xc18] sm:$0xff] }
 0x47c   : > { %3486 = vmatprep.subr.bf16.mxu1 %v2104_v53  ;;  %v2159_v53 = vunpack.c.h.s8.bf16 %v4845_v54  ;;  %v2166_v57 = vunpack.c.l.s8.bf16 %v4852_v50 }
 0x47e   : > { %3323 = vmatpush1.bf16.msra.mxu0 %v2101_v58  ;;  %v4851_v58 = vld [vmem:[%s5977_s27 + $0xc00] sm:$0xff] }
 0x47f   : > { %3487 = vmatpush1.bf16.msra.mxu1 %v2103_v63  ;;  %3324 = vmatprep.subr.bf16.mxu0 %v2110_v1  ;;  %v3251_v63 = vsel %vm3235_vm12, %v6382_v3, %v3243_v48  ;;  %v2168_v1 = vunpack.c.l.s8.bf16 %v4854_v16  ;;  %v2165_v62 = vunpack.c.l.s8.bf16 %v4851_v58  ;;  %v2173_v3 = vunpack.c.h.s8.bf16 %v4851_v58  ;;  %v4877_v48 = vld [vmem:[%s5977_s27 + $0xcd0] sm:$0xff] }
 0x480   : > { %3488 = vmatprep.subr.bf16.mxu1 %v2112_v30  ;;  %v4853_v30 = vld [vmem:[%s5977_s27 + $0xc10] sm:$0xff]  ;;  %v6511_v6 = vpack.c.bf16 %v3251_v63, %v3251_v63  ;;  %v2223_v63 = vunpack.c.h.s8.bf16 %v4877_v48 }
 0x481   : > { %v2175_v19 = vunpack.c.h.s8.bf16 %v4853_v30 }
 0x482   : > { %3325 = vmatpush1.bf16.msra.mxu0 %v2109_v7  ;;  %v2167_v7 = vunpack.c.l.s8.bf16 %v4853_v30  ;;  %v4883_v30 = vld [vmem:[%s5977_s27 + $0xd00] sm:$0xff] }
 0x483   : > { %3489 = vmatpush1.bf16.msra.mxu1 %v2111_v8  ;;  %3326 = vmatprep.subr.bf16.mxu0 %v2118_v11  ;;  %v2174_v8 = vunpack.c.h.s8.bf16 %v4852_v50  ;;  %v2176_v11 = vunpack.c.h.s8.bf16 %v4854_v16  ;;  %v2215_v50 = vunpack.c.l.s8.bf16 %v4877_v48  ;;  %v4907_v48 = vld [vmem:[%s5977_s27 + $0xdc0] sm:$0xff] }
 0x484   : > { %3490 = vmatprep.subr.bf16.mxu1 %v2120_v17  ;;  %v4862_v17 = vld [vmem:[%s5977_s27 + $0xc58] sm:$0xff] }
 0x486   : > { %3327 = vmatpush1.bf16.msra.mxu0 %v2117_v59  ;;  %v2182_v59 = vunpack.c.l.s8.bf16 %v4860_v15 }
 0x487   : > { %3491 = vmatpush1.bf16.msra.mxu1 %v2119_v21  ;;  %3328 = vmatprep.subr.bf16.mxu0 %v2126_v25  ;;  %v4859_v21 = vld [vmem:[%s5977_s27 + $0xc40] sm:$0xff]  ;;  %v2184_v25 = vunpack.c.l.s8.bf16 %v4862_v17 }
 0x488   : > { %3492 = vmatprep.subr.bf16.mxu1 %v2128_v26  ;;  %v4861_v26 = vld [vmem:[%s5977_s27 + $0xc50] sm:$0xff]  ;;  %v2181_v27 = vunpack.c.l.s8.bf16 %v4859_v21 }
 0x489   : > { %v2183_v31 = vunpack.c.l.s8.bf16 %v4861_v26  ;;  %v2191_v36 = vunpack.c.h.s8.bf16 %v4861_v26  ;;  %v4891_v26 = vld [vmem:[%s5977_s27 + $0xd40] sm:$0xff] }
 0x48a   : > { %3329 = vmatpush1.bf16.msra.mxu0 %v2125_v10  ;;  %v2190_v10 = vunpack.c.h.s8.bf16 %v4860_v15 }
 0x48b   : > { %3493 = vmatpush1.bf16.msra.mxu1 %v2127_v33  ;;  %3330 = vmatprep.subr.bf16.mxu0 %v2134_v18  ;;  %v2192_v33 = vunpack.c.h.s8.bf16 %v4862_v17  ;;  %v4868_v18 = vld [vmem:[%s5977_s27 + $0xc88] sm:$0xff] }
 0x48c   : > { %3494 = vmatprep.subr.bf16.mxu1 %v2136_v35  ;;  %v2189_v35 = vunpack.c.h.s8.bf16 %v4859_v21 }
 0x48e   : > { %3331 = vmatpush1.bf16.msra.mxu0 %v2133_v56  ;;  %v2198_v56 = vunpack.c.l.s8.bf16 %v4868_v18 }
 0x48f   : > { %3495 = vmatpush1.bf16.msra.mxu1 %v2135_v37  ;;  %3332 = vmatprep.subr.bf16.mxu0 %v2142_v39  ;;  %v4867_v37 = vld [vmem:[%s5977_s27 + $0xc80] sm:$0xff]  ;;  %v2200_v39 = vunpack.c.l.s8.bf16 %v4870_v34 }
 0x490   : > { %3496 = vmatprep.subr.bf16.mxu1 %v2144_v22  ;;  %v4869_v22 = vld [vmem:[%s5977_s27 + $0xc90] sm:$0xff]  ;;  %v2197_v60 = vunpack.c.l.s8.bf16 %v4867_v37 }
 0x491   : > { %v2199_v51 = vunpack.c.l.s8.bf16 %v4869_v22  ;;  %v2207_v54 = vunpack.c.h.s8.bf16 %v4869_v22  ;;  %v4899_v22 = vld [vmem:[%s5977_s27 + $0xd80] sm:$0xff] }
 0x492   : > { %3333 = vmatpush1.bf16.msra.mxu0 %v2141_v14  ;;  %v2206_v14 = vunpack.c.h.s8.bf16 %v4868_v18 }
 0x493   : > { %3497 = vmatpush1.bf16.msra.mxu1 %v2143_v42  ;;  %3334 = vmatprep.subr.bf16.mxu0 %v2150_v44  ;;  %v2208_v42 = vunpack.c.h.s8.bf16 %v4870_v34  ;;  %v4876_v44 = vld [vmem:[%s5977_s27 + $0xcc8] sm:$0xff] }
 0x494   : > { %3498 = vmatprep.subr.bf16.mxu1 %v2152_v46  ;;  %v2205_v46 = vunpack.c.h.s8.bf16 %v4867_v37  ;;  %v2222_v16 = vunpack.c.h.s8.bf16 %v4876_v44 }
 0x496   : > { %3335 = vmatpush1.bf16.msra.mxu0 %v2149_v47  ;;  %v2214_v47 = vunpack.c.l.s8.bf16 %v4876_v44 }
 0x497   : > { %3499 = vmatpush1.bf16.msra.mxu1 %v2151_v32  ;;  %3336 = vmatprep.subr.bf16.mxu0 %v2158_v41  ;;  %v4875_v32 = vld [vmem:[%s5977_s27 + $0xcc0] sm:$0xff]  ;;  %v2216_v41 = vunpack.c.l.s8.bf16 %v4878_v45 }
 0x498   : > { %3500 = vmatprep.subr.bf16.mxu1 %v2160_v49  ;;  %v2213_v49 = vunpack.c.l.s8.bf16 %v4875_v32  ;;  %v2221_v58 = vunpack.c.h.s8.bf16 %v4875_v32 }
 0x49a   : > { %3337 = vmatpush1.bf16.msra.mxu0 %v2157_v52  ;;  %v2224_v52 = vunpack.c.h.s8.bf16 %v4878_v45 }
 0x49b   : > { %3501 = vmatpush1.bf16.msra.mxu1 %v2159_v53  ;;  %3347 = vmatprep.subr.bf16.mxu0 %v2166_v57  ;;  %v4884_v53 = vld [vmem:[%s5977_s27 + $0xd08] sm:$0xff]  ;;  %v4886_v57 = vld [vmem:[%s5977_s27 + $0xd18] sm:$0xff] }
 0x49c   : > { %3511 = vmatprep.subr.bf16.mxu1 %v2168_v1  ;;  %v2230_v1 = vunpack.c.l.s8.bf16 %v4884_v53  ;;  %v2238_v15 = vunpack.c.h.s8.bf16 %v4884_v53  ;;  %v2240_v17 = vunpack.c.h.s8.bf16 %v4886_v57 }
 0x49d   : > { %3339 = vmatmul.mubr.bf16.vlgmr.msra.gmra.mrb[8].mxu0 %v6511_v6 }
 0x49e   : > { %3503 = vmatmul.mubr.bf16.vlgmr.msra.gmra.mrb[8].mxu1 %v6511_v6  ;;  %3348 = vmatpush1.bf16.msra.mxu0 %v2165_v62  ;;  %v2232_v62 = vunpack.c.l.s8.bf16 %v4886_v57 }
 0x49f   : > { %3512 = vmatpush1.bf16.msra.mxu1 %v2167_v7  ;;  %3349 = vmatprep.subr.bf16.mxu0 %v2174_v8  ;;  %v4885_v7 = vld [vmem:[%s5977_s27 + $0xd10] sm:$0xff]  ;;  %v2229_v8 = vunpack.c.l.s8.bf16 %v4883_v30 }
 0x4a0   : > { %3513 = vmatprep.subr.bf16.mxu1 %v2176_v11  ;;  %v2231_v11 = vunpack.c.l.s8.bf16 %v4885_v7  ;;  %v2239_v21 = vunpack.c.h.s8.bf16 %v4885_v7 }
 0x4a2   : > { %3350 = vmatpush1.bf16.msra.mxu0 %v2173_v3  ;;  %v4892_v3 = vld [vmem:[%s5977_s27 + $0xd48] sm:$0xff] }
 0x4a3   : > { %3514 = vmatpush1.bf16.msra.mxu1 %v2175_v19  ;;  %3351 = vmatprep.subr.bf16.mxu0 %v2182_v59  ;;  %v4894_v19 = vld [vmem:[%s5977_s27 + $0xd58] sm:$0xff]  ;;  %v2237_v59 = vunpack.c.h.s8.bf16 %v4883_v30  ;;  %v2254_v18 = vunpack.c.h.s8.bf16 %v4892_v3 }
 0x4a4   : > { %3515 = vmatprep.subr.bf16.mxu1 %v2184_v25  ;;  %v2246_v25 = vunpack.c.l.s8.bf16 %v4892_v3  ;;  %v2256_v34 = vunpack.c.h.s8.bf16 %v4894_v19  ;;  %v3153_v3 = vsub.s32 5, %v6027_v12 }
 0x4a6   : > { %3352 = vmatpush1.bf16.msra.mxu0 %v2181_v27  ;;  %v2248_v27 = vunpack.c.l.s8.bf16 %v4894_v19  ;;  %v3161_v19 = vsub.s32 7, %v6027_v12 }
 0x4a7   : > { %3516 = vmatpush1.bf16.msra.mxu1 %v2183_v31  ;;  %3353 = vmatprep.subr.bf16.mxu0 %v2190_v10  ;;  %v4893_v31 = vld [vmem:[%s5977_s27 + $0xd50] sm:$0xff]  ;;  %v2245_v10 = vunpack.c.l.s8.bf16 %v4891_v26 }
 0x4a8   : > { %3517 = vmatprep.subr.bf16.mxu1 %v2192_v33  ;;  %v2247_v33 = vunpack.c.l.s8.bf16 %v4893_v31  ;;  %v2255_v37 = vunpack.c.h.s8.bf16 %v4893_v31 }
 0x4aa   : > { %3354 = vmatpush1.bf16.msra.mxu0 %v2189_v35  ;;  %v4900_v35 = vld [vmem:[%s5977_s27 + $0xd88] sm:$0xff] }
 0x4ab   : > { %3518 = vmatpush1.bf16.msra.mxu1 %v2191_v36  ;;  %3355 = vmatprep.subr.bf16.mxu0 %v2198_v56  ;;  %v4902_v36 = vld [vmem:[%s5977_s27 + $0xd98] sm:$0xff]  ;;  %v2253_v56 = vunpack.c.h.s8.bf16 %v4891_v26  ;;  %v2270_v44 = vunpack.c.h.s8.bf16 %v4900_v35 }
 0x4ac   : > { %3519 = vmatprep.subr.bf16.mxu1 %v2200_v39  ;;  %v2262_v39 = vunpack.c.l.s8.bf16 %v4900_v35  ;;  %v2272_v45 = vunpack.c.h.s8.bf16 %v4902_v36 }
 0x4ae   : > { %3356 = vmatpush1.bf16.msra.mxu0 %v2197_v60  ;;  %v2264_v60 = vunpack.c.l.s8.bf16 %v4902_v36 }
 0x4af   : > { %3520 = vmatpush1.bf16.msra.mxu1 %v2199_v51  ;;  %3357 = vmatprep.subr.bf16.mxu0 %v2206_v14  ;;  %v4901_v51 = vld [vmem:[%s5977_s27 + $0xd90] sm:$0xff]  ;;  %v2261_v14 = vunpack.c.l.s8.bf16 %v4899_v22 }
 0x4b0   : > { %3521 = vmatprep.subr.bf16.mxu1 %v2208_v42  ;;  %v2263_v42 = vunpack.c.l.s8.bf16 %v4901_v51  ;;  %v2271_v32 = vunpack.c.h.s8.bf16 %v4901_v51 }
 0x4b2   : > { %3358 = vmatpush1.bf16.msra.mxu0 %v2205_v46  ;;  %v4908_v46 = vld [vmem:[%s5977_s27 + $0xdc8] sm:$0xff] }
 0x4b3   : > { %3522 = vmatpush1.bf16.msra.mxu1 %v2207_v54  ;;  %3359 = vmatprep.subr.bf16.mxu0 %v2214_v47  ;;  %v4910_v54 = vld [vmem:[%s5977_s27 + $0xdd8] sm:$0xff]  ;;  %v2269_v47 = vunpack.c.h.s8.bf16 %v4899_v22  ;;  %v2286_v53 = vunpack.c.h.s8.bf16 %v4908_v46 }
 0x4b4   : > { %3523 = vmatprep.subr.bf16.mxu1 %v2216_v41  ;;  %v2278_v41 = vunpack.c.l.s8.bf16 %v4908_v46  ;;  %v2288_v57 = vunpack.c.h.s8.bf16 %v4910_v54 }
 0x4b6   : > { %3360 = vmatpush1.bf16.msra.mxu0 %v2213_v49  ;;  %v2280_v49 = vunpack.c.l.s8.bf16 %v4910_v54 }
 0x4b7   : > { %3524 = vmatpush1.bf16.msra.mxu1 %v2215_v50  ;;  %3361 = vmatprep.subr.bf16.mxu0 %v2222_v16  ;;  %v4909_v50 = vld [vmem:[%s5977_s27 + $0xdd0] sm:$0xff]  ;;  %v2277_v16 = vunpack.c.l.s8.bf16 %v4907_v48 }
 0x4b8   : > { %3525 = vmatprep.subr.bf16.mxu1 %v2224_v52  ;;  %v2279_v52 = vunpack.c.l.s8.bf16 %v4909_v50  ;;  %v2287_v30 = vunpack.c.h.s8.bf16 %v4909_v50 }
 0x4ba   : > { %3362 = vmatpush1.bf16.msra.mxu0 %v2221_v58  ;;  %v6544_v58 = vld [vmem:[%s5977_s27 + $0xe08] sm:$0xff] }
 0x4bb   : > { %3526 = vmatpush1.bf16.msra.mxu1 %v2223_v63  ;;  %3363 = vmatprep.subr.bf16.mxu0 %v2230_v1  ;;  %v6547_v63 = vld [vmem:[%s5977_s27 + $0xe18] sm:$0xff]  ;;  %v2285_v1 = vunpack.c.h.s8.bf16 %v4907_v48  ;;  %v4917_v48 = vld [vmem:[%s5977_s27 + $0xe10] sm:$0xff] }
 0x4bc   : > { %3527 = vmatprep.subr.bf16.mxu1 %v2232_v62  ;;  %v2294_v62 = vunpack.c.l.s8.bf16 %v6544_v58  ;;  %v2296_v7 = vunpack.c.l.s8.bf16 %v6547_v63 }
 0x4be   : > { %3364 = vmatpush1.bf16.msra.mxu0 %v2229_v8  ;;  %v3180_v8 = vld [vmem:[%s5985_s23 + $0x8] sm:$0xff] }
 0x4bf   : > { %3528 = vmatpush1.bf16.msra.mxu1 %v2231_v11  ;;  %3365 = vmatprep.subr.bf16.mxu0 %v2238_v15  ;;  %v3200_v11 = vcombine.high %v3180_v8, %v3180_v8  ;;  %v3149_v15 = vsub.s32 4, %v6027_v12 }
 0x4c0   : > { %3529 = vmatprep.subr.bf16.mxu1 %v2240_v17  ;;  %v3157_v17 = vsub.s32 6, %v6027_v12 }
 0x4c2   : > { %3366 = vmatpush1.bf16.msra.mxu0 %v2237_v59  ;;  %v3207_v59 = vrot.slane %v3180_v8, %v6036_v23  ;;  %v2304_v8 = vunpack.c.h.s8.bf16 %v6547_v63 }
 0x4c3   : > { %3530 = vmatpush1.bf16.msra.mxu1 %v2239_v21  ;;  %3367 = vmatprep.subr.bf16.mxu0 %v2246_v25  ;;  %v3214_v21 = vrot.slane %v3200_v11, %v6036_v23  ;;  %v5233_v25 = vld [vmem:[%s5983_s22] sm:$0xff]  ;;  %v4924_v11 = vld [vmem:[%s5977_s27 + $0xe48] sm:$0xff] }
 0x4c4   : > { %3531 = vmatprep.subr.bf16.mxu1 %v2248_v27  ;;  %v3150_v26 = vrot.slane %v5233_v25, %v3149_v15  ;;  %v3158_v27 = vrot.slane %v5233_v25, %v3157_v17  ;;  %v3154_v31 = vrot.slane %v5233_v25, %v3153_v3 }
 0x4c5   : > { %v3216_v35 = vcombine.high %v3214_v21, %v3214_v21 }
 0x4c6   : > { %3368 = vmatpush1.bf16.msra.mxu0 %v2245_v10  ;;  %v3162_v10 = vrot.slane %v5233_v25, %v3161_v19 }
 0x4c7   : > { %3532 = vmatpush1.bf16.msra.mxu1 %v2247_v33  ;;  %3369 = vmatprep.subr.bf16.mxu0 %v2254_v18 }
 0x4c8   : > { %3533 = vmatprep.subr.bf16.mxu1 %v2256_v34  ;;  %v3215_v34 = vcombine.high %v3207_v59, %v3207_v59 }
 0x4ca   : > { %3370 = vmatpush1.bf16.msra.mxu0 %v2253_v56 }
 0x4cb   : > { %3534 = vmatpush1.bf16.msra.mxu1 %v2255_v37  ;;  %3371 = vmatprep.subr.bf16.mxu0 %v2262_v39 }
 0x4cc   : > { %3535 = vmatprep.subr.bf16.mxu1 %v2264_v60 }
 0x4ce   : > { %3372 = vmatpush1.bf16.msra.mxu0 %v2261_v14 }
 0x4cf   : > { %3536 = vmatpush1.bf16.msra.mxu1 %v2263_v42  ;;  %3373 = vmatprep.subr.bf16.mxu0 %v2270_v44 }
 0x4d0   : > { %3537 = vmatprep.subr.bf16.mxu1 %v2272_v45 }
 0x4d2   : > { %3374 = vmatpush1.bf16.msra.mxu0 %v2269_v47 }
 0x4d3   : > { %3538 = vmatpush1.bf16.msra.mxu1 %v2271_v32  ;;  %3375 = vmatprep.subr.bf16.mxu0 %v2278_v41  ;;  %v4915_v41 = vld [vmem:[%s5977_s27 + $0xe00] sm:$0xff] }
 0x4d4   : > { %3539 = vmatprep.subr.bf16.mxu1 %v2280_v49  ;;  %v2301_v25 = vunpack.c.h.s8.bf16 %v4915_v41 }
 0x4d6   : > { %3376 = vmatpush1.bf16.msra.mxu0 %v2277_v16 }
 0x4d7   : > { %3540 = vmatpush1.bf16.msra.mxu1 %v2279_v52  ;;  %3377 = vmatprep.subr.bf16.mxu0 %v2286_v53 }
 0x4d8   : > { %3541 = vmatprep.subr.bf16.mxu1 %v2288_v57 }
 0x4da   : > { %3378 = vmatpush1.bf16.msra.mxu0 %v2285_v1  ;;  %v2293_v1 = vunpack.c.l.s8.bf16 %v4915_v41 }
 0x4db   : > { %3542 = vmatpush1.bf16.msra.mxu1 %v2287_v30  ;;  %3388 = vmatprep.subr.bf16.mxu0 %v2294_v62  ;;  %v2295_v30 = vunpack.c.l.s8.bf16 %v4917_v48 }
 0x4dc   : > { %3552 = vmatprep.subr.bf16.mxu1 %v2296_v7  ;;  %v2302_v7 = vunpack.c.h.s8.bf16 %v6544_v58  ;;  %v2310_v58 = vunpack.c.l.s8.bf16 %v4924_v11 }
 0x4f0   : > { %v2958_v33 = vpop.f32.mrb[4].mxu0  ;;  %v3122_v18 = vpop.f32.mrb[4].mxu1 }
 0x4f1   : > { %v3175_v36 = vmul.f32 %v3150_v26, %v2958_v33  ;;  %v3177_v56 = vmul.f32 %v3158_v27, %v3122_v18  ;;  %v2960_v37 = vpop.f32.mrb[5].mxu0  ;;  %v3124_v39 = vpop.f32.mrb[5].mxu1  ;;  %v2303_v26 = vunpack.c.h.s8.bf16 %v4917_v48  ;;  %v4923_v27 = vld [vmem:[%s5977_s27 + $0xe40] sm:$0xff]  ;;  %v2318_v18 = vunpack.c.h.s8.bf16 %v4924_v11 }
 0x4f2   : > { %v3176_v22 = vmul.f32 %v3154_v31, %v2960_v37  ;;  %v3178_v60 = vmul.f32 %v3162_v10, %v3124_v39  ;;  %v2962_v51 = vpop.f32.mrb[6].mxu0  ;;  %v3126_v14 = vpop.f32.mrb[6].mxu1  ;;  %v4925_v31 = vld [vmem:[%s5977_s27 + $0xe50] sm:$0xff]  ;;  %v2309_v10 = vunpack.c.l.s8.bf16 %v4923_v27 }
 0x4f3   : > { %v3229_v42 = vadd.f32 %v3207_v59, %v3175_v36  ;;  %v6567_v44 = vadd.f32 %v3214_v21, %v3177_v56  ;;  %v2963_v45 = vpop.f32.mrb[7].mxu0  ;;  %v3127_v46 = vpop.f32.mrb[7].mxu1  ;;  %v4926_v59 = vld [vmem:[%s5977_s27 + $0xe58] sm:$0xff]  ;;  %v2311_v33 = vunpack.c.l.s8.bf16 %v4925_v31  ;;  %v2317_v56 = vunpack.c.h.s8.bf16 %v4923_v27  ;;  %v4933_v51 = vld [vmem:[%s5977_s27 + $0xe90] sm:$0xff] }
 0x4f4   : > { %v3230_v54 = vadd.f32 %v3215_v34, %v3176_v22  ;;  %v3232_v47 = vadd.f32 %v3216_v35, %v3178_v60  ;;  %v2312_v63 = vunpack.c.l.s8.bf16 %v4926_v59  ;;  %v2320_v34 = vunpack.c.h.s8.bf16 %v4926_v59  ;;  %v4932_v35 = vld [vmem:[%s5977_s27 + $0xe88] sm:$0xff]  ;;  %v4934_v36 = vld [vmem:[%s5977_s27 + $0xe98] sm:$0xff]  ;;  %v4931_v60 = vld [vmem:[%s5977_s27 + $0xe80] sm:$0xff] }
 0x4f5   : > { %vm3237_vm13 = vcmp.ge.f32.partialorder %v3229_v42, 0.0  ;;  %v3245_v32 = vmul.f32 0.2, %v3229_v42  ;;  %v2319_v37 = vunpack.c.h.s8.bf16 %v4925_v31  ;;  %v2326_v39 = vunpack.c.l.s8.bf16 %v4932_v35 }
 0x4f6   : > { %vm3238_vm14 = vcmp.ge.f32.partialorder %v3230_v54, 0.0  ;;  %v3246_v49 = vmul.f32 0.2, %v3230_v54  ;;  %vm3240_vm15 = vcmp.ge.f32.partialorder %v3232_v47, 0.0  ;;  %v3248_v50 = vmul.f32 0.2, %v3232_v47 }
 0x4f7   : > { %v3253_v16 = vsel %vm3237_vm13, %v3229_v42, %v3245_v32  ;;  %v2328_v22 = vunpack.c.l.s8.bf16 %v4934_v36  ;;  %v2325_v14 = vunpack.c.l.s8.bf16 %v4931_v60  ;;  %v2327_v42 = vunpack.c.l.s8.bf16 %v4933_v51 }
 0x4f8   : > { %v3254_v52 = vsel %vm3238_vm14, %v3230_v54, %v3246_v49  ;;  %v3256_v57 = vsel %vm3240_vm15, %v3232_v47, %v3248_v50  ;;  %v6573_v62 = vpack.c.bf16 %v3253_v16, %v3253_v16  ;;  %v2334_v45 = vunpack.c.h.s8.bf16 %v4932_v35  ;;  %v4940_v54 = vld [vmem:[%s5977_s27 + $0xec8] sm:$0xff]  ;;  %v4942_v47 = vld [vmem:[%s5977_s27 + $0xed8] sm:$0xff]  ;;  %v4939_v50 = vld [vmem:[%s5977_s27 + $0xec0] sm:$0xff] }
 0x4f9   : > { %v6571_v53 = vpack.c.bf16 %v3254_v52, %v3254_v52  ;;  %v6581_v21 = vpack.c.bf16 %v3256_v57, %v3256_v57  ;;  %v2336_v46 = vunpack.c.h.s8.bf16 %v4934_v36  ;;  %v2333_v32 = vunpack.c.h.s8.bf16 %v4931_v60  ;;  %v4941_v16 = vld [vmem:[%s5977_s27 + $0xed0] sm:$0xff] }
 0x4fa   : > { %v2335_v41 = vunpack.c.h.s8.bf16 %v4933_v51  ;;  %v2342_v48 = vunpack.c.l.s8.bf16 %v4940_v54  ;;  %v2344_v49 = vunpack.c.l.s8.bf16 %v4942_v47  ;;  %v2341_v52 = vunpack.c.l.s8.bf16 %v4939_v50 }
 0x4fb   : > { %3379 = vmatprep.mubr.bf16.mxu0 %v6571_v53  ;;  %3543 = vmatprep.mubr.bf16.mxu1 %v6571_v53  ;;  %v2343_v57 = vunpack.c.l.s8.bf16 %v4941_v16  ;;  %v2349_v11 = vunpack.c.h.s8.bf16 %v4939_v50  ;;  %v2351_v59 = vunpack.c.h.s8.bf16 %v4941_v16  ;;  %vm3239_vm0 = vcmp.ge.f32.partialorder %v6567_v44, 0.0 }
 0x4fc   : > { %3380 = vmatmul.mubr.bf16.vlgmr.msra.gmra.mrb[8].mxu0 %v6573_v62  ;;  %3544 = vmatmul.mubr.bf16.vlgmr.msra.gmra.mrb[8].mxu1 %v6573_v62 }
 0x4fd   : > { %3389 = vmatpush1.bf16.msra.mxu0 %v2293_v1  ;;  %3553 = vmatpush1.bf16.msra.mxu1 %v2295_v30  ;;  %v2350_v1 = vunpack.c.h.s8.bf16 %v4940_v54  ;;  %v2352_v30 = vunpack.c.h.s8.bf16 %v4942_v47 }
 0x4fe   : > { %3420 = vmatprep.mubr.bf16.mxu0 %v6581_v21  ;;  %3584 = vmatprep.mubr.bf16.mxu1 %v6581_v21 }
 0x4ff   : > { %3390 = vmatprep.subr.bf16.mxu0 %v2302_v7  ;;  %3554 = vmatprep.subr.bf16.mxu1 %v2304_v8  ;;  %v4948_v7 = vld [vmem:[%s5977_s27 + $0xf08] sm:$0xff]  ;;  %v4950_v8 = vld [vmem:[%s5977_s27 + $0xf18] sm:$0xff] }
 0x501   : > { %3391 = vmatpush1.bf16.msra.mxu0 %v2301_v25  ;;  %3555 = vmatpush1.bf16.msra.mxu1 %v2303_v26  ;;  %v2358_v25 = vunpack.c.l.s8.bf16 %v4948_v7  ;;  %v2360_v26 = vunpack.c.l.s8.bf16 %v4950_v8 }
 0x502   : > { %3392 = vmatprep.subr.bf16.mxu0 %v2310_v58  ;;  %3556 = vmatprep.subr.bf16.mxu1 %v2312_v63  ;;  %v4947_v58 = vld [vmem:[%s5977_s27 + $0xf00] sm:$0xff]  ;;  %v4949_v63 = vld [vmem:[%s5977_s27 + $0xf10] sm:$0xff] }
 0x503   : > { %v2357_v27 = vunpack.c.l.s8.bf16 %v4947_v58  ;;  %v2359_v31 = vunpack.c.l.s8.bf16 %v4949_v63  ;;  %v2365_v35 = vunpack.c.h.s8.bf16 %v4947_v58  ;;  %v2367_v36 = vunpack.c.h.s8.bf16 %v4949_v63 }
 0x505   : > { %3393 = vmatpush1.bf16.msra.mxu0 %v2309_v10  ;;  %3557 = vmatpush1.bf16.msra.mxu1 %v2311_v33  ;;  %v2366_v10 = vunpack.c.h.s8.bf16 %v4948_v7  ;;  %v2368_v33 = vunpack.c.h.s8.bf16 %v4950_v8 }
 0x506   : > { %3394 = vmatprep.subr.bf16.mxu0 %v2318_v18  ;;  %3558 = vmatprep.subr.bf16.mxu1 %v2320_v34  ;;  %v4956_v18 = vld [vmem:[%s5977_s27 + $0xf48] sm:$0xff]  ;;  %v4958_v34 = vld [vmem:[%s5977_s27 + $0xf58] sm:$0xff] }
 0x509   : > { %3395 = vmatpush1.bf16.msra.mxu0 %v2317_v56  ;;  %3559 = vmatpush1.bf16.msra.mxu1 %v2319_v37  ;;  %v2374_v56 = vunpack.c.l.s8.bf16 %v4956_v18  ;;  %v2376_v37 = vunpack.c.l.s8.bf16 %v4958_v34 }
 0x50a   : > { %3396 = vmatprep.subr.bf16.mxu0 %v2326_v39  ;;  %3560 = vmatprep.subr.bf16.mxu1 %v2328_v22  ;;  %v4955_v39 = vld [vmem:[%s5977_s27 + $0xf40] sm:$0xff]  ;;  %v4957_v22 = vld [vmem:[%s5977_s27 + $0xf50] sm:$0xff] }
 0x50b   : > { %v2373_v60 = vunpack.c.l.s8.bf16 %v4955_v39  ;;  %v2375_v51 = vunpack.c.l.s8.bf16 %v4957_v22  ;;  %v2381_v54 = vunpack.c.h.s8.bf16 %v4955_v39  ;;  %v2383_v47 = vunpack.c.h.s8.bf16 %v4957_v22  ;;  %v4729_v22 = vld [vmem:[%s5977_s27 + $0x830] sm:$0xff] }
 0x50d   : > { %3397 = vmatpush1.bf16.msra.mxu0 %v2325_v14  ;;  %3561 = vmatpush1.bf16.msra.mxu1 %v2327_v42  ;;  %v2382_v14 = vunpack.c.h.s8.bf16 %v4956_v18  ;;  %v2384_v42 = vunpack.c.h.s8.bf16 %v4958_v34  ;;  %v4730_v18 = vld [vmem:[%s5977_s27 + $0x838] sm:$0xff] }
 0x50e   : > { %3398 = vmatprep.subr.bf16.mxu0 %v2334_v45  ;;  %3562 = vmatprep.subr.bf16.mxu1 %v2336_v46  ;;  %v4964_v45 = vld [vmem:[%s5977_s27 + $0xf88] sm:$0xff]  ;;  %v4966_v46 = vld [vmem:[%s5977_s27 + $0xf98] sm:$0xff] }
 0x511   : > { %3399 = vmatpush1.bf16.msra.mxu0 %v2333_v32  ;;  %3563 = vmatpush1.bf16.msra.mxu1 %v2335_v41  ;;  %v2390_v32 = vunpack.c.l.s8.bf16 %v4964_v45  ;;  %v2392_v41 = vunpack.c.l.s8.bf16 %v4966_v46 }
 0x512   : > { %3400 = vmatprep.subr.bf16.mxu0 %v2342_v48  ;;  %3564 = vmatprep.subr.bf16.mxu1 %v2344_v49  ;;  %v4963_v48 = vld [vmem:[%s5977_s27 + $0xf80] sm:$0xff]  ;;  %v4965_v49 = vld [vmem:[%s5977_s27 + $0xf90] sm:$0xff] }
 0x513   : > { %v2389_v50 = vunpack.c.l.s8.bf16 %v4963_v48  ;;  %v2391_v16 = vunpack.c.l.s8.bf16 %v4965_v49  ;;  %v2397_v7 = vunpack.c.h.s8.bf16 %v4963_v48  ;;  %v2399_v8 = vunpack.c.h.s8.bf16 %v4965_v49  ;;  %v4737_v49 = vld [vmem:[%s5977_s27 + $0x870] sm:$0xff] }
 0x515   : > { %3401 = vmatpush1.bf16.msra.mxu0 %v2341_v52  ;;  %3565 = vmatpush1.bf16.msra.mxu1 %v2343_v57  ;;  %v2398_v52 = vunpack.c.h.s8.bf16 %v4964_v45  ;;  %v2400_v57 = vunpack.c.h.s8.bf16 %v4966_v46  ;;  %v1924_v45 = vunpack.c.h.s8.bf16 %v4730_v18  ;;  %v4736_v46 = vld [vmem:[%s5977_s27 + $0x868] sm:$0xff] }
 0x516   : > { %3402 = vmatprep.subr.bf16.mxu0 %v2350_v1  ;;  %3566 = vmatprep.subr.bf16.mxu1 %v2352_v30  ;;  %v4972_v1 = vld [vmem:[%s5977_s27 + $0xfc8] sm:$0xff]  ;;  %v4974_v30 = vld [vmem:[%s5977_s27 + $0xfd8] sm:$0xff] }
 0x519   : > { %3403 = vmatpush1.bf16.msra.mxu0 %v2349_v11  ;;  %3567 = vmatpush1.bf16.msra.mxu1 %v2351_v59  ;;  %v2406_v11 = vunpack.c.l.s8.bf16 %v4972_v1  ;;  %v2408_v59 = vunpack.c.l.s8.bf16 %v4974_v30 }
 0x51a   : > { %3404 = vmatprep.subr.bf16.mxu0 %v2358_v25  ;;  %3568 = vmatprep.subr.bf16.mxu1 %v2360_v26  ;;  %v4971_v25 = vld [vmem:[%s5977_s27 + $0xfc0] sm:$0xff]  ;;  %v4973_v26 = vld [vmem:[%s5977_s27 + $0xfd0] sm:$0xff] }
 0x51b   : > { %v2405_v58 = vunpack.c.l.s8.bf16 %v4971_v25  ;;  %v2407_v63 = vunpack.c.l.s8.bf16 %v4973_v26  ;;  %v2413_v34 = vunpack.c.h.s8.bf16 %v4971_v25  ;;  %v4745_v25 = vld [vmem:[%s5977_s27 + $0x8b0] sm:$0xff] }
 0x51d   : > { %3405 = vmatpush1.bf16.msra.mxu0 %v2357_v27  ;;  %3569 = vmatpush1.bf16.msra.mxu1 %v2359_v31  ;;  %v2414_v27 = vunpack.c.h.s8.bf16 %v4972_v1  ;;  %v2416_v31 = vunpack.c.h.s8.bf16 %v4974_v30  ;;  %v4746_v1 = vld [vmem:[%s5977_s27 + $0x8b8] sm:$0xff] }
 0x51e   : > { %3406 = vmatprep.subr.bf16.mxu0 %v2366_v10  ;;  %3570 = vmatprep.subr.bf16.mxu1 %v2368_v33  ;;  %v3247_v10 = vmul.f32 0.2, %v6567_v44  ;;  %v4728_v33 = vld [vmem:[%s5977_s27 + $0x828] sm:$0xff] }
 0x520   : > { %v3255_v39 = vsel %vm3239_vm0, %v6567_v44, %v3247_v10  ;;  %v4754_v10 = vld [vmem:[%s5977_s27 + $0x8f8] sm:$0xff] }
 0x521   : > { %3407 = vmatpush1.bf16.msra.mxu0 %v2365_v35  ;;  %3571 = vmatpush1.bf16.msra.mxu1 %v2367_v36  ;;  %v2415_v35 = vunpack.c.h.s8.bf16 %v4973_v26  ;;  %v1914_v36 = vunpack.c.l.s8.bf16 %v4728_v33 }
 0x522   : > { %3408 = vmatprep.subr.bf16.mxu0 %v2374_v56  ;;  %3572 = vmatprep.subr.bf16.mxu1 %v2376_v37  ;;  %v1916_v56 = vunpack.c.l.s8.bf16 %v4730_v18  ;;  %v4727_v37 = vld [vmem:[%s5977_s27 + $0x820] sm:$0xff]  ;;  %v1955_v18 = vunpack.c.h.s8.bf16 %v4745_v25 }
 0x523   : > { %v1921_v44 = vunpack.c.h.s8.bf16 %v4727_v37 }
 0x525   : > { %3409 = vmatpush1.bf16.msra.mxu0 %v2373_v60  ;;  %3573 = vmatpush1.bf16.msra.mxu1 %v2375_v51  ;;  %v1913_v60 = vunpack.c.l.s8.bf16 %v4727_v37  ;;  %v6620_v51 = vpack.c.bf16 %v3255_v39, %v3255_v39 }
 0x526   : > { %3410 = vmatprep.subr.bf16.mxu0 %v2382_v14  ;;  %3574 = vmatprep.subr.bf16.mxu1 %v2384_v42  ;;  %v1915_v14 = vunpack.c.l.s8.bf16 %v4729_v22  ;;  %v1922_v42 = vunpack.c.h.s8.bf16 %v4728_v33 }
 0x529   : > { %3411 = vmatpush1.bf16.msra.mxu0 %v2381_v54  ;;  %3575 = vmatpush1.bf16.msra.mxu1 %v2383_v47  ;;  %v4738_v54 = vld [vmem:[%s5977_s27 + $0x878] sm:$0xff]  ;;  %v1923_v47 = vunpack.c.h.s8.bf16 %v4729_v22 }
 0x52a   : > { %3412 = vmatprep.subr.bf16.mxu0 %v2390_v32  ;;  %3576 = vmatprep.subr.bf16.mxu1 %v2392_v41  ;;  %v1930_v32 = vunpack.c.l.s8.bf16 %v4736_v46  ;;  %v4735_v41 = vld [vmem:[%s5977_s27 + $0x860] sm:$0xff]  ;;  %v1932_v48 = vunpack.c.l.s8.bf16 %v4738_v54 }
 0x52b   : > { %v1937_v30 = vunpack.c.h.s8.bf16 %v4735_v41 }
 0x52d   : > { %3413 = vmatpush1.bf16.msra.mxu0 %v2389_v50  ;;  %3577 = vmatpush1.bf16.msra.mxu1 %v2391_v16  ;;  %v1929_v50 = vunpack.c.l.s8.bf16 %v4735_v41  ;;  %v1931_v16 = vunpack.c.l.s8.bf16 %v4737_v49 }
 0x52e   : > { %3414 = vmatprep.subr.bf16.mxu0 %v2398_v52  ;;  %3578 = vmatprep.subr.bf16.mxu1 %v2400_v57  ;;  %v1938_v52 = vunpack.c.h.s8.bf16 %v4736_v46  ;;  %v1940_v57 = vunpack.c.h.s8.bf16 %v4738_v54 }
 0x531   : > { %3415 = vmatpush1.bf16.msra.mxu0 %v2397_v7  ;;  %3579 = vmatpush1.bf16.msra.mxu1 %v2399_v8  ;;  %v1939_v7 = vunpack.c.h.s8.bf16 %v4737_v49 }
 0x532   : > { %3416 = vmatprep.subr.bf16.mxu0 %v2406_v11  ;;  %3580 = vmatprep.subr.bf16.mxu1 %v2408_v59  ;;  %v4743_v11 = vld [vmem:[%s5977_s27 + $0x8a0] sm:$0xff]  ;;  %v1948_v59 = vunpack.c.l.s8.bf16 %v4746_v1 }
 0x533   : > { %v1945_v26 = vunpack.c.l.s8.bf16 %v4743_v11  ;;  %v1953_v33 = vunpack.c.h.s8.bf16 %v4743_v11 }
 0x535   : > { %3417 = vmatpush1.bf16.msra.mxu0 %v2405_v58  ;;  %3581 = vmatpush1.bf16.msra.mxu1 %v2407_v63  ;;  %v1947_v58 = vunpack.c.l.s8.bf16 %v4745_v25 }
 0x536   : > { %3418 = vmatprep.subr.bf16.mxu0 %v2414_v27  ;;  %3582 = vmatprep.subr.bf16.mxu1 %v2416_v31  ;;  %v1956_v27 = vunpack.c.h.s8.bf16 %v4746_v1  ;;  %v4752_v31 = vld [vmem:[%s5977_s27 + $0x8e8] sm:$0xff] }
 0x537   : > { %v1970_v22 = vunpack.c.h.s8.bf16 %v4752_v31 }
 0x539   : > { %3419 = vmatpush1.bf16.msra.mxu0 %v2413_v34  ;;  %3583 = vmatpush1.bf16.msra.mxu1 %v2415_v35  ;;  %v1962_v34 = vunpack.c.l.s8.bf16 %v4752_v31  ;;  %v4751_v35 = vld [vmem:[%s5977_s27 + $0x8e0] sm:$0xff] }
 0x53a   : > { %3593 = vmatprep.subr.bf16.mxu0 %v1914_v36  ;;  %3757 = vmatprep.subr.bf16.mxu1 %v1916_v56  ;;  %v1964_v36 = vunpack.c.l.s8.bf16 %v4754_v10  ;;  %v4753_v56 = vld [vmem:[%s5977_s27 + $0x8f0] sm:$0xff]  ;;  %v1961_v37 = vunpack.c.l.s8.bf16 %v4751_v35 }
 0x53b   : > { %v1963_v39 = vunpack.c.l.s8.bf16 %v4753_v56  ;;  %v1971_v46 = vunpack.c.h.s8.bf16 %v4753_v56 }
 0x53c   : > { %3421 = vmatmul.mubr.bf16.vlgmr.msra.gmra.mrb[8].mxu0 %v6620_v51  ;;  %3585 = vmatmul.mubr.bf16.vlgmr.msra.gmra.mrb[8].mxu1 %v6620_v51 }
 0x53d   : > { %3594 = vmatpush1.bf16.msra.mxu0 %v1913_v60  ;;  %3625 = vmatprep.mubr.bf16.mxu0 %v6416_v40  ;;  %v1972_v60 = vunpack.c.h.s8.bf16 %v4754_v10 }
 0x53e   : > { %3758 = vmatpush1.bf16.msra.mxu1 %v1915_v14  ;;  %3789 = vmatprep.mubr.bf16.mxu1 %v6416_v40  ;;  %v4744_v40 = vld [vmem:[%s5977_s27 + $0x8a8] sm:$0xff] }
 0x53f   : > { %3595 = vmatprep.subr.bf16.mxu0 %v1922_v42  ;;  %3759 = vmatprep.subr.bf16.mxu1 %v1924_v45  ;;  %v1946_v8 = vunpack.c.l.s8.bf16 %v4744_v40  ;;  %v1954_v63 = vunpack.c.h.s8.bf16 %v4744_v40  ;;  %v4760_v14 = vld [vmem:[%s5977_s27 + $0x928] sm:$0xff]  ;;  %v4762_v42 = vld [vmem:[%s5977_s27 + $0x938] sm:$0xff]  ;;  %v1969_v45 = vunpack.c.h.s8.bf16 %v4751_v35 }
 0x540   : > { %v1978_v54 = vunpack.c.l.s8.bf16 %v4760_v14  ;;  %v1986_v49 = vunpack.c.h.s8.bf16 %v4760_v14 }
 0x541   : > { %3596 = vmatpush1.bf16.msra.mxu0 %v1921_v44  ;;  %v4759_v44 = vld [vmem:[%s5977_s27 + $0x920] sm:$0xff] }
 0x542   : > { %3760 = vmatpush1.bf16.msra.mxu1 %v1923_v47  ;;  %3597 = vmatprep.subr.bf16.mxu0 %v1930_v32  ;;  %v1980_v47 = vunpack.c.l.s8.bf16 %v4762_v42  ;;  %v4761_v32 = vld [vmem:[%s5977_s27 + $0x930] sm:$0xff]  ;;  %v1977_v41 = vunpack.c.l.s8.bf16 %v4759_v44 }
 0x543   : > { %3761 = vmatprep.subr.bf16.mxu1 %v1932_v48  ;;  %v1979_v48 = vunpack.c.l.s8.bf16 %v4761_v32  ;;  %v1987_v40 = vunpack.c.h.s8.bf16 %v4761_v32 }
 0x545   : > { %3598 = vmatpush1.bf16.msra.mxu0 %v1929_v50  ;;  %v1988_v50 = vunpack.c.h.s8.bf16 %v4762_v42 }
 0x546   : > { %3762 = vmatpush1.bf16.msra.mxu1 %v1931_v16  ;;  %3599 = vmatprep.subr.bf16.mxu0 %v1938_v52  ;;  %v4768_v16 = vld [vmem:[%s5977_s27 + $0x968] sm:$0xff]  ;;  %v4770_v52 = vld [vmem:[%s5977_s27 + $0x978] sm:$0xff] }
 0x547   : > { %3763 = vmatprep.subr.bf16.mxu1 %v1940_v57  ;;  %v1985_v57 = vunpack.c.h.s8.bf16 %v4759_v44  ;;  %v1994_v1 = vunpack.c.l.s8.bf16 %v4768_v16  ;;  %v2002_v25 = vunpack.c.h.s8.bf16 %v4768_v16 }
 0x549   : > { %3600 = vmatpush1.bf16.msra.mxu0 %v1937_v30  ;;  %v4767_v30 = vld [vmem:[%s5977_s27 + $0x960] sm:$0xff] }
 0x54a   : > { %3764 = vmatpush1.bf16.msra.mxu1 %v1939_v7  ;;  %3601 = vmatprep.subr.bf16.mxu0 %v1946_v8  ;;  %v1996_v7 = vunpack.c.l.s8.bf16 %v4770_v52  ;;  %v4769_v8 = vld [vmem:[%s5977_s27 + $0x970] sm:$0xff]  ;;  %v1993_v11 = vunpack.c.l.s8.bf16 %v4767_v30 }
 0x54b   : > { %3765 = vmatprep.subr.bf16.mxu1 %v1948_v59  ;;  %v1995_v59 = vunpack.c.l.s8.bf16 %v4769_v8  ;;  %v2003_v31 = vunpack.c.h.s8.bf16 %v4769_v8 }
 0x54d   : > { %3602 = vmatpush1.bf16.msra.mxu0 %v1945_v26  ;;  %v2004_v26 = vunpack.c.h.s8.bf16 %v4770_v52 }
 0x54e   : > { %3766 = vmatpush1.bf16.msra.mxu1 %v1947_v58  ;;  %3603 = vmatprep.subr.bf16.mxu0 %v1954_v63  ;;  %v4776_v58 = vld [vmem:[%s5977_s27 + $0x9a8] sm:$0xff]  ;;  %v4778_v63 = vld [vmem:[%s5977_s27 + $0x9b8] sm:$0xff] }
 0x54f   : > { %3767 = vmatprep.subr.bf16.mxu1 %v1956_v27  ;;  %v2001_v27 = vunpack.c.h.s8.bf16 %v4767_v30  ;;  %v2010_v10 = vunpack.c.l.s8.bf16 %v4776_v58  ;;  %v2018_v56 = vunpack.c.h.s8.bf16 %v4776_v58 }
 0x551   : > { %3604 = vmatpush1.bf16.msra.mxu0 %v1953_v33  ;;  %v4775_v33 = vld [vmem:[%s5977_s27 + $0x9a0] sm:$0xff] }
 0x552   : > { %3768 = vmatpush1.bf16.msra.mxu1 %v1955_v18  ;;  %3605 = vmatprep.subr.bf16.mxu0 %v1962_v34  ;;  %v2012_v18 = vunpack.c.l.s8.bf16 %v4778_v63  ;;  %v4777_v34 = vld [vmem:[%s5977_s27 + $0x9b0] sm:$0xff]  ;;  %v2009_v35 = vunpack.c.l.s8.bf16 %v4775_v33 }
 0x553   : > { %3769 = vmatprep.subr.bf16.mxu1 %v1964_v36  ;;  %v2011_v36 = vunpack.c.l.s8.bf16 %v4777_v34  ;;  %v2019_v14 = vunpack.c.h.s8.bf16 %v4777_v34 }
 0x555   : > { %3606 = vmatpush1.bf16.msra.mxu0 %v1961_v37  ;;  %v2020_v37 = vunpack.c.h.s8.bf16 %v4778_v63 }
 0x556   : > { %3770 = vmatpush1.bf16.msra.mxu1 %v1963_v39  ;;  %3607 = vmatprep.subr.bf16.mxu0 %v1970_v22  ;;  %v4784_v39 = vld [vmem:[%s5977_s27 + $0x9e8] sm:$0xff]  ;;  %v4786_v22 = vld [vmem:[%s5977_s27 + $0x9f8] sm:$0xff] }
 0x557   : > { %3771 = vmatprep.subr.bf16.mxu1 %v1972_v60  ;;  %v2017_v60 = vunpack.c.h.s8.bf16 %v4775_v33  ;;  %v2026_v42 = vunpack.c.l.s8.bf16 %v4784_v39  ;;  %v2034_v32 = vunpack.c.h.s8.bf16 %v4784_v39  ;;  %v4807_v39 = vld [vmem:[%s5977_s27 + $0xaa0] sm:$0xff] }
 0x559   : > { %3608 = vmatpush1.bf16.msra.mxu0 %v1969_v45  ;;  %v4783_v45 = vld [vmem:[%s5977_s27 + $0x9e0] sm:$0xff] }
 0x55a   : > { %3772 = vmatpush1.bf16.msra.mxu1 %v1971_v46  ;;  %3609 = vmatprep.subr.bf16.mxu0 %v1978_v54  ;;  %v2028_v46 = vunpack.c.l.s8.bf16 %v4786_v22  ;;  %v4785_v54 = vld [vmem:[%s5977_s27 + $0x9f0] sm:$0xff]  ;;  %v2025_v44 = vunpack.c.l.s8.bf16 %v4783_v45 }
 0x55b   : > { %3773 = vmatprep.subr.bf16.mxu1 %v1980_v47  ;;  %v2027_v47 = vunpack.c.l.s8.bf16 %v4785_v54  ;;  %v2035_v16 = vunpack.c.h.s8.bf16 %v4785_v54  ;;  %v4816_v54 = vld [vmem:[%s5977_s27 + $0xae8] sm:$0xff] }
 0x55d   : > { %3610 = vmatpush1.bf16.msra.mxu0 %v1977_v41  ;;  %v2036_v41 = vunpack.c.h.s8.bf16 %v4786_v22 }
 0x55e   : > { %3774 = vmatpush1.bf16.msra.mxu1 %v1979_v48  ;;  %3611 = vmatprep.subr.bf16.mxu0 %v1986_v49  ;;  %v4792_v48 = vld [vmem:[%s5977_s27 + $0xa28] sm:$0xff]  ;;  %v4794_v49 = vld [vmem:[%s5977_s27 + $0xa38] sm:$0xff] }
 0x55f   : > { %3775 = vmatprep.subr.bf16.mxu1 %v1988_v50  ;;  %v2033_v50 = vunpack.c.h.s8.bf16 %v4783_v45  ;;  %v2042_v52 = vunpack.c.l.s8.bf16 %v4792_v48  ;;  %v2050_v8 = vunpack.c.h.s8.bf16 %v4792_v48  ;;  %v4815_v48 = vld [vmem:[%s5977_s27 + $0xae0] sm:$0xff] }
 0x561   : > { %3612 = vmatpush1.bf16.msra.mxu0 %v1985_v57  ;;  %v4791_v57 = vld [vmem:[%s5977_s27 + $0xa20] sm:$0xff] }
 0x562   : > { %3776 = vmatpush1.bf16.msra.mxu1 %v1987_v40  ;;  %3613 = vmatprep.subr.bf16.mxu0 %v1994_v1  ;;  %v2044_v40 = vunpack.c.l.s8.bf16 %v4794_v49  ;;  %v4793_v1 = vld [vmem:[%s5977_s27 + $0xa30] sm:$0xff]  ;;  %v2041_v30 = vunpack.c.l.s8.bf16 %v4791_v57 }
 0x563   : > { %3777 = vmatprep.subr.bf16.mxu1 %v1996_v7  ;;  %v2043_v7 = vunpack.c.l.s8.bf16 %v4793_v1  ;;  %v2051_v58 = vunpack.c.h.s8.bf16 %v4793_v1  ;;  %v4824_v1 = vld [vmem:[%s5977_s27 + $0xb28] sm:$0xff] }
 0x565   : > { %3614 = vmatpush1.bf16.msra.mxu0 %v1993_v11  ;;  %v4800_v11 = vld [vmem:[%s5977_s27 + $0xa68] sm:$0xff] }
 0x566   : > { %3778 = vmatpush1.bf16.msra.mxu1 %v1995_v59  ;;  %3615 = vmatprep.subr.bf16.mxu0 %v2002_v25  ;;  %v2052_v59 = vunpack.c.h.s8.bf16 %v4794_v49  ;;  %v4802_v25 = vld [vmem:[%s5977_s27 + $0xa78] sm:$0xff]  ;;  %v2058_v63 = vunpack.c.l.s8.bf16 %v4800_v11 }
 0x567   : > { %3779 = vmatprep.subr.bf16.mxu1 %v2004_v26  ;;  %v2049_v26 = vunpack.c.h.s8.bf16 %v4791_v57  ;;  %v2068_v34 = vunpack.c.h.s8.bf16 %v4802_v25  ;;  %v2098_v57 = vunpack.c.h.s8.bf16 %v4816_v54 }
 0x569   : > { %3616 = vmatpush1.bf16.msra.mxu0 %v2001_v27  ;;  %v4799_v27 = vld [vmem:[%s5977_s27 + $0xa60] sm:$0xff] }
 0x56a   : > { %3780 = vmatpush1.bf16.msra.mxu1 %v2003_v31  ;;  %3617 = vmatprep.subr.bf16.mxu0 %v2010_v10  ;;  %v2060_v31 = vunpack.c.l.s8.bf16 %v4802_v25  ;;  %v4801_v10 = vld [vmem:[%s5977_s27 + $0xa70] sm:$0xff]  ;;  %v2057_v33 = vunpack.c.l.s8.bf16 %v4799_v27 }
 0x56b   : > { %3781 = vmatprep.subr.bf16.mxu1 %v2012_v18  ;;  %v2066_v18 = vunpack.c.h.s8.bf16 %v4800_v11  ;;  %v2106_v11 = vunpack.c.l.s8.bf16 %v4824_v1 }
 0x56d   : > { %3618 = vmatpush1.bf16.msra.mxu0 %v2009_v35  ;;  %v4808_v35 = vld [vmem:[%s5977_s27 + $0xaa8] sm:$0xff] }
 0x56e   : > { %3782 = vmatpush1.bf16.msra.mxu1 %v2011_v36  ;;  %3619 = vmatprep.subr.bf16.mxu0 %v2018_v56  ;;  %v4810_v36 = vld [vmem:[%s5977_s27 + $0xab8] sm:$0xff]  ;;  %v2065_v56 = vunpack.c.h.s8.bf16 %v4799_v27  ;;  %v2082_v45 = vunpack.c.h.s8.bf16 %v4808_v35  ;;  %v2114_v27 = vunpack.c.h.s8.bf16 %v4824_v1  ;;  %v4847_v1 = vld [vmem:[%s5977_s27 + $0xbe0] sm:$0xff] }
 0x56f   : > { %3783 = vmatprep.subr.bf16.mxu1 %v2020_v37  ;;  %v2074_v37 = vunpack.c.l.s8.bf16 %v4808_v35  ;;  %v2076_v22 = vunpack.c.l.s8.bf16 %v4810_v36  ;;  %v4831_v35 = vld [vmem:[%s5977_s27 + $0xb60] sm:$0xff] }
 0x571   : > { %3620 = vmatpush1.bf16.msra.mxu0 %v2017_v60  ;;  %v4809_v60 = vld [vmem:[%s5977_s27 + $0xab0] sm:$0xff] }
 0x572   : > { %3784 = vmatpush1.bf16.msra.mxu1 %v2019_v14  ;;  %3621 = vmatprep.subr.bf16.mxu0 %v2026_v42  ;;  %v2073_v14 = vunpack.c.l.s8.bf16 %v4807_v39  ;;  %v2075_v42 = vunpack.c.l.s8.bf16 %v4809_v60 }
 0x573   : > { %3785 = vmatprep.subr.bf16.mxu1 %v2028_v46  ;;  %v2084_v46 = vunpack.c.h.s8.bf16 %v4810_v36 }
 0x575   : > { %3622 = vmatpush1.bf16.msra.mxu0 %v2025_v44  ;;  %v4818_v44 = vld [vmem:[%s5977_s27 + $0xaf8] sm:$0xff] }
 0x576   : > { %3786 = vmatpush1.bf16.msra.mxu1 %v2027_v47  ;;  %3623 = vmatprep.subr.bf16.mxu0 %v2034_v32  ;;  %v2081_v47 = vunpack.c.h.s8.bf16 %v4807_v39  ;;  %v2083_v32 = vunpack.c.h.s8.bf16 %v4809_v60  ;;  %v2092_v49 = vunpack.c.l.s8.bf16 %v4818_v44  ;;  %v4840_v60 = vld [vmem:[%s5977_s27 + $0xba8] sm:$0xff] }
 0x577   : > { %3787 = vmatprep.subr.bf16.mxu1 %v2036_v41  ;;  %v2090_v41 = vunpack.c.l.s8.bf16 %v4816_v54  ;;  %v4839_v54 = vld [vmem:[%s5977_s27 + $0xba0] sm:$0xff] }
 0x579   : > { %3624 = vmatpush1.bf16.msra.mxu0 %v2033_v50  ;;  %v4817_v50 = vld [vmem:[%s5977_s27 + $0xaf0] sm:$0xff] }
 0x57a   : > { %3788 = vmatpush1.bf16.msra.mxu1 %v2035_v16  ;;  %3634 = vmatprep.subr.bf16.mxu0 %v2042_v52  ;;  %v2089_v16 = vunpack.c.l.s8.bf16 %v4815_v48  ;;  %v2091_v52 = vunpack.c.l.s8.bf16 %v4817_v50 }
 0x57b   : > { %3798 = vmatprep.subr.bf16.mxu1 %v2044_v40  ;;  %v2100_v40 = vunpack.c.h.s8.bf16 %v4818_v44 }
 0x57c   : > { %3626 = vmatmul.mubr.bf16.vlgmr.msra.gmra.mrb[12].mxu0 %v6468_v55 }
 0x57d   : > { %3790 = vmatmul.mubr.bf16.vlgmr.msra.gmra.mrb[12].mxu1 %v6468_v55  ;;  %3635 = vmatpush1.bf16.msra.mxu0 %v2041_v30  ;;  %v2059_v55 = vunpack.c.l.s8.bf16 %v4801_v10  ;;  %v4826_v30 = vld [vmem:[%s5977_s27 + $0xb38] sm:$0xff] }
 0x57e   : > { %3666 = vmatprep.mubr.bf16.mxu0 %v6471_v0  ;;  %3799 = vmatpush1.bf16.msra.mxu1 %v2043_v7  ;;  %v2097_v7 = vunpack.c.h.s8.bf16 %v4815_v48  ;;  %v2108_v25 = vunpack.c.l.s8.bf16 %v4826_v30  ;;  %v2146_v48 = vunpack.c.h.s8.bf16 %v4840_v60 }
 0x57f   : > { %3830 = vmatprep.mubr.bf16.mxu1 %v6471_v0  ;;  %3636 = vmatprep.subr.bf16.mxu0 %v2050_v8  ;;  %v2067_v0 = vunpack.c.h.s8.bf16 %v4801_v10  ;;  %v2099_v8 = vunpack.c.h.s8.bf16 %v4817_v50  ;;  %v4832_v10 = vld [vmem:[%s5977_s27 + $0xb68] sm:$0xff] }
 0x580   : > { %3800 = vmatprep.subr.bf16.mxu1 %v2052_v59  ;;  %v4823_v59 = vld [vmem:[%s5977_s27 + $0xb20] sm:$0xff]  ;;  %v2130_v39 = vunpack.c.h.s8.bf16 %v4832_v10  ;;  %v4848_v50 = vld [vmem:[%s5977_s27 + $0xbe8] sm:$0xff] }
 0x581   : > { %3637 = vmatpush1.bf16.msra.mxu0 %v2049_v26  ;;  %v4825_v26 = vld [vmem:[%s5977_s27 + $0xb30] sm:$0xff] }
 0x582   : > { %3801 = vmatpush1.bf16.msra.mxu1 %v2051_v58  ;;  %3638 = vmatprep.subr.bf16.mxu0 %v2058_v63  ;;  %v2105_v58 = vunpack.c.l.s8.bf16 %v4823_v59  ;;  %v2107_v63 = vunpack.c.l.s8.bf16 %v4825_v26 }
 0x583   : > { %3802 = vmatprep.subr.bf16.mxu1 %v2060_v31  ;;  %v2116_v31 = vunpack.c.h.s8.bf16 %v4826_v30 }
 0x585   : > { %3639 = vmatpush1.bf16.msra.mxu0 %v2057_v33  ;;  %v4834_v33 = vld [vmem:[%s5977_s27 + $0xb78] sm:$0xff] }
 0x586   : > { %3803 = vmatpush1.bf16.msra.mxu1 %v2059_v55  ;;  %3640 = vmatprep.subr.bf16.mxu0 %v2066_v18  ;;  %v2113_v55 = vunpack.c.h.s8.bf16 %v4823_v59  ;;  %v2115_v18 = vunpack.c.h.s8.bf16 %v4825_v26  ;;  %v2124_v36 = vunpack.c.l.s8.bf16 %v4834_v33  ;;  %v2162_v59 = vunpack.c.h.s8.bf16 %v4848_v50  ;;  %v4856_v26 = vld [vmem:[%s5977_s27 + $0xc28] sm:$0xff] }
 0x587   : > { %3804 = vmatprep.subr.bf16.mxu1 %v2068_v34  ;;  %v2122_v34 = vunpack.c.l.s8.bf16 %v4832_v10  ;;  %v4855_v10 = vld [vmem:[%s5977_s27 + $0xc20] sm:$0xff] }
 0x589   : > { %3641 = vmatpush1.bf16.msra.mxu0 %v2065_v56  ;;  %v4833_v56 = vld [vmem:[%s5977_s27 + $0xb70] sm:$0xff] }
 0x58a   : > { %3805 = vmatpush1.bf16.msra.mxu1 %v2067_v0  ;;  %3642 = vmatprep.subr.bf16.mxu0 %v2074_v37  ;;  %v2121_v0 = vunpack.c.l.s8.bf16 %v4831_v35  ;;  %v2123_v37 = vunpack.c.l.s8.bf16 %v4833_v56 }
 0x58b   : > { %3806 = vmatprep.subr.bf16.mxu1 %v2076_v22  ;;  %v2132_v22 = vunpack.c.h.s8.bf16 %v4834_v33 }
 0x58d   : > { %3643 = vmatpush1.bf16.msra.mxu0 %v2073_v14  ;;  %v4842_v14 = vld [vmem:[%s5977_s27 + $0xbb8] sm:$0xff] }
 0x58e   : > { %3807 = vmatpush1.bf16.msra.mxu1 %v2075_v42  ;;  %3644 = vmatprep.subr.bf16.mxu0 %v2082_v45  ;;  %v2129_v42 = vunpack.c.h.s8.bf16 %v4831_v35  ;;  %v2131_v45 = vunpack.c.h.s8.bf16 %v4833_v56  ;;  %v2140_v44 = vunpack.c.l.s8.bf16 %v4842_v14  ;;  %v2178_v35 = vunpack.c.h.s8.bf16 %v4856_v26 }
 0x58f   : > { %3808 = vmatprep.subr.bf16.mxu1 %v2084_v46  ;;  %v2138_v46 = vunpack.c.l.s8.bf16 %v4840_v60  ;;  %v4863_v60 = vld [vmem:[%s5977_s27 + $0xc60] sm:$0xff] }
 0x591   : > { %3645 = vmatpush1.bf16.msra.mxu0 %v2081_v47  ;;  %v4841_v47 = vld [vmem:[%s5977_s27 + $0xbb0] sm:$0xff] }
 0x592   : > { %3809 = vmatpush1.bf16.msra.mxu1 %v2083_v32  ;;  %3646 = vmatprep.subr.bf16.mxu0 %v2090_v41  ;;  %v2137_v32 = vunpack.c.l.s8.bf16 %v4839_v54  ;;  %v2139_v41 = vunpack.c.l.s8.bf16 %v4841_v47 }
 0x593   : > { %3810 = vmatprep.subr.bf16.mxu1 %v2092_v49  ;;  %v2148_v49 = vunpack.c.h.s8.bf16 %v4842_v14 }
 0x595   : > { %3647 = vmatpush1.bf16.msra.mxu0 %v2089_v16  ;;  %v4850_v16 = vld [vmem:[%s5977_s27 + $0xbf8] sm:$0xff] }
 0x596   : > { %3811 = vmatpush1.bf16.msra.mxu1 %v2091_v52  ;;  %3648 = vmatprep.subr.bf16.mxu0 %v2098_v57  ;;  %v2145_v52 = vunpack.c.h.s8.bf16 %v4839_v54  ;;  %v2147_v57 = vunpack.c.h.s8.bf16 %v4841_v47  ;;  %v2156_v30 = vunpack.c.l.s8.bf16 %v4850_v16  ;;  %v4874_v47 = vld [vmem:[%s5977_s27 + $0xcb8] sm:$0xff] }
 0x597   : > { %3812 = vmatprep.subr.bf16.mxu1 %v2100_v40  ;;  %v2154_v40 = vunpack.c.l.s8.bf16 %v4848_v50  ;;  %v4873_v50 = vld [vmem:[%s5977_s27 + $0xcb0] sm:$0xff] }
 0x599   : > { %3649 = vmatpush1.bf16.msra.mxu0 %v2097_v7  ;;  %v4849_v7 = vld [vmem:[%s5977_s27 + $0xbf0] sm:$0xff] }
 0x59a   : > { %3813 = vmatpush1.bf16.msra.mxu1 %v2099_v8  ;;  %3650 = vmatprep.subr.bf16.mxu0 %v2106_v11  ;;  %v2153_v8 = vunpack.c.l.s8.bf16 %v4847_v1  ;;  %v2155_v11 = vunpack.c.l.s8.bf16 %v4849_v7 }
 0x59b   : > { %3814 = vmatprep.subr.bf16.mxu1 %v2108_v25  ;;  %v2164_v25 = vunpack.c.h.s8.bf16 %v4850_v16 }
 0x59d   : > { %3651 = vmatpush1.bf16.msra.mxu0 %v2105_v58  ;;  %v4858_v58 = vld [vmem:[%s5977_s27 + $0xc38] sm:$0xff] }
 0x59e   : > { %3815 = vmatpush1.bf16.msra.mxu1 %v2107_v63  ;;  %3652 = vmatprep.subr.bf16.mxu0 %v2114_v27  ;;  %v2161_v63 = vunpack.c.h.s8.bf16 %v4847_v1  ;;  %v2163_v27 = vunpack.c.h.s8.bf16 %v4849_v7  ;;  %v2172_v33 = vunpack.c.l.s8.bf16 %v4858_v58  ;;  %v2180_v56 = vunpack.c.h.s8.bf16 %v4858_v58  ;;  %v4880_v1 = vld [vmem:[%s5977_s27 + $0xce8] sm:$0xff] }
 0x59f   : > { %3816 = vmatprep.subr.bf16.mxu1 %v2116_v31  ;;  %v2170_v31 = vunpack.c.l.s8.bf16 %v4856_v26  ;;  %v4881_v26 = vld [vmem:[%s5977_s27 + $0xcf0] sm:$0xff] }
 0x5a1   : > { %3653 = vmatpush1.bf16.msra.mxu0 %v2113_v55  ;;  %v4857_v55 = vld [vmem:[%s5977_s27 + $0xc30] sm:$0xff] }
 0x5a2   : > { %3817 = vmatpush1.bf16.msra.mxu1 %v2115_v18  ;;  %3654 = vmatprep.subr.bf16.mxu0 %v2122_v34  ;;  %v2169_v18 = vunpack.c.l.s8.bf16 %v4855_v10  ;;  %v2171_v34 = vunpack.c.l.s8.bf16 %v4857_v55 }
 0x5a3   : > { %3818 = vmatprep.subr.bf16.mxu1 %v2124_v36  ;;  %v4864_v36 = vld [vmem:[%s5977_s27 + $0xc68] sm:$0xff] }
 0x5a5   : > { %3655 = vmatpush1.bf16.msra.mxu0 %v2121_v0  ;;  %v4866_v0 = vld [vmem:[%s5977_s27 + $0xc78] sm:$0xff] }
 0x5a6   : > { %3819 = vmatpush1.bf16.msra.mxu1 %v2123_v37  ;;  %3656 = vmatprep.subr.bf16.mxu0 %v2130_v39  ;;  %v2177_v37 = vunpack.c.h.s8.bf16 %v4855_v10  ;;  %v2179_v39 = vunpack.c.h.s8.bf16 %v4857_v55  ;;  %v2188_v14 = vunpack.c.l.s8.bf16 %v4866_v0  ;;  %v2196_v54 = vunpack.c.h.s8.bf16 %v4866_v0  ;;  %v4888_v10 = vld [vmem:[%s5977_s27 + $0xd28] sm:$0xff] }
 0x5a7   : > { %3820 = vmatprep.subr.bf16.mxu1 %v2132_v22  ;;  %v2186_v22 = vunpack.c.l.s8.bf16 %v4864_v36 }
 0x5a9   : > { %3657 = vmatpush1.bf16.msra.mxu0 %v2129_v42  ;;  %v4865_v42 = vld [vmem:[%s5977_s27 + $0xc70] sm:$0xff] }
 0x5aa   : > { %3821 = vmatpush1.bf16.msra.mxu1 %v2131_v45  ;;  %3658 = vmatprep.subr.bf16.mxu0 %v2138_v46  ;;  %v2185_v45 = vunpack.c.l.s8.bf16 %v4863_v60  ;;  %v2194_v46 = vunpack.c.h.s8.bf16 %v4864_v36 }
 0x5ab   : > { %3822 = vmatprep.subr.bf16.mxu1 %v2140_v44  ;;  %v4872_v44 = vld [vmem:[%s5977_s27 + $0xca8] sm:$0xff] }
 0x5ad   : > { %3659 = vmatpush1.bf16.msra.mxu0 %v2137_v32  ;;  %v2193_v32 = vunpack.c.h.s8.bf16 %v4863_v60  ;;  %v4896_v60 = vld [vmem:[%s5977_s27 + $0xd68] sm:$0xff] }
 0x5ae   : > { %3823 = vmatpush1.bf16.msra.mxu1 %v2139_v41  ;;  %3660 = vmatprep.subr.bf16.mxu0 %v2146_v48  ;;  %v2202_v41 = vunpack.c.l.s8.bf16 %v4872_v44  ;;  %v4871_v48 = vld [vmem:[%s5977_s27 + $0xca0] sm:$0xff] }
 0x5af   : > { %3824 = vmatprep.subr.bf16.mxu1 %v2148_v49  ;;  %v2204_v49 = vunpack.c.l.s8.bf16 %v4874_v47  ;;  %v2201_v16 = vunpack.c.l.s8.bf16 %v4871_v48  ;;  %v2209_v7 = vunpack.c.h.s8.bf16 %v4871_v48  ;;  %v4904_v48 = vld [vmem:[%s5977_s27 + $0xda8] sm:$0xff] }
 0x5b1   : > { %3661 = vmatpush1.bf16.msra.mxu0 %v2145_v52  ;;  %v2203_v52 = vunpack.c.l.s8.bf16 %v4873_v50 }
 0x5b2   : > { %3825 = vmatpush1.bf16.msra.mxu1 %v2147_v57  ;;  %3662 = vmatprep.subr.bf16.mxu0 %v2154_v40  ;;  %v2210_v57 = vunpack.c.h.s8.bf16 %v4872_v44  ;;  %v2212_v40 = vunpack.c.h.s8.bf16 %v4874_v47  ;;  %v4897_v44 = vld [vmem:[%s5977_s27 + $0xd70] sm:$0xff] }
 0x5b3   : > { %3826 = vmatprep.subr.bf16.mxu1 %v2156_v30  ;;  %v4882_v30 = vld [vmem:[%s5977_s27 + $0xcf8] sm:$0xff] }
 0x5b5   : > { %3663 = vmatpush1.bf16.msra.mxu0 %v2153_v8  ;;  %v2211_v8 = vunpack.c.h.s8.bf16 %v4873_v50 }
 0x5b6   : > { %3827 = vmatpush1.bf16.msra.mxu1 %v2155_v11  ;;  %3664 = vmatprep.subr.bf16.mxu0 %v2162_v59  ;;  %v2218_v11 = vunpack.c.l.s8.bf16 %v4880_v1  ;;  %v4879_v59 = vld [vmem:[%s5977_s27 + $0xce0] sm:$0xff] }
 0x5b7   : > { %3828 = vmatprep.subr.bf16.mxu1 %v2164_v25  ;;  %v2220_v25 = vunpack.c.l.s8.bf16 %v4882_v30  ;;  %v2217_v58 = vunpack.c.l.s8.bf16 %v4879_v59  ;;  %v2225_v55 = vunpack.c.h.s8.bf16 %v4879_v59  ;;  %v4912_v59 = vld [vmem:[%s5977_s27 + $0xde8] sm:$0xff] }
 0x5b9   : > { %3665 = vmatpush1.bf16.msra.mxu0 %v2161_v63  ;;  %v2219_v63 = vunpack.c.l.s8.bf16 %v4881_v26 }
 0x5ba   : > { %3829 = vmatpush1.bf16.msra.mxu1 %v2163_v27  ;;  %3675 = vmatprep.subr.bf16.mxu0 %v2170_v31  ;;  %v2226_v27 = vunpack.c.h.s8.bf16 %v4880_v1  ;;  %v2228_v31 = vunpack.c.h.s8.bf16 %v4882_v30  ;;  %v4905_v1 = vld [vmem:[%s5977_s27 + $0xdb0] sm:$0xff] }
 0x5bb   : > { %3839 = vmatprep.subr.bf16.mxu1 %v2172_v33  ;;  %v4890_v33 = vld [vmem:[%s5977_s27 + $0xd38] sm:$0xff] }
 0x5bc   : > { %3667 = vmatmul.mubr.bf16.vlgmr.msra.gmra.mrb[12].mxu0 %v6511_v6  ;;  %v2236_v36 = vunpack.c.l.s8.bf16 %v4890_v33 }
 0x5bd   : > { %3831 = vmatmul.mubr.bf16.vlgmr.msra.gmra.mrb[12].mxu1 %v6511_v6  ;;  %3676 = vmatpush1.bf16.msra.mxu0 %v2169_v18  ;;  %v2187_v6 = vunpack.c.l.s8.bf16 %v4865_v42  ;;  %v2227_v18 = vunpack.c.h.s8.bf16 %v4881_v26 }
 0x5be   : > { %3707 = vmatprep.mubr.bf16.mxu0 %v6571_v53  ;;  %3840 = vmatpush1.bf16.msra.mxu1 %v2171_v34  ;;  %v2234_v34 = vunpack.c.l.s8.bf16 %v4888_v10 }
 0x5bf   : > { %3871 = vmatprep.mubr.bf16.mxu1 %v6571_v53  ;;  %3677 = vmatprep.subr.bf16.mxu0 %v2178_v35  ;;  %v2195_v53 = vunpack.c.h.s8.bf16 %v4865_v42  ;;  %v4887_v35 = vld [vmem:[%s5977_s27 + $0xd20] sm:$0xff] }
 0x5c0   : > { %3841 = vmatprep.subr.bf16.mxu1 %v2180_v56  ;;  %v4889_v56 = vld [vmem:[%s5977_s27 + $0xd30] sm:$0xff]  ;;  %v2233_v0 = vunpack.c.l.s8.bf16 %v4887_v35  ;;  %v2241_v42 = vunpack.c.h.s8.bf16 %v4887_v35  ;;  %v4920_v35 = vld [vmem:[%s5977_s27 + $0xe28] sm:$0xff] }
 0x5c1   : > { %3678 = vmatpush1.bf16.msra.mxu0 %v2177_v37  ;;  %v2235_v37 = vunpack.c.l.s8.bf16 %v4889_v56 }
 0x5c2   : > { %3842 = vmatpush1.bf16.msra.mxu1 %v2179_v39  ;;  %3679 = vmatprep.subr.bf16.mxu0 %v2186_v22  ;;  %v2242_v39 = vunpack.c.h.s8.bf16 %v4888_v10  ;;  %v2244_v22 = vunpack.c.h.s8.bf16 %v4890_v33  ;;  %v4913_v10 = vld [vmem:[%s5977_s27 + $0xdf0] sm:$0xff] }
 0x5c3   : > { %3843 = vmatprep.subr.bf16.mxu1 %v2188_v14  ;;  %v4898_v14 = vld [vmem:[%s5977_s27 + $0xd78] sm:$0xff] }
 0x5c5   : > { %3680 = vmatpush1.bf16.msra.mxu0 %v2185_v45  ;;  %v2243_v45 = vunpack.c.h.s8.bf16 %v4889_v56 }
 0x5c6   : > { %3844 = vmatpush1.bf16.msra.mxu1 %v2187_v6  ;;  %3681 = vmatprep.subr.bf16.mxu0 %v2194_v46  ;;  %v2250_v6 = vunpack.c.l.s8.bf16 %v4896_v60  ;;  %v4895_v46 = vld [vmem:[%s5977_s27 + $0xd60] sm:$0xff] }
 0x5c7   : > { %3845 = vmatprep.subr.bf16.mxu1 %v2196_v54  ;;  %v2252_v54 = vunpack.c.l.s8.bf16 %v4898_v14  ;;  %v2249_v47 = vunpack.c.l.s8.bf16 %v4895_v46  ;;  %v2257_v50 = vunpack.c.h.s8.bf16 %v4895_v46 }
 0x5c9   : > { %3682 = vmatpush1.bf16.msra.mxu0 %v2193_v32  ;;  %v2251_v32 = vunpack.c.l.s8.bf16 %v4897_v44 }
 0x5ca   : > { %3846 = vmatpush1.bf16.msra.mxu1 %v2195_v53  ;;  %3683 = vmatprep.subr.bf16.mxu0 %v2202_v41  ;;  %v2258_v53 = vunpack.c.h.s8.bf16 %v4896_v60  ;;  %v2260_v41 = vunpack.c.h.s8.bf16 %v4898_v14  ;;  %v4921_v60 = vld [vmem:[%s5977_s27 + $0xe30] sm:$0xff] }
 0x5cb   : > { %3847 = vmatprep.subr.bf16.mxu1 %v2204_v49  ;;  %v4906_v49 = vld [vmem:[%s5977_s27 + $0xdb8] sm:$0xff] }
 0x5cd   : > { %3684 = vmatpush1.bf16.msra.mxu0 %v2201_v16  ;;  %v2259_v16 = vunpack.c.h.s8.bf16 %v4897_v44 }
 0x5ce   : > { %3848 = vmatpush1.bf16.msra.mxu1 %v2203_v52  ;;  %3685 = vmatprep.subr.bf16.mxu0 %v2210_v57  ;;  %v2266_v52 = vunpack.c.l.s8.bf16 %v4904_v48  ;;  %v4903_v57 = vld [vmem:[%s5977_s27 + $0xda0] sm:$0xff] }
 0x5cf   : > { %3849 = vmatprep.subr.bf16.mxu1 %v2212_v40  ;;  %v2268_v40 = vunpack.c.l.s8.bf16 %v4906_v49  ;;  %v2265_v30 = vunpack.c.l.s8.bf16 %v4903_v57  ;;  %v2273_v26 = vunpack.c.h.s8.bf16 %v4903_v57  ;;  %v4938_v57 = vld [vmem:[%s5977_s27 + $0xeb8] sm:$0xff] }
 0x5d1   : > { %3686 = vmatpush1.bf16.msra.mxu0 %v2209_v7  ;;  %v2267_v7 = vunpack.c.l.s8.bf16 %v4905_v1 }
 0x5d2   : > { %3850 = vmatpush1.bf16.msra.mxu1 %v2211_v8  ;;  %3687 = vmatprep.subr.bf16.mxu0 %v2218_v11  ;;  %v2274_v8 = vunpack.c.h.s8.bf16 %v4904_v48  ;;  %v2276_v11 = vunpack.c.h.s8.bf16 %v4906_v49  ;;  %v4929_v48 = vld [vmem:[%s5977_s27 + $0xe70] sm:$0xff] }
 0x5d3   : > { %3851 = vmatprep.subr.bf16.mxu1 %v2220_v25  ;;  %v4914_v25 = vld [vmem:[%s5977_s27 + $0xdf8] sm:$0xff] }
 0x5d5   : > { %3688 = vmatpush1.bf16.msra.mxu0 %v2217_v58  ;;  %v2275_v58 = vunpack.c.h.s8.bf16 %v4905_v1  ;;  %v2323_v1 = vunpack.c.h.s8.bf16 %v4929_v48 }
 0x5d6   : > { %3852 = vmatpush1.bf16.msra.mxu1 %v2219_v63  ;;  %3689 = vmatprep.subr.bf16.mxu0 %v2226_v27  ;;  %v2282_v63 = vunpack.c.l.s8.bf16 %v4912_v59  ;;  %v4911_v27 = vld [vmem:[%s5977_s27 + $0xde0] sm:$0xff] }
 0x5d7   : > { %3853 = vmatprep.subr.bf16.mxu1 %v2228_v31  ;;  %v2284_v31 = vunpack.c.l.s8.bf16 %v4914_v25  ;;  %v2281_v33 = vunpack.c.l.s8.bf16 %v4911_v27  ;;  %v2289_v56 = vunpack.c.h.s8.bf16 %v4911_v27 }
 0x5d9   : > { %3690 = vmatpush1.bf16.msra.mxu0 %v2225_v55  ;;  %v2283_v55 = vunpack.c.l.s8.bf16 %v4913_v10 }
 0x5da   : > { %3854 = vmatpush1.bf16.msra.mxu1 %v2227_v18  ;;  %3691 = vmatprep.subr.bf16.mxu0 %v2234_v34  ;;  %v2290_v18 = vunpack.c.h.s8.bf16 %v4912_v59  ;;  %v2292_v34 = vunpack.c.h.s8.bf16 %v4914_v25 }
 0x5db   : > { %3855 = vmatprep.subr.bf16.mxu1 %v2236_v36  ;;  %v4922_v36 = vld [vmem:[%s5977_s27 + $0xe38] sm:$0xff] }
 0x5dc   : > { %v2308_v46 = vunpack.c.h.s8.bf16 %v4922_v36 }
 0x5dd   : > { %3692 = vmatpush1.bf16.msra.mxu0 %v2233_v0  ;;  %v2291_v0 = vunpack.c.h.s8.bf16 %v4913_v10  ;;  %v2340_v10 = vunpack.c.h.s8.bf16 %v4938_v57 }
 0x5de   : > { %3856 = vmatpush1.bf16.msra.mxu1 %v2235_v37  ;;  %3693 = vmatprep.subr.bf16.mxu0 %v2242_v39  ;;  %v2298_v37 = vunpack.c.l.s8.bf16 %v4920_v35  ;;  %v4919_v39 = vld [vmem:[%s5977_s27 + $0xe20] sm:$0xff] }
 0x5df   : > { %3857 = vmatprep.subr.bf16.mxu1 %v2244_v22  ;;  %v2300_v22 = vunpack.c.l.s8.bf16 %v4922_v36  ;;  %v2297_v14 = vunpack.c.l.s8.bf16 %v4919_v39  ;;  %v2305_v44 = vunpack.c.h.s8.bf16 %v4919_v39  ;;  %v4943_v39 = vld [vmem:[%s5977_s27 + $0xee0] sm:$0xff] }
 0x5e1   : > { %3694 = vmatpush1.bf16.msra.mxu0 %v2241_v42  ;;  %v2299_v42 = vunpack.c.l.s8.bf16 %v4921_v60 }
 0x5e2   : > { %3858 = vmatpush1.bf16.msra.mxu1 %v2243_v45  ;;  %3695 = vmatprep.subr.bf16.mxu0 %v2250_v6  ;;  %v2306_v45 = vunpack.c.h.s8.bf16 %v4920_v35  ;;  %v4928_v6 = vld [vmem:[%s5977_s27 + $0xe68] sm:$0xff] }
 0x5e3   : > { %3859 = vmatprep.subr.bf16.mxu1 %v2252_v54  ;;  %v4930_v54 = vld [vmem:[%s5977_s27 + $0xe78] sm:$0xff] }
 0x5e5   : > { %3696 = vmatpush1.bf16.msra.mxu0 %v2249_v47  ;;  %v2307_v47 = vunpack.c.h.s8.bf16 %v4921_v60 }
 0x5e6   : > { %3860 = vmatpush1.bf16.msra.mxu1 %v2251_v32  ;;  %3697 = vmatprep.subr.bf16.mxu0 %v2258_v53  ;;  %v2314_v32 = vunpack.c.l.s8.bf16 %v4928_v6  ;;  %v4927_v53 = vld [vmem:[%s5977_s27 + $0xe60] sm:$0xff] }
 0x5e7   : > { %3861 = vmatprep.subr.bf16.mxu1 %v2260_v41  ;;  %v2316_v41 = vunpack.c.l.s8.bf16 %v4930_v54  ;;  %v2313_v49 = vunpack.c.l.s8.bf16 %v4927_v53 }
 0x5e9   : > { %3698 = vmatpush1.bf16.msra.mxu0 %v2257_v50  ;;  %v2322_v50 = vunpack.c.h.s8.bf16 %v4928_v6 }
 0x5ea   : > { %3862 = vmatpush1.bf16.msra.mxu1 %v2259_v16  ;;  %3699 = vmatprep.subr.bf16.mxu0 %v2266_v52  ;;  %v2324_v16 = vunpack.c.h.s8.bf16 %v4930_v54  ;;  %v4936_v52 = vld [vmem:[%s5977_s27 + $0xea8] sm:$0xff] }
 0x5eb   : > { %3863 = vmatprep.subr.bf16.mxu1 %v2268_v40  ;;  %v4980_v40 = vld [vmem:[%s5985_s23 + $0x10] sm:$0xff] }
 0x5ec   : > { %v3977_v59 = vcombine.high %v4980_v40, %v4980_v40  ;;  %v3984_v27 = vrot.slane %v4980_v40, %v6036_v23  ;;  %v4954_v40 = vld [vmem:[%s5977_s27 + $0xf38] sm:$0xff] }
 0x5ed   : > { %3700 = vmatpush1.bf16.msra.mxu0 %v2265_v30  ;;  %v2330_v30 = vunpack.c.l.s8.bf16 %v4936_v52 }
 0x5ee   : > { %3864 = vmatpush1.bf16.msra.mxu1 %v2267_v7  ;;  %3701 = vmatprep.subr.bf16.mxu0 %v2274_v8  ;;  %v4935_v7 = vld [vmem:[%s5977_s27 + $0xea0] sm:$0xff]  ;;  %v2332_v8 = vunpack.c.l.s8.bf16 %v4938_v57  ;;  %v4952_v57 = vld [vmem:[%s5977_s27 + $0xf28] sm:$0xff] }
 0x5ef   : > { %3865 = vmatprep.subr.bf16.mxu1 %v2276_v11  ;;  %v4937_v11 = vld [vmem:[%s5977_s27 + $0xeb0] sm:$0xff]  ;;  %v2329_v25 = vunpack.c.l.s8.bf16 %v4935_v7 }
 0x5f1   : > { %3702 = vmatpush1.bf16.msra.mxu0 %v2273_v26  ;;  %v6744_v26 = vld [vmem:[%s5983_s22 + $0x8] sm:$0xff] }
 0x5f2   : > { %3866 = vmatpush1.bf16.msra.mxu1 %v2275_v58  ;;  %3703 = vmatprep.subr.bf16.mxu0 %v2282_v63  ;;  %v2331_v58 = vunpack.c.l.s8.bf16 %v4937_v11  ;;  %v2338_v63 = vunpack.c.h.s8.bf16 %v4936_v52  ;;  %v3931_v35 = vrot.slane %v6744_v26, %v6395_v38  ;;  %v3939_v36 = vrot.slane %v6744_v26, %v3145_v4 }
 0x5f3   : > { %3867 = vmatprep.subr.bf16.mxu1 %v2284_v31  ;;  %v3991_v31 = vrot.slane %v3977_v59, %v6036_v23 }
 0x5f5   : > { %3704 = vmatpush1.bf16.msra.mxu0 %v2281_v33  ;;  %v4944_v33 = vld [vmem:[%s5977_s27 + $0xee8] sm:$0xff] }
 0x5f6   : > { %3868 = vmatpush1.bf16.msra.mxu1 %v2283_v55  ;;  %3705 = vmatprep.subr.bf16.mxu0 %v2290_v18  ;;  %v3927_v55 = vrot.slane %v6744_v26, %v6443_v61  ;;  %v3935_v18 = vrot.slane %v6744_v26, %v3141_v43  ;;  %v3993_v43 = vcombine.high %v3991_v31, %v3991_v31  ;;  %v2354_v52 = vunpack.c.h.s8.bf16 %v4944_v33 }
 0x5f7   : > { %3869 = vmatprep.subr.bf16.mxu1 %v2292_v34  ;;  %v4946_v34 = vld [vmem:[%s5977_s27 + $0xef8] sm:$0xff] }
 0x5f9   : > { %3706 = vmatpush1.bf16.msra.mxu0 %v2289_v56  ;;  %v2337_v56 = vunpack.c.h.s8.bf16 %v4935_v7 }
 0x5fa   : > { %3870 = vmatpush1.bf16.msra.mxu1 %v2291_v0  ;;  %3716 = vmatprep.subr.bf16.mxu0 %v2298_v37  ;;  %v2339_v0 = vunpack.c.h.s8.bf16 %v4937_v11  ;;  %v2346_v37 = vunpack.c.l.s8.bf16 %v4944_v33  ;;  %v2353_v11 = vunpack.c.h.s8.bf16 %v4943_v39 }
 0x5fb   : > { %3880 = vmatprep.subr.bf16.mxu1 %v2300_v22 }
 0x5fc   : > { %3708 = vmatmul.mubr.bf16.vlgmr.msra.gmra.mrb[12].mxu0 %v6573_v62 }
 0x5fd   : > { %3872 = vmatmul.mubr.bf16.vlgmr.msra.gmra.mrb[12].mxu1 %v6573_v62  ;;  %3717 = vmatpush1.bf16.msra.mxu0 %v2297_v14  ;;  %v2315_v62 = vunpack.c.l.s8.bf16 %v4929_v48  ;;  %v3992_v14 = vcombine.high %v3984_v27, %v3984_v27 }
 0x5fe   : > { %3748 = vmatprep.mubr.bf16.mxu0 %v6581_v21  ;;  %3881 = vmatpush1.bf16.msra.mxu1 %v2299_v42  ;;  %v2348_v42 = vunpack.c.l.s8.bf16 %v4946_v34 }
 0x5ff   : > { %3912 = vmatprep.mubr.bf16.mxu1 %v6581_v21  ;;  %3718 = vmatprep.subr.bf16.mxu0 %v2306_v45  ;;  %v2321_v21 = vunpack.c.h.s8.bf16 %v4927_v53  ;;  %v4945_v45 = vld [vmem:[%s5977_s27 + $0xef0] sm:$0xff] }
 0x600   : > { %3882 = vmatprep.subr.bf16.mxu1 %v2308_v46  ;;  %v2355_v59 = vunpack.c.h.s8.bf16 %v4945_v45 }
 0x601   : > { %3719 = vmatpush1.bf16.msra.mxu0 %v2305_v44 }
 0x602   : > { %3883 = vmatpush1.bf16.msra.mxu1 %v2307_v47  ;;  %3720 = vmatprep.subr.bf16.mxu0 %v2314_v32 }
 0x603   : > { %3884 = vmatprep.subr.bf16.mxu1 %v2316_v41  ;;  %v2345_v41 = vunpack.c.l.s8.bf16 %v4943_v39  ;;  %v2372_v39 = vunpack.c.h.s8.bf16 %v4954_v40 }
 0x605   : > { %3721 = vmatpush1.bf16.msra.mxu0 %v2313_v49 }
 0x606   : > { %3885 = vmatpush1.bf16.msra.mxu1 %v2315_v62  ;;  %3722 = vmatprep.subr.bf16.mxu0 %v2322_v50 }
 0x607   : > { %3886 = vmatprep.subr.bf16.mxu1 %v2324_v16  ;;  %v2347_v16 = vunpack.c.l.s8.bf16 %v4945_v45 }
 0x609   : > { %3723 = vmatpush1.bf16.msra.mxu0 %v2321_v21 }
 0x60a   : > { %3887 = vmatpush1.bf16.msra.mxu1 %v2323_v1  ;;  %3724 = vmatprep.subr.bf16.mxu0 %v2330_v30  ;;  %v2356_v30 = vunpack.c.h.s8.bf16 %v4946_v34 }
 0x60b   : > { %3888 = vmatprep.subr.bf16.mxu1 %v2332_v8 }
 0x60d   : > { %3725 = vmatpush1.bf16.msra.mxu0 %v2329_v25 }
 0x60e   : > { %3889 = vmatpush1.bf16.msra.mxu1 %v2331_v58  ;;  %3726 = vmatprep.subr.bf16.mxu0 %v2338_v63  ;;  %v2362_v63 = vunpack.c.l.s8.bf16 %v4952_v57 }
 0x60f   : > { %v3422_v22 = vpop.f32.mrb[8].mxu0  ;;  %v3586_v60 = vpop.f32.mrb[8].mxu1  ;;  %3890 = vmatprep.subr.bf16.mxu1 %v2340_v10  ;;  %v4953_v10 = vld [vmem:[%s5977_s27 + $0xf30] sm:$0xff] }
 0x610   : > { %v3964_v6 = vmul.f32 %v3927_v55, %v3422_v22  ;;  %v3966_v46 = vmul.f32 %v3935_v18, %v3586_v60  ;;  %v3424_v54 = vpop.f32.mrb[9].mxu0  ;;  %v3588_v44 = vpop.f32.mrb[9].mxu1  ;;  %v4960_v22 = vld [vmem:[%s5977_s27 + $0xf68] sm:$0xff] }
 0x611   : > { %v3965_v4 = vmul.f32 %v3931_v35, %v3424_v54  ;;  %v3967_v47 = vmul.f32 %v3939_v36, %v3588_v44  ;;  %v3426_v32 = vpop.f32.mrb[10].mxu0  ;;  %v3590_v53 = vpop.f32.mrb[10].mxu1  ;;  %3727 = vmatpush1.bf16.msra.mxu0 %v2337_v56  ;;  %v4959_v54 = vld [vmem:[%s5977_s27 + $0xf60] sm:$0xff] }
 0x612   : > { %v4019_v48 = vadd.f32 %v3984_v27, %v3964_v6  ;;  %v4021_v49 = vadd.f32 %v3991_v31, %v3966_v46  ;;  %3891 = vmatpush1.bf16.msra.mxu1 %v2339_v0  ;;  %v3427_v62 = vpop.f32.mrb[11].mxu0  ;;  %v3591_v50 = vpop.f32.mrb[11].mxu1  ;;  %3728 = vmatprep.subr.bf16.mxu0 %v2346_v37  ;;  %v2364_v27 = vunpack.c.l.s8.bf16 %v4954_v40  ;;  %v4951_v31 = vld [vmem:[%s5977_s27 + $0xf20] sm:$0xff]  ;;  %v2363_v0 = vunpack.c.l.s8.bf16 %v4953_v10  ;;  %v4969_v40 = vld [vmem:[%s5977_s27 + $0xfb0] sm:$0xff] }
 0x613   : > { %v4020_v21 = vadd.f32 %v3992_v14, %v3965_v4  ;;  %v4022_v1 = vadd.f32 %v3993_v43, %v3967_v47  ;;  %3892 = vmatprep.subr.bf16.mxu1 %v2348_v42  ;;  %v2361_v35 = vunpack.c.l.s8.bf16 %v4951_v31  ;;  %v2370_v37 = vunpack.c.h.s8.bf16 %v4952_v57  ;;  %v4962_v43 = vld [vmem:[%s5977_s27 + $0xf78] sm:$0xff]  ;;  %v4961_v4 = vld [vmem:[%s5977_s27 + $0xf70] sm:$0xff] }
 0x614   : > { %v4027_v7 = vadd.f32 %v4019_v48, %v6040_v24  ;;  %v4029_v8 = vadd.f32 %v4021_v49, %v6073_v20  ;;  %v2369_v42 = vunpack.c.h.s8.bf16 %v4951_v31  ;;  %v2371_v6 = vunpack.c.h.s8.bf16 %v4953_v10  ;;  %v4968_v48 = vld [vmem:[%s5977_s27 + $0xfa8] sm:$0xff]  ;;  %v4970_v49 = vld [vmem:[%s5977_s27 + $0xfb8] sm:$0xff]  ;;  %v4977_v31 = vld [vmem:[%s5977_s27 + $0xff0] sm:$0xff] }
 0x615   : > { %v4028_v25 = vadd.f32 %v4020_v21, %v6044_v29  ;;  %v4030_v58 = vadd.f32 %v4022_v1, %v6079_v28  ;;  %3729 = vmatpush1.bf16.msra.mxu0 %v2345_v41  ;;  %v2378_v46 = vunpack.c.l.s8.bf16 %v4960_v22  ;;  %v2380_v44 = vunpack.c.l.s8.bf16 %v4962_v43 }
 0x616   : > { %vm4035_vm1 = vcmp.ge.f32.partialorder %v4027_v7, 0.0  ;;  %v4043_v33 = vmul.f32 0.2, %v4027_v7  ;;  %vm4037_vm2 = vcmp.ge.f32.partialorder %v4029_v8, 0.0  ;;  %v4045_v55 = vmul.f32 0.2, %v4029_v8  ;;  %3893 = vmatpush1.bf16.msra.mxu1 %v2347_v16  ;;  %3730 = vmatprep.subr.bf16.mxu0 %v2354_v52 }
 0x617   : > { %vm4036_vm3 = vcmp.ge.f32.partialorder %v4028_v25, 0.0  ;;  %v4044_v24 = vmul.f32 0.2, %v4028_v25  ;;  %vm4038_vm4 = vcmp.ge.f32.partialorder %v4030_v58, 0.0  ;;  %v4046_v20 = vmul.f32 0.2, %v4030_v58  ;;  %3894 = vmatprep.subr.bf16.mxu1 %v2356_v30 }
 0x618   : > { %v6770_v29 = vsel %vm4035_vm1, %v4027_v7, %v4043_v33  ;;  %v6772_v28 = vsel %vm4037_vm2, %v4029_v8, %v4045_v55  ;;  %v2377_v47 = vunpack.c.l.s8.bf16 %v4959_v54  ;;  %v2379_v32 = vunpack.c.l.s8.bf16 %v4961_v4  ;;  %v4967_v52 = vld [vmem:[%s5977_s27 + $0xfa0] sm:$0xff]  ;;  %v4976_v8 = vld [vmem:[%s5977_s27 + $0xfe8] sm:$0xff] }
 0x619   : > { %v6774_v18 = vsel %vm4036_vm3, %v4028_v25, %v4044_v24  ;;  %v6776_v34 = vsel %vm4038_vm4, %v4030_v58, %v4046_v20  ;;  %3731 = vmatpush1.bf16.msra.mxu0 %v2353_v11  ;;  %v2386_v53 = vunpack.c.h.s8.bf16 %v4960_v22  ;;  %v2388_v41 = vunpack.c.h.s8.bf16 %v4962_v43  ;;  %v4978_v11 = vld [vmem:[%s5977_s27 + $0xff8] sm:$0xff] }
 0x61a   : > { %v4067_v36 = vcombine.low %v6770_v29, %v6774_v18  ;;  %v4068_v56 = vcombine.low %v6772_v28, %v6776_v34  ;;  %3895 = vmatpush1.bf16.msra.mxu1 %v2355_v59  ;;  %3732 = vmatprep.subr.bf16.mxu0 %v2362_v63  ;;  %v2385_v62 = vunpack.c.h.s8.bf16 %v4959_v54  ;;  %v2387_v50 = vunpack.c.h.s8.bf16 %v4961_v4  ;;  %v4975_v63 = vld [vmem:[%s5977_s27 + $0xfe0] sm:$0xff] }
 0x61b   : > { %3896 = vmatprep.subr.bf16.mxu1 %v2364_v27  ;;  %v2394_v16 = vunpack.c.l.s8.bf16 %v4968_v48  ;;  %v2396_v57 = vunpack.c.l.s8.bf16 %v4970_v49  ;;  %v2393_v21 = vunpack.c.l.s8.bf16 %v4967_v52  ;;  %v2395_v1 = vunpack.c.l.s8.bf16 %v4969_v40 }
 0x61c   : > { %v4075_v60 = vrot.slane %v4067_v36, %v6036_v23  ;;  %v4082_v14 = vrot.slane %v4068_v56, %v6036_v23  ;;  %v2402_v30 = vunpack.c.h.s8.bf16 %v4968_v48  ;;  %v2404_v7 = vunpack.c.h.s8.bf16 %v4970_v49  ;;  %v4981_v36 = vld [vmem:[%s5985_s23 + $0x18] sm:$0xff] }
 0x61d   : > { %3733 = vmatpush1.bf16.msra.mxu0 %v2361_v35  ;;  %v2401_v59 = vunpack.c.h.s8.bf16 %v4967_v52  ;;  %v2403_v25 = vunpack.c.h.s8.bf16 %v4969_v40  ;;  %v2410_v58 = vunpack.c.l.s8.bf16 %v4976_v8  ;;  %v2412_v27 = vunpack.c.l.s8.bf16 %v4978_v11 }
 0x61e   : > { %v4083_v45 = vcombine.low %v4075_v60, %v4082_v14  ;;  %3897 = vmatpush1.bf16.msra.mxu1 %v2363_v0  ;;  %3734 = vmatprep.subr.bf16.mxu0 %v2370_v37  ;;  %v2409_v10 = vunpack.c.l.s8.bf16 %v4975_v63  ;;  %v2411_v33 = vunpack.c.l.s8.bf16 %v4977_v31  ;;  %v2418_v55 = vunpack.c.h.s8.bf16 %v4976_v8  ;;  %v4110_v8 = vld [vmem:[#allocation14 + $0x8] sm:$0xff] (!%p4982_p7) }
 0x61f   : > { %3898 = vmatprep.subr.bf16.mxu1 %v2372_v39  ;;  %v2420_v24 = vunpack.c.h.s8.bf16 %v4978_v11  ;;  %v2417_v20 = vunpack.c.h.s8.bf16 %v4975_v63  ;;  %v2419_v35 = vunpack.c.h.s8.bf16 %v4977_v31  ;;  %v3994_v56 = vcombine.high %v4981_v36, %v4981_v36  ;;  %v4142_v11 = vld [vmem:[#allocation14 + $0x108] sm:$0xff] (!%p4982_p7) }
 0x620   : > { %4103 = vst [vmem:[#allocation2] sm:$0xff] %v4083_v45  ;;  %v4001_v0 = vrot.slane %v4981_v36, %v6036_v23  ;;  %v3943_v37 = vrot.slane %v6744_v26, %v3149_v15  ;;  %v3951_v22 = vrot.slane %v6744_v26, %v3157_v17  ;;  %v3947_v60 = vrot.slane %v6744_v26, %v3153_v3 }
 0x621   : > { %3735 = vmatpush1.bf16.msra.mxu0 %v2369_v42  ;;  %v4008_v39 = vrot.slane %v3994_v56, %v6036_v23  ;;  %v4174_v63 = vunpack.c.l.s8.bf16 (!%p4982_p7), %v4110_v8  ;;  %v4238_v31 = vunpack.c.l.s8.bf16 (!%p4982_p7), %v4142_v11 }
 0x622   : > { %3899 = vmatpush1.bf16.msra.mxu1 %v2371_v6  ;;  %3736 = vmatprep.subr.bf16.mxu0 %v2378_v46  ;;  %v4009_v43 = vcombine.high %v4001_v0, %v4001_v0 }
 0x623   : > { %3900 = vmatprep.subr.bf16.mxu1 %v2380_v44  ;;  %v4010_v15 = vcombine.high %v4008_v39, %v4008_v39 }
 0x625   : > { %3737 = vmatpush1.bf16.msra.mxu0 %v2377_v47 }
 0x626   : > { %3901 = vmatpush1.bf16.msra.mxu1 %v2379_v32  ;;  %3738 = vmatprep.subr.bf16.mxu0 %v2386_v53 }
 0x627   : > { %3902 = vmatprep.subr.bf16.mxu1 %v2388_v41 }
 0x629   : > { %3739 = vmatpush1.bf16.msra.mxu0 %v2385_v62 }
 0x62a   : > { %3903 = vmatpush1.bf16.msra.mxu1 %v2387_v50  ;;  %3740 = vmatprep.subr.bf16.mxu0 %v2394_v16 }
 0x62b   : > { %3904 = vmatprep.subr.bf16.mxu1 %v2396_v57 }
 0x62d   : > { %3741 = vmatpush1.bf16.msra.mxu0 %v2393_v21 }
 0x62e   : > { %3905 = vmatpush1.bf16.msra.mxu1 %v2395_v1  ;;  %3742 = vmatprep.subr.bf16.mxu0 %v2402_v30 }
 0x62f   : > { %3906 = vmatprep.subr.bf16.mxu1 %v2404_v7 }
 0x631   : > { %3743 = vmatpush1.bf16.msra.mxu0 %v2401_v59  ;;  %v4109_v59 = vld [vmem:[#allocation14] sm:$0xff] (!%p4982_p7) }
 0x632   : > { %3907 = vmatpush1.bf16.msra.mxu1 %v2403_v25  ;;  %3744 = vmatprep.subr.bf16.mxu0 %v2410_v58  ;;  %v4302_v25 = vpack.c.bf16 (!%p4982_p7), %v6774_v18, %v6774_v18 }
 0x633   : > { %3908 = vmatprep.subr.bf16.mxu1 %v2412_v27  ;;  %v4176_v27 = vunpack.c.h.s8.bf16 (!%p4982_p7), %v4110_v8 }
 0x635   : > { %3745 = vmatpush1.bf16.msra.mxu0 %v2409_v10  ;;  %v4240_v10 = vunpack.c.h.s8.bf16 (!%p4982_p7), %v4142_v11 }
 0x636   : > { %3909 = vmatpush1.bf16.msra.mxu1 %v2411_v33  ;;  %3746 = vmatprep.subr.bf16.mxu0 %v2418_v55  ;;  %v4141_v33 = vld [vmem:[#allocation14 + $0x100] sm:$0xff] (!%p4982_p7)  ;;  %v4173_v55 = vunpack.c.l.s8.bf16 (!%p4982_p7), %v4109_v59 }
 0x637   : > { %3910 = vmatprep.subr.bf16.mxu1 %v2420_v24  ;;  %v4237_v24 = vunpack.c.l.s8.bf16 (!%p4982_p7), %v4141_v33  ;;  %v4239_v36 = vunpack.c.h.s8.bf16 (!%p4982_p7), %v4141_v33 }
 0x639   : > { %3747 = vmatpush1.bf16.msra.mxu0 %v2417_v20  ;;  %v4144_v20 = vld [vmem:[#allocation14 + $0x118] sm:$0xff] (!%p4982_p7) }
 0x63a   : > { %3911 = vmatpush1.bf16.msra.mxu1 %v2419_v35  ;;  %4391 = vmatprep.subr.bf16.mxu0 (!%p4982_p7), %v4238_v31  ;;  %v4175_v35 = vunpack.c.h.s8.bf16 (!%p4982_p7), %v4109_v59  ;;  %v4242_v56 = vunpack.c.l.s8.bf16 (!%p4982_p7), %v4144_v20 }
 0x63b   : > { %4309 = vmatprep.subr.bf16.mxu1 (!%p4982_p7), %v4174_v63  ;;  %v4152_v63 = vld [vmem:[#allocation14 + $0x158] sm:$0xff] (!%p4982_p7) }
 0x63c   : > { %3749 = vmatmul.mubr.bf16.vlgmr.msra.gmra.mrb[12].mxu0 %v6620_v51  ;;  %v4258_v33 = vunpack.c.l.s8.bf16 (!%p4982_p7), %v4152_v63 }
 0x63d   : > { %3913 = vmatmul.mubr.bf16.vlgmr.msra.gmra.mrb[12].mxu1 %v6620_v51  ;;  %v3955_v51 = vrot.slane %v6744_v26, %v3161_v19  ;;  %4392 = vmatpush1.bf16.msra.mxu0 (!%p4982_p7), %v4237_v24  ;;  %v4151_v24 = vld [vmem:[#allocation14 + $0x150] sm:$0xff] (!%p4982_p7) }
 0x63e   : > { %4341 = vmatprep.mubr.bf16.mxu1 (!%p4982_p7), %v4302_v25  ;;  %4310 = vmatpush1.bf16.msra.mxu1 (!%p4982_p7), %v4173_v55  ;;  %v4119_v55 = vld [vmem:[#allocation14 + $0x50] sm:$0xff] (!%p4982_p7) }
 0x63f   : > { %4311 = vmatprep.subr.bf16.mxu1 (!%p4982_p7), %v4176_v27  ;;  %4393 = vmatprep.subr.bf16.mxu0 (!%p4982_p7), %v4240_v10 }
 0x641   : > { %4394 = vmatpush1.bf16.msra.mxu0 (!%p4982_p7), %v4239_v36  ;;  %v4260_v36 = vunpack.c.h.s8.bf16 (!%p4982_p7), %v4152_v63  ;;  %v4159_v63 = vld [vmem:[#allocation14 + $0x190] sm:$0xff] (!%p4982_p7) }
 0x642   : > { %4312 = vmatpush1.bf16.msra.mxu1 (!%p4982_p7), %v4175_v35  ;;  %4395 = vmatprep.subr.bf16.mxu0 (!%p4982_p7), %v4242_v56  ;;  %v4154_v56 = vld [vmem:[#allocation14 + $0x168] sm:$0xff] (!%p4982_p7) }
 0x70f   : > { %v3750_v14 = vpop.f32.mrb[12].mxu0 }
 0x710   : > { %v3968_v42 = vmul.f32 %v3943_v37, %v3750_v14  ;;  %v3914_v45 = vpop.f32.mrb[12].mxu1  ;;  %v3752_v6 = vpop.f32.mrb[13].mxu0  ;;  %v4143_v37 = vld [vmem:[#allocation14 + $0x110] sm:$0xff] (!%p4982_p7)  ;;  %v4114_v14 = vld [vmem:[#allocation14 + $0x28] sm:$0xff] (!%p4982_p7) }
 0x711   : > { %v3970_v46 = vmul.f32 %v3951_v22, %v3914_v45  ;;  %v3969_v54 = vmul.f32 %v3947_v60, %v3752_v6  ;;  %v3916_v44 = vpop.f32.mrb[13].mxu1  ;;  %v3754_v4 = vpop.f32.mrb[14].mxu0  ;;  %v4241_v22 = vunpack.c.l.s8.bf16 (!%p4982_p7), %v4143_v37  ;;  %v4243_v45 = vunpack.c.h.s8.bf16 (!%p4982_p7), %v4143_v37 }
 0x712   : > { %v4023_v47 = vadd.f32 %v4001_v0, %v3968_v42  ;;  %v3971_v17 = vmul.f32 %v3955_v51, %v3916_v44  ;;  %v3918_v32 = vpop.f32.mrb[14].mxu1  ;;  %v3755_v53 = vpop.f32.mrb[15].mxu0  ;;  %v4111_v0 = vld [vmem:[#allocation14 + $0x10] sm:$0xff] (!%p4982_p7)  ;;  %v4244_v51 = vunpack.c.h.s8.bf16 (!%p4982_p7), %v4144_v20  ;;  %v4182_v6 = vunpack.c.l.s8.bf16 (!%p4982_p7), %v4114_v14 }
 0x713   : > { %v4025_v41 = vadd.f32 %v4008_v39, %v3970_v46  ;;  %v4024_v3 = vadd.f32 %v4009_v43, %v3969_v54  ;;  %v3919_v48 = vpop.f32.mrb[15].mxu1  ;;  %v4177_v39 = vunpack.c.l.s8.bf16 (!%p4982_p7), %v4111_v0  ;;  %v4146_v43 = vld [vmem:[#allocation14 + $0x128] sm:$0xff] (!%p4982_p7)  ;;  %4396 = vmatpush1.bf16.msra.mxu0 (!%p4982_p7), %v4241_v22  ;;  %v4179_v42 = vunpack.c.h.s8.bf16 (!%p4982_p7), %v4111_v0  ;;  %v4113_v46 = vld [vmem:[#allocation14 + $0x20] sm:$0xff] (!%p4982_p7)  ;;  %v4116_v32 = vld [vmem:[#allocation14 + $0x38] sm:$0xff] (!%p4982_p7) }
 0x714   : > { %v4031_v12 = vadd.f32 %v4023_v47, %v6127_v5  ;;  %v4026_v19 = vadd.f32 %v4010_v15, %v3971_v17  ;;  %4397 = vmatprep.subr.bf16.mxu0 (!%p4982_p7), %v4244_v51  ;;  %v4246_v15 = vunpack.c.l.s8.bf16 (!%p4982_p7), %v4146_v43  ;;  %v4145_v54 = vld [vmem:[#allocation14 + $0x120] sm:$0xff] (!%p4982_p7)  ;;  %v4181_v44 = vunpack.c.l.s8.bf16 (!%p4982_p7), %v4113_v46  ;;  %v4148_v53 = vld [vmem:[#allocation14 + $0x138] sm:$0xff] (!%p4982_p7) }
 0x715   : > { %v4033_v26 = vadd.f32 %v4025_v41, %v6180_v2  ;;  %v4032_v49 = vadd.f32 %v4024_v3, %v6133_v13  ;;  %v4245_v4 = vunpack.c.l.s8.bf16 (!%p4982_p7), %v4145_v54  ;;  %v4184_v47 = vunpack.c.h.s8.bf16 (!%p4982_p7), %v4114_v14  ;;  %v4153_v51 = vld [vmem:[#allocation14 + $0x160] sm:$0xff] (!%p4982_p7) }
 0x716   : > { %vm4039_vm5 = vcmp.ge.f32.partialorder %v4031_v12, 0.0  ;;  %v4047_v62 = vmul.f32 0.2, %v4031_v12  ;;  %v4034_v50 = vadd.f32 %v4026_v19, %v6186_v9  ;;  %v4248_v17 = vunpack.c.h.s8.bf16 (!%p4982_p7), %v4146_v43  ;;  %v4115_v19 = vld [vmem:[#allocation14 + $0x30] sm:$0xff] (!%p4982_p7) }
 0x717   : > { %vm4041_vm6 = vcmp.ge.f32.partialorder %v4033_v26, 0.0  ;;  %v4049_v16 = vmul.f32 0.2, %v4033_v26  ;;  %vm4040_vm7 = vcmp.ge.f32.partialorder %v4032_v49, 0.0  ;;  %v4048_v52 = vmul.f32 0.2, %v4032_v49  ;;  %4398 = vmatpush1.bf16.msra.mxu0 (!%p4982_p7), %v4243_v45 }
 0x718   : > { %v6817_v57 = vsel %vm4039_vm5, %v4031_v12, %v4047_v62  ;;  %vm4042_vm8 = vcmp.ge.f32.partialorder %v4034_v50, 0.0  ;;  %v4050_v40 = vmul.f32 0.2, %v4034_v50  ;;  %4399 = vmatprep.subr.bf16.mxu0 (!%p4982_p7), %v4246_v15  ;;  %v4183_v41 = vunpack.c.h.s8.bf16 (!%p4982_p7), %v4113_v46  ;;  %v4156_v15 = vld [vmem:[#allocation14 + $0x178] sm:$0xff] (!%p4982_p7) }
 0x719   : > { %v6819_v21 = vsel %vm4041_vm6, %v4033_v26, %v4049_v16  ;;  %v4056_v5 = vsel %vm4040_vm7, %v4032_v49, %v4048_v52  ;;  %v4247_v3 = vunpack.c.h.s8.bf16 (!%p4982_p7), %v4145_v54  ;;  %v4186_v48 = vunpack.c.l.s8.bf16 (!%p4982_p7), %v4116_v32  ;;  %v4147_v26 = vld [vmem:[#allocation14 + $0x130] sm:$0xff] (!%p4982_p7)  ;;  %v4118_v52 = vld [vmem:[#allocation14 + $0x48] sm:$0xff] (!%p4982_p7) }
 0x71a   : > { %v4084_v1 = vcombine.low %v6817_v57, %v4056_v5  ;;  %v6822_v2 = vsel %vm4042_vm8, %v4034_v50, %v4050_v40  ;;  %v4306_v58 = vpack.c.bf16 (!%p4982_p7), %v4056_v5, %v4056_v5  ;;  %v4250_v12 = vunpack.c.l.s8.bf16 (!%p4982_p7), %v4148_v53  ;;  %v4150_v40 = vld [vmem:[#allocation14 + $0x148] sm:$0xff] (!%p4982_p7) }
 0x71b   : > { %v4085_v13 = vcombine.low %v6819_v21, %v6822_v2  ;;  %4108 = sbr.rel (%p4982_p7) target bundleno = 2177 (0x881), region = 100  ;;  %4400 = vmatpush1.bf16.msra.mxu0 (!%p4982_p7), %v4245_v4  ;;  %v4185_v49 = vunpack.c.l.s8.bf16 (!%p4982_p7), %v4115_v19  ;;  %v4249_v62 = vunpack.c.l.s8.bf16 (!%p4982_p7), %v4147_v26  ;;  %v4188_v50 = vunpack.c.h.s8.bf16 (!%p4982_p7), %v4116_v32 }
 0x71c   : > { %v4092_v9 = vrot.slane %v4084_v1, %v6036_v23  ;;  %4423 = vmatprep.mubr.bf16.mxu0 (!%p4982_p7), %v4306_v58  ;;  %4401 = vmatprep.subr.bf16.mxu0 (!%p4982_p7), %v4248_v17  ;;  %v4252_v16 = vunpack.c.h.s8.bf16 (!%p4982_p7), %v4148_v53  ;;  %v4187_v5 = vunpack.c.h.s8.bf16 (!%p4982_p7), %v4115_v19  ;;  %v4251_v1 = vunpack.c.h.s8.bf16 (!%p4982_p7), %v4147_v26  ;;  %v4120_v58 = vld [vmem:[#allocation14 + $0x58] sm:$0xff] (!%p4982_p7)  ;;  %v4155_v17 = vld [vmem:[#allocation14 + $0x170] sm:$0xff] (!%p4982_p7) }
 0x71d   : > { %v4099_v30 = vrot.slane %v4085_v13, %v6036_v23  ;;  %v4112_v23 = vld [vmem:[#allocation14 + $0x18] sm:$0xff] (!%p4982_p7)  ;;  %v4190_v13 = vunpack.c.l.s8.bf16 (!%p4982_p7), %v4118_v52  ;;  %v4192_v59 = vunpack.c.h.s8.bf16 (!%p4982_p7), %v4118_v52  ;;  %v4256_v25 = vunpack.c.h.s8.bf16 (!%p4982_p7), %v4150_v40 }
 0x71e   : > { %v4178_v18 = vunpack.c.l.s8.bf16 (!%p4982_p7), %v4112_v23  ;;  %v4180_v60 = vunpack.c.h.s8.bf16 (!%p4982_p7), %v4112_v23  ;;  %v4194_v10 = vunpack.c.l.s8.bf16 (!%p4982_p7), %v4120_v58  ;;  %v4193_v23 = vunpack.c.l.s8.bf16 (!%p4982_p7), %v4119_v55 }
 0x71f   : > { %v4100_v7 = vcombine.low %v4092_v9, %v4099_v30  ;;  %4402 = vmatpush1.bf16.msra.mxu0 (!%p4982_p7), %v4247_v3  ;;  %v4254_v9 = vunpack.c.l.s8.bf16 (!%p4982_p7), %v4150_v40  ;;  %v4117_v30 = vld [vmem:[#allocation14 + $0x40] sm:$0xff] (!%p4982_p7)  ;;  %v4257_v20 = vunpack.c.l.s8.bf16 (!%p4982_p7), %v4151_v24  ;;  %v4196_v35 = vunpack.c.h.s8.bf16 (!%p4982_p7), %v4120_v58  ;;  %v4127_v58 = vld [vmem:[#allocation14 + $0x90] sm:$0xff] (!%p4982_p7) }
 0x720   : > { %4313 = vmatprep.subr.bf16.mxu1 (!%p4982_p7), %v4178_v18  ;;  %4403 = vmatprep.subr.bf16.mxu0 (!%p4982_p7), %v4250_v12  ;;  %v4189_v8 = vunpack.c.l.s8.bf16 (!%p4982_p7), %v4117_v30  ;;  %v4191_v27 = vunpack.c.h.s8.bf16 (!%p4982_p7), %v4117_v30  ;;  %v4122_v18 = vld [vmem:[#allocation14 + $0x68] sm:$0xff] (!%p4982_p7)  ;;  %v4195_v0 = vunpack.c.h.s8.bf16 (!%p4982_p7), %v4119_v55  ;;  %v4259_v37 = vunpack.c.h.s8.bf16 (!%p4982_p7), %v4151_v24  ;;  %v4128_v30 = vld [vmem:[#allocation14 + $0x98] sm:$0xff] (!%p4982_p7) }
 0x721   : > { %4104 = vst [vmem:[#allocation2 + $0x8] sm:$0xff] %v4100_v7  ;;  %4314 = vmatpush1.bf16.msra.mxu1 (!%p4982_p7), %v4177_v39  ;;  %v4149_v7 = vld [vmem:[#allocation14 + $0x140] sm:$0xff] (!%p4982_p7)  ;;  %v4198_v39 = vunpack.c.l.s8.bf16 (!%p4982_p7), %v4122_v18  ;;  %v4262_v22 = vunpack.c.l.s8.bf16 (!%p4982_p7), %v4154_v56  ;;  %v4261_v43 = vunpack.c.l.s8.bf16 (!%p4982_p7), %v4153_v51  ;;  %v4264_v45 = vunpack.c.h.s8.bf16 (!%p4982_p7), %v4154_v56  ;;  %v4158_v12 = vld [vmem:[#allocation14 + $0x188] sm:$0xff] (!%p4982_p7) }
 0x722   : > { %4315 = vmatprep.subr.bf16.mxu1 %v4180_v60  ;;  %v4253_v11 = vunpack.c.l.s8.bf16 %v4149_v7  ;;  %v4255_v31 = vunpack.c.h.s8.bf16 %v4149_v7  ;;  %v4121_v60 = vld [vmem:[#allocation14 + $0x60] sm:$0xff]  ;;  %v4263_v54 = vunpack.c.h.s8.bf16 %v4153_v51  ;;  %v4266_v4 = vunpack.c.l.s8.bf16 %v4156_v15  ;;  %v4160_v7 = vld [vmem:[#allocation14 + $0x198] sm:$0xff] }
 0x723   : > { %4404 = vmatpush1.bf16.msra.mxu0 %v4249_v62  ;;  %v4197_v14 = vunpack.c.l.s8.bf16 %v4121_v60  ;;  %v4199_v46 = vunpack.c.h.s8.bf16 %v4121_v60  ;;  %v4265_v53 = vunpack.c.l.s8.bf16 %v4155_v17  ;;  %v4268_v3 = vunpack.c.h.s8.bf16 %v4156_v15 }
 0x724   : > { %4405 = vmatprep.subr.bf16.mxu0 %v4252_v16  ;;  %v4267_v26 = vunpack.c.h.s8.bf16 %v4155_v17  ;;  %v4270_v62 = vunpack.c.l.s8.bf16 %v4158_v12  ;;  %v4157_v16 = vld [vmem:[#allocation14 + $0x180] sm:$0xff]  ;;  %v4301_v52 = vpack.c.bf16 %v6770_v29, %v6770_v29  ;;  %v4305_v40 = vpack.c.bf16 %v6817_v57, %v6817_v57 }
 0x725   : > { %4316 = vmatpush1.bf16.msra.mxu1 %v4179_v42  ;;  %v4200_v42 = vunpack.c.h.s8.bf16 %v4122_v18  ;;  %v4271_v57 = vunpack.c.h.s8.bf16 %v4157_v16  ;;  %v4211_v55 = vunpack.c.h.s8.bf16 %v4127_v58  ;;  %v4275_v24 = vunpack.c.h.s8.bf16 %v4159_v63 }
 0x726   : > { %4317 = vmatprep.subr.bf16.mxu1 %v4182_v6  ;;  %v4124_v6 = vld [vmem:[#allocation14 + $0x78] sm:$0xff] }
 0x727   : > { %4406 = vmatpush1.bf16.msra.mxu0 %v4251_v1  ;;  %v4269_v1 = vunpack.c.l.s8.bf16 %v4157_v16 }
 0x728   : > { %4407 = vmatprep.subr.bf16.mxu0 %v4254_v9  ;;  %v4272_v9 = vunpack.c.h.s8.bf16 %v4158_v12 }
 0x729   : > { %4318 = vmatpush1.bf16.msra.mxu1 %v4181_v44  ;;  %v4202_v44 = vunpack.c.l.s8.bf16 %v4124_v6 }
 0x72a   : > { %4319 = vmatprep.subr.bf16.mxu1 %v4184_v47  ;;  %v4123_v47 = vld [vmem:[#allocation14 + $0x70] sm:$0xff] }
 0x72b   : > { %4408 = vmatpush1.bf16.msra.mxu0 %v4253_v11  ;;  %v4201_v32 = vunpack.c.l.s8.bf16 %v4123_v47  ;;  %v4203_v19 = vunpack.c.h.s8.bf16 %v4123_v47  ;;  %v4308_v11 = vpack.c.bf16 %v6822_v2, %v6822_v2  ;;  %v4212_v2 = vunpack.c.h.s8.bf16 %v4128_v30 }
 0x72c   : > { %4409 = vmatprep.subr.bf16.mxu0 %v4256_v25  ;;  %v4274_v25 = vunpack.c.l.s8.bf16 %v4160_v7 }
 0x72d   : > { %4320 = vmatpush1.bf16.msra.mxu1 %v4183_v41  ;;  %v4204_v41 = vunpack.c.h.s8.bf16 %v4124_v6 }
 0x72e   : > { %4321 = vmatprep.subr.bf16.mxu1 %v4186_v48  ;;  %v4126_v48 = vld [vmem:[#allocation14 + $0x88] sm:$0xff] }
 0x72f   : > { %4410 = vmatpush1.bf16.msra.mxu0 %v4255_v31  ;;  %v4276_v31 = vunpack.c.h.s8.bf16 %v4160_v7 }
 0x730   : > { %4411 = vmatprep.subr.bf16.mxu0 %v4258_v33  ;;  %v4162_v33 = vld [vmem:[#allocation14 + $0x1a8] sm:$0xff] }
 0x731   : > { %4322 = vmatpush1.bf16.msra.mxu1 %v4185_v49  ;;  %v4206_v49 = vunpack.c.l.s8.bf16 %v4126_v48 }
 0x732   : > { %4323 = vmatprep.subr.bf16.mxu1 %v4188_v50  ;;  %v4125_v50 = vld [vmem:[#allocation14 + $0x80] sm:$0xff] }
 0x733   : > { %4412 = vmatpush1.bf16.msra.mxu0 %v4257_v20  ;;  %v4207_v29 = vunpack.c.h.s8.bf16 %v4125_v50  ;;  %v4278_v20 = vunpack.c.l.s8.bf16 %v4162_v33 }
 0x734   : > { %4413 = vmatprep.subr.bf16.mxu0 %v4260_v36  ;;  %v4161_v36 = vld [vmem:[#allocation14 + $0x1a0] sm:$0xff] }
 0x735   : > { %4324 = vmatpush1.bf16.msra.mxu1 %v4187_v5  ;;  %v4205_v5 = vunpack.c.l.s8.bf16 %v4125_v50  ;;  %v4277_v56 = vunpack.c.l.s8.bf16 %v4161_v36  ;;  %v4279_v51 = vunpack.c.h.s8.bf16 %v4161_v36  ;;  %v4171_v36 = vld [vmem:[#allocation14 + $0x1f0] sm:$0xff] }
 0x736   : > { %4325 = vmatprep.subr.bf16.mxu1 %v4190_v13  ;;  %v4208_v13 = vunpack.c.h.s8.bf16 %v4126_v48 }
 0x737   : > { %4414 = vmatpush1.bf16.msra.mxu0 %v4259_v37  ;;  %v4280_v37 = vunpack.c.h.s8.bf16 %v4162_v33  ;;  %v4172_v33 = vld [vmem:[#allocation14 + $0x1f8] sm:$0xff] }
 0x738   : > { %4415 = vmatprep.subr.bf16.mxu0 %v4262_v22  ;;  %v4164_v22 = vld [vmem:[#allocation14 + $0x1b8] sm:$0xff] }
 0x739   : > { %4326 = vmatpush1.bf16.msra.mxu1 %v4189_v8  ;;  %v4304_v8 = vpack.c.bf16 %v6776_v34, %v6776_v34  ;;  %v4209_v34 = vunpack.c.l.s8.bf16 %v4127_v58  ;;  %v4137_v58 = vld [vmem:[#allocation14 + $0xe0] sm:$0xff] }
 0x73a   : > { %4327 = vmatprep.subr.bf16.mxu1 %v4192_v59  ;;  %v4210_v59 = vunpack.c.l.s8.bf16 %v4128_v30 }
 0x73b   : > { %4416 = vmatpush1.bf16.msra.mxu0 %v4261_v43  ;;  %v4282_v43 = vunpack.c.l.s8.bf16 %v4164_v22 }
 0x73c   : > { %4417 = vmatprep.subr.bf16.mxu0 %v4264_v45  ;;  %v4163_v45 = vld [vmem:[#allocation14 + $0x1b0] sm:$0xff] }
 0x73d   : > { %4328 = vmatpush1.bf16.msra.mxu1 %v4191_v27  ;;  %v4273_v27 = vunpack.c.l.s8.bf16 %v4159_v63  ;;  %v4281_v15 = vunpack.c.l.s8.bf16 %v4163_v45  ;;  %v4283_v17 = vunpack.c.h.s8.bf16 %v4163_v45  ;;  %v4169_v63 = vld [vmem:[#allocation14 + $0x1e0] sm:$0xff] }
 0x73e   : > { %4329 = vmatprep.subr.bf16.mxu1 %v4194_v10  ;;  %v4130_v10 = vld [vmem:[#allocation14 + $0xa8] sm:$0xff] }
 0x73f   : > { %4418 = vmatpush1.bf16.msra.mxu0 %v4263_v54  ;;  %v4284_v54 = vunpack.c.h.s8.bf16 %v4164_v22  ;;  %v4299_v22 = vunpack.c.h.s8.bf16 %v4171_v36 }
 0x740   : > { %4419 = vmatprep.subr.bf16.mxu0 %v4266_v4  ;;  %v4166_v4 = vld [vmem:[#allocation14 + $0x1c8] sm:$0xff] }
 0x741   : > { %4330 = vmatpush1.bf16.msra.mxu1 %v4193_v23  ;;  %v4214_v23 = vunpack.c.l.s8.bf16 %v4130_v10 }
 0x742   : > { %4331 = vmatprep.subr.bf16.mxu1 %v4196_v35  ;;  %v4129_v35 = vld [vmem:[#allocation14 + $0xa0] sm:$0xff] }
 0x743   : > { %4420 = vmatpush1.bf16.msra.mxu0 %v4265_v53  ;;  %v4213_v18 = vunpack.c.l.s8.bf16 %v4129_v35  ;;  %v4215_v60 = vunpack.c.h.s8.bf16 %v4129_v35  ;;  %v4286_v53 = vunpack.c.l.s8.bf16 %v4166_v4  ;;  %v4139_v35 = vld [vmem:[#allocation14 + $0xf0] sm:$0xff] }
 0x744   : > { %4421 = vmatprep.subr.bf16.mxu0 %v4268_v3  ;;  %v4165_v3 = vld [vmem:[#allocation14 + $0x1c0] sm:$0xff] }
 0x745   : > { %4332 = vmatpush1.bf16.msra.mxu1 %v4195_v0  ;;  %v4216_v0 = vunpack.c.h.s8.bf16 %v4130_v10  ;;  %v4285_v12 = vunpack.c.l.s8.bf16 %v4165_v3  ;;  %v4287_v16 = vunpack.c.h.s8.bf16 %v4165_v3  ;;  %v4140_v10 = vld [vmem:[#allocation14 + $0xf8] sm:$0xff] }
 0x746   : > { %4333 = vmatprep.subr.bf16.mxu1 %v4198_v39  ;;  %v4132_v39 = vld [vmem:[#allocation14 + $0xb8] sm:$0xff] }
 0x747   : > { %4422 = vmatpush1.bf16.msra.mxu0 %v4267_v26  ;;  %v4288_v26 = vunpack.c.h.s8.bf16 %v4166_v4 }
 0x748   : > { %4432 = vmatprep.subr.bf16.mxu0 %v4270_v62  ;;  %v4168_v62 = vld [vmem:[#allocation14 + $0x1d8] sm:$0xff] }
 0x749   : > { %4334 = vmatpush1.bf16.msra.mxu1 %v4197_v14  ;;  %v4218_v14 = vunpack.c.l.s8.bf16 %v4132_v39  ;;  %v4292_v7 = vunpack.c.h.s8.bf16 %v4168_v62 }
 0x74a   : > { %4335 = vmatprep.subr.bf16.mxu1 %v4200_v42  ;;  %4424 = vmatmul.mubr.bf16.vlgmr.msra.gmra.mrb[0].mxu0 %v4305_v40  ;;  %v4131_v42 = vld [vmem:[#allocation14 + $0xb0] sm:$0xff]  ;;  %v4290_v40 = vunpack.c.l.s8.bf16 %v4168_v62 }
 0x74b   : > { %4433 = vmatpush1.bf16.msra.mxu0 %v4269_v1  ;;  %4464 = vmatprep.mubr.bf16.mxu0 %v4308_v11  ;;  %v4217_v6 = vunpack.c.l.s8.bf16 %v4131_v42  ;;  %v4219_v47 = vunpack.c.h.s8.bf16 %v4131_v42  ;;  %v4167_v1 = vld [vmem:[#allocation14 + $0x1d0] sm:$0xff]  ;;  %v4170_v11 = vld [vmem:[#allocation14 + $0x1e8] sm:$0xff] }
 0x74c   : > { %4434 = vmatprep.subr.bf16.mxu0 %v4272_v9  ;;  %v4289_v9 = vunpack.c.l.s8.bf16 %v4167_v1 }
 0x74d   : > { %4336 = vmatpush1.bf16.msra.mxu1 %v4199_v46  ;;  %v4220_v46 = vunpack.c.h.s8.bf16 %v4132_v39  ;;  %v4235_v39 = vunpack.c.h.s8.bf16 %v4139_v35 }
 0x74e   : > { %4337 = vmatprep.subr.bf16.mxu1 %v4202_v44  ;;  %v4134_v44 = vld [vmem:[#allocation14 + $0xc8] sm:$0xff] }
 0x74f   : > { %4435 = vmatpush1.bf16.msra.mxu0 %v4271_v57  ;;  %v4291_v57 = vunpack.c.h.s8.bf16 %v4167_v1 }
 0x750   : > { %4436 = vmatprep.subr.bf16.mxu0 %v4274_v25  ;;  %v4294_v25 = vunpack.c.l.s8.bf16 %v4170_v11 }
 0x751   : > { %4338 = vmatpush1.bf16.msra.mxu1 %v4201_v32  ;;  %v4222_v32 = vunpack.c.l.s8.bf16 %v4134_v44 }
 0x752   : > { %4339 = vmatprep.subr.bf16.mxu1 %v4204_v41  ;;  %v4133_v41 = vld [vmem:[#allocation14 + $0xc0] sm:$0xff] }
 0x753   : > { %4437 = vmatpush1.bf16.msra.mxu0 %v4273_v27  ;;  %v4221_v48 = vunpack.c.l.s8.bf16 %v4133_v41  ;;  %v4223_v50 = vunpack.c.h.s8.bf16 %v4133_v41  ;;  %v4293_v27 = vunpack.c.l.s8.bf16 %v4169_v63 }
 0x754   : > { %4438 = vmatprep.subr.bf16.mxu0 %v4276_v31  ;;  %v4296_v31 = vunpack.c.h.s8.bf16 %v4170_v11 }
 0x755   : > { %4340 = vmatpush1.bf16.msra.mxu1 %v4203_v19  ;;  %v4224_v19 = vunpack.c.h.s8.bf16 %v4134_v44 }
 0x756   : > { %4350 = vmatprep.subr.bf16.mxu1 %v4206_v49  ;;  %v4136_v49 = vld [vmem:[#allocation14 + $0xd8] sm:$0xff] }
 0x757   : > { %4439 = vmatpush1.bf16.msra.mxu0 %v4275_v24  ;;  %v4228_v30 = vunpack.c.h.s8.bf16 %v4136_v49  ;;  %v4295_v24 = vunpack.c.h.s8.bf16 %v4169_v63 }
 0x758   : > { %4342 = vmatmul.mubr.bf16.vlgmr.msra.gmra.mrb[0].mxu1 %v4301_v52  ;;  %4440 = vmatprep.subr.bf16.mxu0 %v4278_v20  ;;  %v4226_v52 = vunpack.c.l.s8.bf16 %v4136_v49  ;;  %v4298_v20 = vunpack.c.l.s8.bf16 %v4172_v33 }
 0x759   : > { %4351 = vmatpush1.bf16.msra.mxu1 %v4205_v5  ;;  %4382 = vmatprep.mubr.bf16.mxu1 %v4304_v8  ;;  %v4135_v5 = vld [vmem:[#allocation14 + $0xd0] sm:$0xff]  ;;  %v4138_v8 = vld [vmem:[#allocation14 + $0xe8] sm:$0xff] }
 0x75a   : > { %4352 = vmatprep.subr.bf16.mxu1 %v4208_v13  ;;  %v4225_v13 = vunpack.c.l.s8.bf16 %v4135_v5 }
 0x75b   : > { %4441 = vmatpush1.bf16.msra.mxu0 %v4277_v56  ;;  %v4297_v56 = vunpack.c.l.s8.bf16 %v4171_v36 }
 0x75c   : > { %4442 = vmatprep.subr.bf16.mxu0 %v4280_v37  ;;  %v4300_v37 = vunpack.c.h.s8.bf16 %v4172_v33 }
 0x75d   : > { %4353 = vmatpush1.bf16.msra.mxu1 %v4207_v29  ;;  %v4227_v29 = vunpack.c.h.s8.bf16 %v4135_v5 }
 0x75e   : > { %4354 = vmatprep.subr.bf16.mxu1 %v4210_v59  ;;  %v4230_v59 = vunpack.c.l.s8.bf16 %v4138_v8 }
 0x75f   : > { %4443 = vmatpush1.bf16.msra.mxu0 %v4279_v51  ;;  %v4307_v51 = vpack.c.bf16 %v6819_v21, %v6819_v21 }
 0x760   : > { %4444 = vmatprep.subr.bf16.mxu0 %v4282_v43  ;;  %v4487_v43 = vld [vmem:[#allocation17] sm:$0x3] }
 0x761   : > { %4355 = vmatpush1.bf16.msra.mxu1 %v4209_v34  ;;  %v4229_v34 = vunpack.c.l.s8.bf16 %v4137_v58  ;;  %v4496_v21 = vrot.slane %v4487_v43, %v6395_v38 }
 0x762   : > { %4356 = vmatprep.subr.bf16.mxu1 %v4212_v2  ;;  %v4232_v2 = vunpack.c.h.s8.bf16 %v4138_v8 }
 0x763   : > { %4445 = vmatpush1.bf16.msra.mxu0 %v4281_v15 }
 0x764   : > { %4446 = vmatprep.subr.bf16.mxu0 %v4284_v54  ;;  %v4492_v54 = vrot.slane %v4487_v43, %v6443_v61 }
 0x765   : > { %4357 = vmatpush1.bf16.msra.mxu1 %v4211_v55  ;;  %v4231_v55 = vunpack.c.h.s8.bf16 %v4137_v58 }
 0x766   : > { %4358 = vmatprep.subr.bf16.mxu1 %v4214_v23  ;;  %v4234_v23 = vunpack.c.l.s8.bf16 %v4140_v10 }
 0x767   : > { %4447 = vmatpush1.bf16.msra.mxu0 %v4283_v17 }
 0x768   : > { %4448 = vmatprep.subr.bf16.mxu0 %v4286_v53 }
 0x769   : > { %4359 = vmatpush1.bf16.msra.mxu1 %v4213_v18  ;;  %v4233_v18 = vunpack.c.l.s8.bf16 %v4139_v35 }
 0x76a   : > { %4360 = vmatprep.subr.bf16.mxu1 %v4216_v0  ;;  %v4236_v0 = vunpack.c.h.s8.bf16 %v4140_v10 }
 0x76b   : > { %4449 = vmatpush1.bf16.msra.mxu0 %v4285_v12 }
 0x76c   : > { %4450 = vmatprep.subr.bf16.mxu0 %v4288_v26 }
 0x76d   : > { %4361 = vmatpush1.bf16.msra.mxu1 %v4215_v60  ;;  %v4303_v60 = vpack.c.bf16 %v6772_v28, %v6772_v28 }
 0x76e   : > { %4362 = vmatprep.subr.bf16.mxu1 %v4218_v14  ;;  %v4473_v14 = vld [vmem:[#allocation15] sm:$0x3] }
 0x76f   : > { %4451 = vmatpush1.bf16.msra.mxu0 %v4287_v16  ;;  %v4478_v42 = vrot.slane %v4473_v14, %v6443_v61  ;;  %v4482_v15 = vrot.slane %v4473_v14, %v6395_v38 }
 0x770   : > { %4452 = vmatprep.subr.bf16.mxu0 %v4290_v40 }
 0x771   : > { %4363 = vmatpush1.bf16.msra.mxu1 %v4217_v6 }
 0x772   : > { %4364 = vmatprep.subr.bf16.mxu1 %v4220_v46 }
 0x773   : > { %4453 = vmatpush1.bf16.msra.mxu0 %v4289_v9 }
 0x774   : > { %4454 = vmatprep.subr.bf16.mxu0 %v4292_v7 }
 0x775   : > { %4365 = vmatpush1.bf16.msra.mxu1 %v4219_v47 }
 0x776   : > { %4366 = vmatprep.subr.bf16.mxu1 %v4222_v32 }
 0x777   : > { %4455 = vmatpush1.bf16.msra.mxu0 %v4291_v57 }
 0x778   : > { %4456 = vmatprep.subr.bf16.mxu0 %v4294_v25 }
 0x779   : > { %4367 = vmatpush1.bf16.msra.mxu1 %v4221_v48 }
 0x77a   : > { %4368 = vmatprep.subr.bf16.mxu1 %v4224_v19 }
 0x77b   : > { %4457 = vmatpush1.bf16.msra.mxu0 %v4293_v27 }
 0x77c   : > { %4458 = vmatprep.subr.bf16.mxu0 %v4296_v31 }
 0x77d   : > { %4369 = vmatpush1.bf16.msra.mxu1 %v4223_v50 }
 0x77e   : > { %4370 = vmatprep.subr.bf16.mxu1 %v4226_v52 }
 0x77f   : > { %4459 = vmatpush1.bf16.msra.mxu0 %v4295_v24 }
 0x780   : > { %4460 = vmatprep.subr.bf16.mxu0 %v4298_v20 }
 0x781   : > { %4371 = vmatpush1.bf16.msra.mxu1 %v4225_v13 }
 0x782   : > { %4372 = vmatprep.subr.bf16.mxu1 %v4228_v30 }
 0x783   : > { %4461 = vmatpush1.bf16.msra.mxu0 %v4297_v56 }
 0x784   : > { %4462 = vmatprep.subr.bf16.mxu0 %v4300_v37 }
 0x785   : > { %4373 = vmatpush1.bf16.msra.mxu1 %v4227_v29 }
 0x786   : > { %4374 = vmatprep.subr.bf16.mxu1 %v4230_v59 }
 0x787   : > { %4463 = vmatpush1.bf16.msra.mxu0 %v4299_v22 }
 0x789   : > { %4375 = vmatpush1.bf16.msra.mxu1 %v4229_v34 }
 0x78a   : > { %4376 = vmatprep.subr.bf16.mxu1 %v4232_v2  ;;  %4465 = vmatmul.mubr.bf16.vlgmr.msra.gmra.mrb[0].mxu0 %v4307_v51 }
 0x78d   : > { %4377 = vmatpush1.bf16.msra.mxu1 %v4231_v55 }
 0x78e   : > { %4378 = vmatprep.subr.bf16.mxu1 %v4234_v23 }
 0x791   : > { %4379 = vmatpush1.bf16.msra.mxu1 %v4233_v18 }
 0x792   : > { %4380 = vmatprep.subr.bf16.mxu1 %v4236_v0 }
 0x795   : > { %4381 = vmatpush1.bf16.msra.mxu1 %v4235_v39 }
 0x798   : > { %4383 = vmatmul.mubr.bf16.vlgmr.msra.gmra.mrb[0].mxu1 %v4303_v60 }
 0x85d   : > { %v4466_v6 = vpop.f32.mrb[0].mxu0 }
 0x85e   : > { %v4468_v28 = vpop.f32.mrb[1].mxu0 }
 0x85f   : > { %v4470_v17 = vpop.f32.mrb[2].mxu0 }
 0x860   : > { %v4471_v41 = vpop.f32.mrb[3].mxu0 }
 0x86b   : > { %v4384_v45 = vpop.f32.mrb[0].mxu1 }
 0x86c   : > { %v5087_v46 = vadd.f32 %v4466_v6, %v4384_v45  ;;  %v4386_v44 = vpop.f32.mrb[1].mxu1 }
 0x86d   : > { %v5088_v4 = vadd.f32 %v4468_v28, %v4386_v44  ;;  %v4388_v47 = vpop.f32.mrb[2].mxu1 }
 0x86e   : > { %v4485_v32 = vmul.f32 %v5087_v46, %v4478_v42  ;;  %v4389_v53 = vpop.f32.mrb[3].mxu1 }
 0x86f   : > { %v4486_v3 = vmul.f32 %v5088_v4, %v4482_v15 }
 0x870   : > { %v4499_v48 = vadd.f32 %v4492_v54, %v4485_v32 }
 0x871   : > { %v4500_v12 = vadd.f32 %v4496_v21, %v4486_v3 }
 0x872   : > { %5234 = vtanh.f32 %v4499_v48 }
 0x873   : > { %5236 = vtanh.f32 %v4500_v12 }
 0x87c   : > { %v5235_v19 = vpop.eup %5234 }
 0x87d   : > { %v5237_v26 = vpop.eup %5236 }
 0x87e   : > { %v4505_v49 = vcombine.low %v5235_v19, %v5237_v26 }
 0x880   : > { %4983 = vst.sshfl [vmem:[#allocation18] sm:$0x33 pattern:$0x76325410] %v4505_v49 }
 0x881 PF: > { %p5173_p0 = scmp.eq.s32.totalorder %s5674_s15, 4  ;;  %s5602_s26 = smov [#allocation18]  }
 0x882   : > { %s4522_s9 = sshll.u32 %s5602_s26, 4  ;;  %s4523_s9 = int_to_ptr.vmem [resolvable:$true] %s4522_s9 }
 0x883   : > { %s5496_s18 = scalar_lea.vmem %s4523_s9, 64  ;;  %p5503_p9 = scmp.lt.s32.totalorder %s4523_s9, %s4523_s9 }
 0x884   : > { %p5497_p5 = scmp.ne.s32.totalorder %s4523_s9, %s5496_s18  ;;  %p5504_p10 = scmp.lt.s32.totalorder %s5496_s18, %s5496_s18 }
 0x886   : > { %p5498_p3 = pnand %p5497_p5, %p5173_p0  ;;  %p5505_p4 = por %p5504_p10, %p5503_p9 }
 0x888   : > { %p5499_p13 = pneg %p5498_p3 }
 0x88a   : > { %p5506_p1 = pnand %p5505_p4, %p5499_p13 }
 0x88c   : > { %5509 = shalt.err (!%p5506_p1)
}
 0x88d   : > { %s6948_s1 = sld [smem:[#allocation33_spill]] }
 0x893   : > { %s5510_s11 = scalar_lea.hbm %s6948_s1, 64 }
 0x894   : > { %p5511_p11 = scmp.ne.s32.totalorder %s6948_s1, %s5510_s11  ;;  %p5516_p6 = scmp.lt.u32.totalorder %s5510_s11, %s6948_s1 }
 0x896   : > { %p5512_p8 = pnand %p5511_p11, %p5173_p0 }
 0x898   : > { %p5513_p2 = pneg %p5512_p8 }
 0x89a   : > { %p5518_p12 = pnand %p5516_p6, %p5513_p2 }
 0x89c   : > { %5521 = shalt.err (!%p5518_p12)
}
 0x89d   : > { %5128 = dma.vmem_to_hbm [thread:$0]  (%p5173_p0), %s4523_s9, 64, %s6948_s1, [#allocation5]  }
 0x89e   : > { %5563 = dma.done.wait (%p5173_p0), [#allocation5], 64  }
 0x89f   : > { %5565 = vsyncadd (%p5173_p0), [#allocation5], 4294967232 }
 0x8a0 PF: > { %s6949_s12 = sld [smem:[#allocation27_spill]]  ;;  %s6950_s21 = sld [smem:[#allocation26_spill]] }
 0x8a1   : > { %s6951_s11 = sld [smem:[#allocation28_spill]]  ;;  %s6952_s30 = smov %s5572_s10 }
 0x8a6   : > { %p26_p7 = scmp.ge.s32.totalorder %s6949_s12, 7   ;;  %s6953_s10 = smov %s6950_s21 }
 0x8a8   :  { %28 = sbr.rel (!%p26_p7) target bundleno = 15 (0xf), region = 153 }
 0x8af   :  { %4535 = vsyncpa [#allocation4], 1 }
 0x8b0   :  { %4537 = vsyncpa [#allocation4 + $0x1], 1 }
 0x8b1   :  { %4538 = vsyncpa [#allocation7], 1 }
 0x8b2   :  { %4539 = vsyncpa [#allocation10], 1 }
 0x8b3   :  { %4541 = vsyncpa [#allocation10 + $0x1], 1 }
 0x8b4   :  { %4542 = vsyncpa [#allocation13], 1 }
 0x8b5   :  { %4544 = vsyncpa [#allocation13 + $0x1], 1 }
 0x8b6   :  { %4545 = vsyncpa [#allocation16], 1 }
 0x8b7   :  { %4546 = vsyncpa [#allocation5], 1 }
 0x8b8   :  { %4548 = vsyncpa [#allocation5 + $0x1], 1 }

</bundles_post_ra>
